<compile_context>
chip_gen: v6e
topology: v6e:2x2x1
jax: 0.10.0
libtpu: 0.0.40
codegen_flags: <defaults>
</compile_context>

<pallas_src>
import functools

import jax
import jax.numpy as jnp
from jax.experimental import pallas as pl
from jax.experimental.pallas import tpu as pltpu

PAD_VALUE = -9999999.0   # pad_packed_sequence padding_value
MASK_VALUE = -99999.0    # apply_mask fill value


# ------------------------------ fused kernel ------------------------------

def fused_pointer_kernel(*refs, hidden_size, num_layers, apply_mask):
    H, L = hidden_size, num_layers
    H3, H4, H8 = 3 * H, 4 * H, 8 * H

    x_ref, mask2_ref, mask_bt_ref, h0_ref, c0_ref = refs[:5]
    idx = 5
    wx_refs, wh_refs, b_refs = [], [], []
    for _ in range(L):                               # per layer, both dirs fused along N
        wx_refs.append(refs[idx])                    # (Din, 8H) bf16
        wh_refs.append(refs[idx + 1])                # (H,  8H) bf16
        b_refs.append(refs[idx + 2])                 # (1,  8H) f32
        idx += 3
    w_attn_ref = refs[idx]; v_ref = refs[idx + 1]; idx += 2
    out_ref = refs[idx]; idx += 1
    bufs = list(refs[idx:])                          # 2L VMEM buffers, each (T, B, H) f32

    T, B, E = x_ref.shape

    # Hoisted per-timestep validity masks, shared across all layers/directions.
    # keeps[i] rows [:B] gate forward time i, rows [B:] gate backward time T-1-i.
    keeps = [mask2_ref[i] > 0.0 for i in range(T)]   # each (2B, 1) bool

    # ---- stacked bidirectional LSTM (packed-sequence semantics via masks) ----
    # dropout is train-only in the torch module -> omitted (eval forward).
    for layer in range(L):
        # Batched input-side projection for ALL timesteps: one big MXU push with
        # M = T*B, bias folded in.  Columns [:4H] = forward dir, [4H:] = backward.
        if layer == 0:
            slab = x_ref[...].reshape(T * B, E)                       # bf16
        else:
            slab = jnp.concatenate([bufs[2 * (layer - 1)][...],
                                    bufs[2 * (layer - 1) + 1][...]],
                                   axis=-1).reshape(T * B, 2 * H)
            slab = slab.astype(jnp.bfloat16)
        pre = jnp.dot(slab, wx_refs[layer][...],
                      preferred_element_type=jnp.float32) + b_refs[layer][...]
        pre = pre.reshape(T, B, H8)                                   # (T, B, 8H) f32

        w_h = wh_refs[layer][...]          # (H, 8H) bf16: [W_hh_fwd | W_hh_bwd]
        h_st = h0_ref[layer]               # (2B, H) f32, rows [:B]=fwd, [B:]=bwd
        c_st = c0_ref[layer]
        out_f = bufs[2 * layer]
        out_b = bufs[2 * layer + 1]

        for i in range(T):                 # fully unrolled; both directions per step
            t = i                          # forward time index
            tb = T - 1 - i                 # backward time index
            # Single fused recurrent MXU push for both directions.
            r = jnp.dot(h_st.astype(jnp.bfloat16), w_h,
                        preferred_element_type=jnp.float32)           # (2B, 8H)
            g_f = pre[t, :, 0:H4] + r[0:B, 0:H4]                      # (B, 4H)
            g_b = pre[tb, :, H4:H8] + r[B:2 * B, H4:H8]               # (B, 4H)
            gates = jnp.concatenate([g_f, g_b], axis=0)               # (2B, 4H)
            # gate order is [i, f, o | g]: one sigmoid over 3H, one tanh over H
            sifo = jax.nn.sigmoid(gates[:, 0:H3])
            g_g = jnp.tanh(gates[:, H3:H4])
            i_g = sifo[:, 0:H]
            f_g = sifo[:, H:2 * H]
            o_g = sifo[:, 2 * H:H3]
            c_new = f_g * c_st + i_g * g_g
            h_new = o_g * jnp.tanh(c_new)
            keep = keeps[i]
            h_st = jnp.where(keep, h_new, h_st)   # freeze state past each length
            c_st = jnp.where(keep, c_new, c_st)
            out_f[t] = h_st[0:B]                  # finite value; PAD applied at the end
            out_b[tb] = h_st[B:2 * B]

    # ---- additive-attention pointer scores + length mask + log_softmax ----
    y = jnp.concatenate([bufs[2 * (L - 1)][...],
                         bufs[2 * (L - 1) + 1][...]], axis=-1)        # (T, B, 2H) f32
    mask_f = mask2_ref[...][:, 0:B, :]                                # (T, B, 1) f32
    y = jnp.where(mask_f > 0.0, y, PAD_VALUE)     # pad_packed padding_value semantics
    a = jnp.dot(y.reshape(T * B, 2 * H).astype(jnp.bfloat16), w_attn_ref[...],
                preferred_element_type=jnp.float32)                   # (T*B, A), one push
    z = jnp.tanh(a) * v_ref[...]                                      # (T*B, A)
    s = jnp.sum(z, axis=-1, keepdims=True).reshape(T, B, 1)           # batched reduce
    scores = jnp.concatenate([s[t] for t in range(T)], axis=-1)       # (B, T) lane-dense
    if apply_mask:
        scores = jnp.where(mask_bt_ref[...] > 0.0, scores, MASK_VALUE)
    m = jnp.max(scores, axis=1, keepdims=True)
    e = jnp.exp(scores - m)
    lse = jnp.log(jnp.sum(e, axis=1, keepdims=True))
    out_ref[...] = scores - m - lse


# ------------------------------ pallas_call glue ------------------------------

def _full_spec(shape):
    zeros = (0,) * len(shape)
    return pl.BlockSpec(shape, lambda i: zeros)


def single_pointer_net_forward(params, tokens, hidden, cell, lengths, *, apply_mask):
    B, T = tokens.shape
    H = hidden.shape[-1]
    L = hidden.shape[0] // 2

    # Embedding lookup (padding_idx row of the table is zero). Tiny XLA gather,
    # laid out sequence-major and already bf16 so the kernel feeds the MXU directly.
    x_tbe = jnp.take(params["emb"], tokens.T, axis=0).astype(jnp.bfloat16)   # (T, B, E)

    # pack_padded_sequence equivalent: per-position validity masks.
    mask_bt = (jnp.arange(T)[None, :] < lengths[:, None]).astype(jnp.float32)  # (B, T)
    m_f = mask_bt.T[:, :, None]                      # (T, B, 1): valid(t)
    m_b = m_f[::-1]                                  # (T, B, 1): valid(T-1-t)
    mask2 = jnp.concatenate([m_f, m_b], axis=1)      # (T, 2B, 1)

    # torch init-hidden layout (L*2, B, H) -> per-layer stacked (L, 2B, H).
    h0 = hidden.reshape(L, 2 * B, H).astype(jnp.float32)
    c0 = cell.reshape(L, 2 * B, H).astype(jnp.float32)

    inputs = [x_tbe, mask2, mask_bt, h0, c0]
    for p in params["lstm"]:
        inputs += [p["w_x"], p["w_h"], p["b"]]
    inputs += [params["w_attn_t"], params["v_row"]]

    kernel = functools.partial(fused_pointer_kernel, hidden_size=H,
                               num_layers=L, apply_mask=apply_mask)

    return pl.pallas_call(
        kernel,
        out_shape=jax.ShapeDtypeStruct((B, T), jnp.float32),
        grid=(1,),
        in_specs=[_full_spec(x.shape) for x in inputs],
        out_specs=_full_spec((B, T)),
        scratch_shapes=[pltpu.VMEM((T, B, H), jnp.float32) for _ in range(2 * L)],
        compiler_params=pltpu.CompilerParams(dimension_semantics=("arbitrary",)),
        # NOTE: total VMEM use here is a few hundred KiB; if B/T/H are scaled up,
        # set vmem_limit_bytes explicitly and re-derive the v7x (64 MiB) budget.
    )(*inputs)


# ------------------------------ parameter init ------------------------------

def init_params(key, *, hidden_size, num_layers, attention_dimension,
                embedding_dim, num_embeddings, padding_idx=21):
    H = hidden_size
    keys = jax.random.split(key, 4 + num_layers * 2 * 4)
    ki = iter(keys)

    emb = jax.random.normal(next(ki), (num_embeddings, embedding_dim), jnp.float32)
    emb = emb.at[padding_idx].set(0.0)

    def reorder_ifog(m):
        # torch gate-row order [i, f, g, o] -> kernel order [i, f, o, g]
        return jnp.concatenate([m[0:H], m[H:2 * H], m[3 * H:4 * H], m[2 * H:3 * H]],
                               axis=0)

    lstm = []
    k_uni = 1.0 / float(H) ** 0.5
    for layer in range(num_layers):
        in_size = embedding_dim if layer == 0 else 2 * H
        wx_dirs, wh_dirs, b_dirs = [], [], []
        for _d in range(2):                       # forward, backward
            w_ih = jax.random.uniform(next(ki), (4 * H, in_size),
                                      jnp.float32, -k_uni, k_uni)
            w_hh = jax.random.uniform(next(ki), (4 * H, H),
                                      jnp.float32, -k_uni, k_uni)
            b_ih = jax.random.uniform(next(ki), (4 * H,), jnp.float32, -k_uni, k_uni)
            b_hh = jax.random.uniform(next(ki), (4 * H,), jnp.float32, -k_uni, k_uni)
            wx_dirs.append(reorder_ifog(w_ih).T)          # (in, 4H)
            wh_dirs.append(reorder_ifog(w_hh).T)          # (H, 4H)
            b_dirs.append(reorder_ifog(b_ih + b_hh))      # (4H,)
        lstm.append(dict(
            w_x=jnp.concatenate(wx_dirs, axis=1).astype(jnp.bfloat16),   # (in, 8H)
            w_h=jnp.concatenate(wh_dirs, axis=1).astype(jnp.bfloat16),   # (H, 8H)
            b=jnp.concatenate(b_dirs).reshape(1, 8 * H).astype(jnp.float32)))

    # xavier_normal_ init for the attention parameters.
    std_w = float((2.0 / (attention_dimension + 2 * H)) ** 0.5)
    W = std_w * jax.random.normal(next(ki), (attention_dimension, 2 * H), jnp.float32)
    std_v = float((2.0 / (1 + attention_dimension)) ** 0.5)
    V = std_v * jax.random.normal(next(ki), (1, attention_dimension), jnp.float32)
    # NOTE: the torch module also defines self.b, but it is never used in forward().
    return dict(emb=emb, lstm=lstm,
                w_attn_t=W.T.astype(jnp.bfloat16), v_row=V)


# ---------------------------------- main ----------------------------------

if __name__ == "__main__":
    B, T = 2, 8
    hidden_size = 32
    num_layers = 2
    attention_dimension = 64
    embedding_dim = 16
    num_embeddings = 25
    apply_mask = True

    key = jax.random.PRNGKey(0)
    k_par, k_tok = jax.random.split(key)
    params = init_params(k_par, hidden_size=hidden_size, num_layers=num_layers,
                         attention_dimension=attention_dimension,
                         embedding_dim=embedding_dim, num_embeddings=num_embeddings)

    # Lengths sorted descending (pack_padded_sequence enforce_sorted default).
    lengths = jnp.array([8, 5], dtype=jnp.int32)
    tokens = jax.random.randint(k_tok, (B, T), 0, num_embeddings, dtype=jnp.int32)
    pad_pos = jnp.arange(T)[None, :] >= lengths[:, None]
    tokens = jnp.where(pad_pos, 21, tokens)        # padding_idx tokens past length

    # init_hidden equivalent: zeros of shape (num_layers * 2, B, H).
    hidden0 = jnp.zeros((num_layers * 2, B, hidden_size), jnp.float32)
    cell0 = jnp.zeros((num_layers * 2, B, hidden_size), jnp.float32)

    fwd = jax.jit(functools.partial(single_pointer_net_forward, apply_mask=apply_mask))
    out = fwd(params, tokens, hidden0, cell0, lengths)
    out = jax.block_until_ready(out)

    assert out.shape == (B, T)
    assert bool(jnp.all(jnp.isfinite(out)))
    # log_softmax rows must exponentiate to 1.
    row_sums = jnp.sum(jnp.exp(out), axis=1)
    assert bool(jnp.all(jnp.abs(row_sums - 1.0) < 1e-3))
    print("KERNEL_OK")
</pallas_src>

<mosaic_0001>
module attributes {stable_mosaic.version = 11 : i64} {
  func.func @fused_pointer_kernel(%arg0: i32, %arg1: memref<8x2x16xbf16, #tpu.memory_space<vmem>>, %arg2: memref<8x4x1xf32, #tpu.memory_space<vmem>>, %arg3: memref<2x8xf32, #tpu.memory_space<vmem>>, %arg4: memref<2x4x32xf32, #tpu.memory_space<vmem>>, %arg5: memref<2x4x32xf32, #tpu.memory_space<vmem>>, %arg6: memref<16x256xbf16, #tpu.memory_space<vmem>>, %arg7: memref<32x256xbf16, #tpu.memory_space<vmem>>, %arg8: memref<1x256xf32, #tpu.memory_space<vmem>>, %arg9: memref<64x256xbf16, #tpu.memory_space<vmem>>, %arg10: memref<32x256xbf16, #tpu.memory_space<vmem>>, %arg11: memref<1x256xf32, #tpu.memory_space<vmem>>, %arg12: memref<64x64xbf16, #tpu.memory_space<vmem>>, %arg13: memref<1x64xf32, #tpu.memory_space<vmem>>, %arg14: memref<2x8xf32, #tpu.memory_space<vmem>>, %arg15: memref<8x2x32xf32, #tpu.memory_space<vmem>>, %arg16: memref<8x2x32xf32, #tpu.memory_space<vmem>>, %arg17: memref<8x2x32xf32, #tpu.memory_space<vmem>>, %arg18: memref<8x2x32xf32, #tpu.memory_space<vmem>>) attributes {dimension_semantics = [#tpu.dimension_semantics<arbitrary>], iteration_bounds = array<i64: 1>, scalar_prefetch = 0 : i64, scratch_operands = 4 : i64, tpu.core_type = #tpu.core_type<tc>, window_params = [{pipeline_mode = #tpu.pipeline_mode<synchronous>, transform_indices = @transform_0, window_bounds = array<i64: 8, 2, 16>}, {pipeline_mode = #tpu.pipeline_mode<synchronous>, transform_indices = @transform_1, window_bounds = array<i64: 8, 4, 1>}, {pipeline_mode = #tpu.pipeline_mode<synchronous>, transform_indices = @transform_2, window_bounds = array<i64: 2, 8>}, {pipeline_mode = #tpu.pipeline_mode<synchronous>, transform_indices = @transform_3, window_bounds = array<i64: 2, 4, 32>}, {pipeline_mode = #tpu.pipeline_mode<synchronous>, transform_indices = @transform_4, window_bounds = array<i64: 2, 4, 32>}, {pipeline_mode = #tpu.pipeline_mode<synchronous>, transform_indices = @transform_5, window_bounds = array<i64: 16, 256>}, {pipeline_mode = #tpu.pipeline_mode<synchronous>, transform_indices = @transform_6, window_bounds = array<i64: 32, 256>}, {pipeline_mode = #tpu.pipeline_mode<synchronous>, transform_indices = @transform_7, window_bounds = array<i64: 1, 256>}, {pipeline_mode = #tpu.pipeline_mode<synchronous>, transform_indices = @transform_8, window_bounds = array<i64: 64, 256>}, {pipeline_mode = #tpu.pipeline_mode<synchronous>, transform_indices = @transform_9, window_bounds = array<i64: 32, 256>}, {pipeline_mode = #tpu.pipeline_mode<synchronous>, transform_indices = @transform_10, window_bounds = array<i64: 1, 256>}, {pipeline_mode = #tpu.pipeline_mode<synchronous>, transform_indices = @transform_11, window_bounds = array<i64: 64, 64>}, {pipeline_mode = #tpu.pipeline_mode<synchronous>, transform_indices = @transform_12, window_bounds = array<i64: 1, 64>}, {pipeline_mode = #tpu.pipeline_mode<synchronous>, transform_indices = @transform_13, window_bounds = array<i64: 2, 8>}]} {
    %c0 = arith.constant 0 : index
    %c0_0 = arith.constant 0 : index
    %c0_1 = arith.constant 0 : index
    %0 = vector.load %arg2[%c0, %c0_0, %c0_1] : memref<8x4x1xf32, #tpu.memory_space<vmem>>, vector<1x4x1xf32>
    %1 = vector.shape_cast %0 : vector<1x4x1xf32> to vector<4x1xf32>
    %cst = arith.constant 0.000000e+00 : f32
    %2 = vector.broadcast %cst : f32 to vector<4x1xf32>
    %3 = arith.cmpf ogt, %1, %2 : vector<4x1xf32>
    %c1 = arith.constant 1 : index
    %c0_2 = arith.constant 0 : index
    %c0_3 = arith.constant 0 : index
    %4 = vector.load %arg2[%c1, %c0_2, %c0_3] : memref<8x4x1xf32, #tpu.memory_space<vmem>>, vector<1x4x1xf32>
    %5 = vector.shape_cast %4 : vector<1x4x1xf32> to vector<4x1xf32>
    %cst_4 = arith.constant 0.000000e+00 : f32
    %6 = vector.broadcast %cst_4 : f32 to vector<4x1xf32>
    %7 = arith.cmpf ogt, %5, %6 : vector<4x1xf32>
    %c2 = arith.constant 2 : index
    %c0_5 = arith.constant 0 : index
    %c0_6 = arith.constant 0 : index
    %8 = vector.load %arg2[%c2, %c0_5, %c0_6] : memref<8x4x1xf32, #tpu.memory_space<vmem>>, vector<1x4x1xf32>
    %9 = vector.shape_cast %8 : vector<1x4x1xf32> to vector<4x1xf32>
    %cst_7 = arith.constant 0.000000e+00 : f32
    %10 = vector.broadcast %cst_7 : f32 to vector<4x1xf32>
    %11 = arith.cmpf ogt, %9, %10 : vector<4x1xf32>
    %c3 = arith.constant 3 : index
    %c0_8 = arith.constant 0 : index
    %c0_9 = arith.constant 0 : index
    %12 = vector.load %arg2[%c3, %c0_8, %c0_9] : memref<8x4x1xf32, #tpu.memory_space<vmem>>, vector<1x4x1xf32>
    %13 = vector.shape_cast %12 : vector<1x4x1xf32> to vector<4x1xf32>
    %cst_10 = arith.constant 0.000000e+00 : f32
    %14 = vector.broadcast %cst_10 : f32 to vector<4x1xf32>
    %15 = arith.cmpf ogt, %13, %14 : vector<4x1xf32>
    %c4 = arith.constant 4 : index
    %c0_11 = arith.constant 0 : index
    %c0_12 = arith.constant 0 : index
    %16 = vector.load %arg2[%c4, %c0_11, %c0_12] : memref<8x4x1xf32, #tpu.memory_space<vmem>>, vector<1x4x1xf32>
    %17 = vector.shape_cast %16 : vector<1x4x1xf32> to vector<4x1xf32>
    %cst_13 = arith.constant 0.000000e+00 : f32
    %18 = vector.broadcast %cst_13 : f32 to vector<4x1xf32>
    %19 = arith.cmpf ogt, %17, %18 : vector<4x1xf32>
    %c5 = arith.constant 5 : index
    %c0_14 = arith.constant 0 : index
    %c0_15 = arith.constant 0 : index
    %20 = vector.load %arg2[%c5, %c0_14, %c0_15] : memref<8x4x1xf32, #tpu.memory_space<vmem>>, vector<1x4x1xf32>
    %21 = vector.shape_cast %20 : vector<1x4x1xf32> to vector<4x1xf32>
    %cst_16 = arith.constant 0.000000e+00 : f32
    %22 = vector.broadcast %cst_16 : f32 to vector<4x1xf32>
    %23 = arith.cmpf ogt, %21, %22 : vector<4x1xf32>
    %c6 = arith.constant 6 : index
    %c0_17 = arith.constant 0 : index
    %c0_18 = arith.constant 0 : index
    %24 = vector.load %arg2[%c6, %c0_17, %c0_18] : memref<8x4x1xf32, #tpu.memory_space<vmem>>, vector<1x4x1xf32>
    %25 = vector.shape_cast %24 : vector<1x4x1xf32> to vector<4x1xf32>
    %cst_19 = arith.constant 0.000000e+00 : f32
    %26 = vector.broadcast %cst_19 : f32 to vector<4x1xf32>
    %27 = arith.cmpf ogt, %25, %26 : vector<4x1xf32>
    %c7 = arith.constant 7 : index
    %c0_20 = arith.constant 0 : index
    %c0_21 = arith.constant 0 : index
    %28 = vector.load %arg2[%c7, %c0_20, %c0_21] : memref<8x4x1xf32, #tpu.memory_space<vmem>>, vector<1x4x1xf32>
    %29 = vector.shape_cast %28 : vector<1x4x1xf32> to vector<4x1xf32>
    %cst_22 = arith.constant 0.000000e+00 : f32
    %30 = vector.broadcast %cst_22 : f32 to vector<4x1xf32>
    %31 = arith.cmpf ogt, %29, %30 : vector<4x1xf32>
    %c0_23 = arith.constant 0 : index
    %c0_24 = arith.constant 0 : index
    %c0_25 = arith.constant 0 : index
    %32 = vector.load %arg1[%c0_23, %c0_24, %c0_25] : memref<8x2x16xbf16, #tpu.memory_space<vmem>>, vector<8x2x16xbf16>
    %33 = vector.shape_cast %32 : vector<8x2x16xbf16> to vector<16x16xbf16>
    %c0_26 = arith.constant 0 : index
    %c0_27 = arith.constant 0 : index
    %34 = vector.load %arg6[%c0_26, %c0_27] : memref<16x256xbf16, #tpu.memory_space<vmem>>, vector<16x256xbf16>
    %cst_28 = arith.constant dense<0.000000e+00> : vector<16x256xf32>
    %35 = tpu.matmul %33, %34, %cst_28 {dimension_numbers = #tpu.dot_dimension_numbers<[1], [0], [0], [1], [0, 0, 1, 1], [], []>} : vector<16x16xbf16>, vector<16x256xbf16>, vector<16x256xf32> -> vector<16x256xf32>
    %c0_29 = arith.constant 0 : index
    %c0_30 = arith.constant 0 : index
    %36 = vector.load %arg8[%c0_29, %c0_30] : memref<1x256xf32, #tpu.memory_space<vmem>>, vector<1x256xf32>
    %37 = vector.broadcast %36 : vector<1x256xf32> to vector<16x256xf32>
    %38 = arith.addf %35, %37 : vector<16x256xf32>
    %39 = vector.shape_cast %38 : vector<16x256xf32> to vector<8x2x256xf32>
    %c0_31 = arith.constant 0 : index
    %c0_32 = arith.constant 0 : index
    %40 = vector.load %arg7[%c0_31, %c0_32] : memref<32x256xbf16, #tpu.memory_space<vmem>>, vector<32x256xbf16>
    %c0_33 = arith.constant 0 : index
    %c0_34 = arith.constant 0 : index
    %c0_35 = arith.constant 0 : index
    %41 = vector.load %arg4[%c0_33, %c0_34, %c0_35] : memref<2x4x32xf32, #tpu.memory_space<vmem>>, vector<1x4x32xf32>
    %42 = vector.shape_cast %41 : vector<1x4x32xf32> to vector<4x32xf32>
    %c0_36 = arith.constant 0 : index
    %c0_37 = arith.constant 0 : index
    %c0_38 = arith.constant 0 : index
    %43 = vector.load %arg5[%c0_36, %c0_37, %c0_38] : memref<2x4x32xf32, #tpu.memory_space<vmem>>, vector<1x4x32xf32>
    %44 = vector.shape_cast %43 : vector<1x4x32xf32> to vector<4x32xf32>
    %45 = arith.truncf %42 : vector<4x32xf32> to vector<4x32xbf16>
    %cst_39 = arith.constant dense<0.000000e+00> : vector<4x256xf32>
    %46 = tpu.matmul %45, %40, %cst_39 {dimension_numbers = #tpu.dot_dimension_numbers<[1], [0], [0], [1], [0, 0, 1, 1], [], []>} : vector<4x32xbf16>, vector<32x256xbf16>, vector<4x256xf32> -> vector<4x256xf32>
    %47 = vector.extract_strided_slice %39 {offsets = [0, 0, 0], sizes = [1, 2, 128], strides = [1, 1, 1]} : vector<8x2x256xf32> to vector<1x2x128xf32>
    %48 = vector.shape_cast %47 : vector<1x2x128xf32> to vector<2x128xf32>
    %49 = vector.extract_strided_slice %46 {offsets = [0, 0], sizes = [2, 128], strides = [1, 1]} : vector<4x256xf32> to vector<2x128xf32>
    %50 = arith.addf %48, %49 : vector<2x128xf32>
    %51 = vector.extract_strided_slice %39 {offsets = [7, 0, 128], sizes = [1, 2, 128], strides = [1, 1, 1]} : vector<8x2x256xf32> to vector<1x2x128xf32>
    %52 = vector.shape_cast %51 : vector<1x2x128xf32> to vector<2x128xf32>
    %53 = vector.extract_strided_slice %46 {offsets = [2, 128], sizes = [2, 128], strides = [1, 1]} : vector<4x256xf32> to vector<2x128xf32>
    %54 = arith.addf %52, %53 : vector<2x128xf32>
    %55 = tpu.concatenate %50, %54 in 0 : vector<2x128xf32>, vector<2x128xf32> -> vector<4x128xf32>
    %56 = vector.extract_strided_slice %55 {offsets = [0, 0], sizes = [4, 96], strides = [1, 1]} : vector<4x128xf32> to vector<4x96xf32>
    %57 = arith.negf %56 : vector<4x96xf32>
    %58 = math.exp %57 : vector<4x96xf32>
    %cst_40 = arith.constant 1.000000e+00 : f32
    %59 = vector.broadcast %cst_40 : f32 to vector<4x96xf32>
    %60 = arith.addf %59, %58 : vector<4x96xf32>
    %61 = arith.divf %59, %60 : vector<4x96xf32>
    %62 = vector.extract_strided_slice %55 {offsets = [0, 96], sizes = [4, 32], strides = [1, 1]} : vector<4x128xf32> to vector<4x32xf32>
    %63 = math.tanh %62 : vector<4x32xf32>
    %64 = vector.extract_strided_slice %61 {offsets = [0, 0], sizes = [4, 32], strides = [1, 1]} : vector<4x96xf32> to vector<4x32xf32>
    %65 = vector.extract_strided_slice %61 {offsets = [0, 32], sizes = [4, 32], strides = [1, 1]} : vector<4x96xf32> to vector<4x32xf32>
    %66 = vector.extract_strided_slice %61 {offsets = [0, 64], sizes = [4, 32], strides = [1, 1]} : vector<4x96xf32> to vector<4x32xf32>
    %67 = arith.mulf %65, %44 : vector<4x32xf32>
    %68 = arith.mulf %64, %63 : vector<4x32xf32>
    %69 = arith.addf %67, %68 : vector<4x32xf32>
    %70 = math.tanh %69 : vector<4x32xf32>
    %71 = arith.mulf %66, %70 : vector<4x32xf32>
    %72 = vector.shape_cast %3 : vector<4x1xi1> to vector<4x1xi1>
    %73 = vector.broadcast %72 : vector<4x1xi1> to vector<4x32xi1>
    %74 = arith.select %73, %71, %42 : vector<4x32xi1>, vector<4x32xf32>
    %75 = vector.shape_cast %3 : vector<4x1xi1> to vector<4x1xi1>
    %76 = vector.broadcast %75 : vector<4x1xi1> to vector<4x32xi1>
    %77 = arith.select %76, %69, %44 : vector<4x32xi1>, vector<4x32xf32>
    %78 = vector.extract_strided_slice %74 {offsets = [0, 0], sizes = [2, 32], strides = [1, 1]} : vector<4x32xf32> to vector<2x32xf32>
    %c0_41 = arith.constant 0 : index
    %c0_42 = arith.constant 0 : index
    %c0_43 = arith.constant 0 : index
    %79 = vector.load %arg15[%c0_41, %c0_42, %c0_43] : memref<8x2x32xf32, #tpu.memory_space<vmem>>, vector<1x2x32xf32>
    %80 = vector.shape_cast %79 : vector<1x2x32xf32> to vector<2x32xf32>
    %81 = vector.shape_cast %78 : vector<2x32xf32> to vector<1x2x32xf32>
    tpu.vector_store %arg15[%c0_41, %c0_42, %c0_43], %81 {strides = array<i32>} : memref<8x2x32xf32, #tpu.memory_space<vmem>>, vector<1x2x32xf32>,
    %82 = vector.extract_strided_slice %74 {offsets = [2, 0], sizes = [2, 32], strides = [1, 1]} : vector<4x32xf32> to vector<2x32xf32>
    %c7_44 = arith.constant 7 : index
    %c0_45 = arith.constant 0 : index
    %c0_46 = arith.constant 0 : index
    %83 = vector.load %arg16[%c7_44, %c0_45, %c0_46] : memref<8x2x32xf32, #tpu.memory_space<vmem>>, vector<1x2x32xf32>
    %84 = vector.shape_cast %83 : vector<1x2x32xf32> to vector<2x32xf32>
    %85 = vector.shape_cast %82 : vector<2x32xf32> to vector<1x2x32xf32>
    tpu.vector_store %arg16[%c7_44, %c0_45, %c0_46], %85 {strides = array<i32>} : memref<8x2x32xf32, #tpu.memory_space<vmem>>, vector<1x2x32xf32>,
    %86 = arith.truncf %74 : vector<4x32xf32> to vector<4x32xbf16>
    %cst_47 = arith.constant dense<0.000000e+00> : vector<4x256xf32>
    %87 = tpu.matmul %86, %40, %cst_47 {dimension_numbers = #tpu.dot_dimension_numbers<[1], [0], [0], [1], [0, 0, 1, 1], [], []>} : vector<4x32xbf16>, vector<32x256xbf16>, vector<4x256xf32> -> vector<4x256xf32>
    %88 = vector.extract_strided_slice %39 {offsets = [1, 0, 0], sizes = [1, 2, 128], strides = [1, 1, 1]} : vector<8x2x256xf32> to vector<1x2x128xf32>
    %89 = vector.shape_cast %88 : vector<1x2x128xf32> to vector<2x128xf32>
    %90 = vector.extract_strided_slice %87 {offsets = [0, 0], sizes = [2, 128], strides = [1, 1]} : vector<4x256xf32> to vector<2x128xf32>
    %91 = arith.addf %89, %90 : vector<2x128xf32>
    %92 = vector.extract_strided_slice %39 {offsets = [6, 0, 128], sizes = [1, 2, 128], strides = [1, 1, 1]} : vector<8x2x256xf32> to vector<1x2x128xf32>
    %93 = vector.shape_cast %92 : vector<1x2x128xf32> to vector<2x128xf32>
    %94 = vector.extract_strided_slice %87 {offsets = [2, 128], sizes = [2, 128], strides = [1, 1]} : vector<4x256xf32> to vector<2x128xf32>
    %95 = arith.addf %93, %94 : vector<2x128xf32>
    %96 = tpu.concatenate %91, %95 in 0 : vector<2x128xf32>, vector<2x128xf32> -> vector<4x128xf32>
    %97 = vector.extract_strided_slice %96 {offsets = [0, 0], sizes = [4, 96], strides = [1, 1]} : vector<4x128xf32> to vector<4x96xf32>
    %98 = arith.negf %97 : vector<4x96xf32>
    %99 = math.exp %98 : vector<4x96xf32>
    %cst_48 = arith.constant 1.000000e+00 : f32
    %100 = vector.broadcast %cst_48 : f32 to vector<4x96xf32>
    %101 = arith.addf %100, %99 : vector<4x96xf32>
    %102 = arith.divf %100, %101 : vector<4x96xf32>
    %103 = vector.extract_strided_slice %96 {offsets = [0, 96], sizes = [4, 32], strides = [1, 1]} : vector<4x128xf32> to vector<4x32xf32>
    %104 = math.tanh %103 : vector<4x32xf32>
    %105 = vector.extract_strided_slice %102 {offsets = [0, 0], sizes = [4, 32], strides = [1, 1]} : vector<4x96xf32> to vector<4x32xf32>
    %106 = vector.extract_strided_slice %102 {offsets = [0, 32], sizes = [4, 32], strides = [1, 1]} : vector<4x96xf32> to vector<4x32xf32>
    %107 = vector.extract_strided_slice %102 {offsets = [0, 64], sizes = [4, 32], strides = [1, 1]} : vector<4x96xf32> to vector<4x32xf32>
    %108 = arith.mulf %106, %77 : vector<4x32xf32>
    %109 = arith.mulf %105, %104 : vector<4x32xf32>
    %110 = arith.addf %108, %109 : vector<4x32xf32>
    %111 = math.tanh %110 : vector<4x32xf32>
    %112 = arith.mulf %107, %111 : vector<4x32xf32>
    %113 = vector.shape_cast %7 : vector<4x1xi1> to vector<4x1xi1>
    %114 = vector.broadcast %113 : vector<4x1xi1> to vector<4x32xi1>
    %115 = arith.select %114, %112, %74 : vector<4x32xi1>, vector<4x32xf32>
    %116 = vector.shape_cast %7 : vector<4x1xi1> to vector<4x1xi1>
    %117 = vector.broadcast %116 : vector<4x1xi1> to vector<4x32xi1>
    %118 = arith.select %117, %110, %77 : vector<4x32xi1>, vector<4x32xf32>
    %119 = vector.extract_strided_slice %115 {offsets = [0, 0], sizes = [2, 32], strides = [1, 1]} : vector<4x32xf32> to vector<2x32xf32>
    %c1_49 = arith.constant 1 : index
    %c0_50 = arith.constant 0 : index
    %c0_51 = arith.constant 0 : index
    %120 = vector.load %arg15[%c1_49, %c0_50, %c0_51] : memref<8x2x32xf32, #tpu.memory_space<vmem>>, vector<1x2x32xf32>
    %121 = vector.shape_cast %120 : vector<1x2x32xf32> to vector<2x32xf32>
    %122 = vector.shape_cast %119 : vector<2x32xf32> to vector<1x2x32xf32>
    tpu.vector_store %arg15[%c1_49, %c0_50, %c0_51], %122 {strides = array<i32>} : memref<8x2x32xf32, #tpu.memory_space<vmem>>, vector<1x2x32xf32>,
    %123 = vector.extract_strided_slice %115 {offsets = [2, 0], sizes = [2, 32], strides = [1, 1]} : vector<4x32xf32> to vector<2x32xf32>
    %c6_52 = arith.constant 6 : index
    %c0_53 = arith.constant 0 : index
    %c0_54 = arith.constant 0 : index
    %124 = vector.load %arg16[%c6_52, %c0_53, %c0_54] : memref<8x2x32xf32, #tpu.memory_space<vmem>>, vector<1x2x32xf32>
    %125 = vector.shape_cast %124 : vector<1x2x32xf32> to vector<2x32xf32>
    %126 = vector.shape_cast %123 : vector<2x32xf32> to vector<1x2x32xf32>
    tpu.vector_store %arg16[%c6_52, %c0_53, %c0_54], %126 {strides = array<i32>} : memref<8x2x32xf32, #tpu.memory_space<vmem>>, vector<1x2x32xf32>,
    %127 = arith.truncf %115 : vector<4x32xf32> to vector<4x32xbf16>
    %cst_55 = arith.constant dense<0.000000e+00> : vector<4x256xf32>
    %128 = tpu.matmul %127, %40, %cst_55 {dimension_numbers = #tpu.dot_dimension_numbers<[1], [0], [0], [1], [0, 0, 1, 1], [], []>} : vector<4x32xbf16>, vector<32x256xbf16>, vector<4x256xf32> -> vector<4x256xf32>
    %129 = vector.extract_strided_slice %39 {offsets = [2, 0, 0], sizes = [1, 2, 128], strides = [1, 1, 1]} : vector<8x2x256xf32> to vector<1x2x128xf32>
    %130 = vector.shape_cast %129 : vector<1x2x128xf32> to vector<2x128xf32>
    %131 = vector.extract_strided_slice %128 {offsets = [0, 0], sizes = [2, 128], strides = [1, 1]} : vector<4x256xf32> to vector<2x128xf32>
    %132 = arith.addf %130, %131 : vector<2x128xf32>
    %133 = vector.extract_strided_slice %39 {offsets = [5, 0, 128], sizes = [1, 2, 128], strides = [1, 1, 1]} : vector<8x2x256xf32> to vector<1x2x128xf32>
    %134 = vector.shape_cast %133 : vector<1x2x128xf32> to vector<2x128xf32>
    %135 = vector.extract_strided_slice %128 {offsets = [2, 128], sizes = [2, 128], strides = [1, 1]} : vector<4x256xf32> to vector<2x128xf32>
    %136 = arith.addf %134, %135 : vector<2x128xf32>
    %137 = tpu.concatenate %132, %136 in 0 : vector<2x128xf32>, vector<2x128xf32> -> vector<4x128xf32>
    %138 = vector.extract_strided_slice %137 {offsets = [0, 0], sizes = [4, 96], strides = [1, 1]} : vector<4x128xf32> to vector<4x96xf32>
    %139 = arith.negf %138 : vector<4x96xf32>
    %140 = math.exp %139 : vector<4x96xf32>
    %cst_56 = arith.constant 1.000000e+00 : f32
    %141 = vector.broadcast %cst_56 : f32 to vector<4x96xf32>
    %142 = arith.addf %141, %140 : vector<4x96xf32>
    %143 = arith.divf %141, %142 : vector<4x96xf32>
    %144 = vector.extract_strided_slice %137 {offsets = [0, 96], sizes = [4, 32], strides = [1, 1]} : vector<4x128xf32> to vector<4x32xf32>
    %145 = math.tanh %144 : vector<4x32xf32>
    %146 = vector.extract_strided_slice %143 {offsets = [0, 0], sizes = [4, 32], strides = [1, 1]} : vector<4x96xf32> to vector<4x32xf32>
    %147 = vector.extract_strided_slice %143 {offsets = [0, 32], sizes = [4, 32], strides = [1, 1]} : vector<4x96xf32> to vector<4x32xf32>
    %148 = vector.extract_strided_slice %143 {offsets = [0, 64], sizes = [4, 32], strides = [1, 1]} : vector<4x96xf32> to vector<4x32xf32>
    %149 = arith.mulf %147, %118 : vector<4x32xf32>
    %150 = arith.mulf %146, %145 : vector<4x32xf32>
    %151 = arith.addf %149, %150 : vector<4x32xf32>
    %152 = math.tanh %151 : vector<4x32xf32>
    %153 = arith.mulf %148, %152 : vector<4x32xf32>
    %154 = vector.shape_cast %11 : vector<4x1xi1> to vector<4x1xi1>
    %155 = vector.broadcast %154 : vector<4x1xi1> to vector<4x32xi1>
    %156 = arith.select %155, %153, %115 : vector<4x32xi1>, vector<4x32xf32>
    %157 = vector.shape_cast %11 : vector<4x1xi1> to vector<4x1xi1>
    %158 = vector.broadcast %157 : vector<4x1xi1> to vector<4x32xi1>
    %159 = arith.select %158, %151, %118 : vector<4x32xi1>, vector<4x32xf32>
    %160 = vector.extract_strided_slice %156 {offsets = [0, 0], sizes = [2, 32], strides = [1, 1]} : vector<4x32xf32> to vector<2x32xf32>
    %c2_57 = arith.constant 2 : index
    %c0_58 = arith.constant 0 : index
    %c0_59 = arith.constant 0 : index
    %161 = vector.load %arg15[%c2_57, %c0_58, %c0_59] : memref<8x2x32xf32, #tpu.memory_space<vmem>>, vector<1x2x32xf32>
    %162 = vector.shape_cast %161 : vector<1x2x32xf32> to vector<2x32xf32>
    %163 = vector.shape_cast %160 : vector<2x32xf32> to vector<1x2x32xf32>
    tpu.vector_store %arg15[%c2_57, %c0_58, %c0_59], %163 {strides = array<i32>} : memref<8x2x32xf32, #tpu.memory_space<vmem>>, vector<1x2x32xf32>,
    %164 = vector.extract_strided_slice %156 {offsets = [2, 0], sizes = [2, 32], strides = [1, 1]} : vector<4x32xf32> to vector<2x32xf32>
    %c5_60 = arith.constant 5 : index
    %c0_61 = arith.constant 0 : index
    %c0_62 = arith.constant 0 : index
    %165 = vector.load %arg16[%c5_60, %c0_61, %c0_62] : memref<8x2x32xf32, #tpu.memory_space<vmem>>, vector<1x2x32xf32>
    %166 = vector.shape_cast %165 : vector<1x2x32xf32> to vector<2x32xf32>
    %167 = vector.shape_cast %164 : vector<2x32xf32> to vector<1x2x32xf32>
    tpu.vector_store %arg16[%c5_60, %c0_61, %c0_62], %167 {strides = array<i32>} : memref<8x2x32xf32, #tpu.memory_space<vmem>>, vector<1x2x32xf32>,
    %168 = arith.truncf %156 : vector<4x32xf32> to vector<4x32xbf16>
    %cst_63 = arith.constant dense<0.000000e+00> : vector<4x256xf32>
    %169 = tpu.matmul %168, %40, %cst_63 {dimension_numbers = #tpu.dot_dimension_numbers<[1], [0], [0], [1], [0, 0, 1, 1], [], []>} : vector<4x32xbf16>, vector<32x256xbf16>, vector<4x256xf32> -> vector<4x256xf32>
    %170 = vector.extract_strided_slice %39 {offsets = [3, 0, 0], sizes = [1, 2, 128], strides = [1, 1, 1]} : vector<8x2x256xf32> to vector<1x2x128xf32>
    %171 = vector.shape_cast %170 : vector<1x2x128xf32> to vector<2x128xf32>
    %172 = vector.extract_strided_slice %169 {offsets = [0, 0], sizes = [2, 128], strides = [1, 1]} : vector<4x256xf32> to vector<2x128xf32>
    %173 = arith.addf %171, %172 : vector<2x128xf32>
    %174 = vector.extract_strided_slice %39 {offsets = [4, 0, 128], sizes = [1, 2, 128], strides = [1, 1, 1]} : vector<8x2x256xf32> to vector<1x2x128xf32>
    %175 = vector.shape_cast %174 : vector<1x2x128xf32> to vector<2x128xf32>
    %176 = vector.extract_strided_slice %169 {offsets = [2, 128], sizes = [2, 128], strides = [1, 1]} : vector<4x256xf32> to vector<2x128xf32>
    %177 = arith.addf %175, %176 : vector<2x128xf32>
    %178 = tpu.concatenate %173, %177 in 0 : vector<2x128xf32>, vector<2x128xf32> -> vector<4x128xf32>
    %179 = vector.extract_strided_slice %178 {offsets = [0, 0], sizes = [4, 96], strides = [1, 1]} : vector<4x128xf32> to vector<4x96xf32>
    %180 = arith.negf %179 : vector<4x96xf32>
    %181 = math.exp %180 : vector<4x96xf32>
    %cst_64 = arith.constant 1.000000e+00 : f32
    %182 = vector.broadcast %cst_64 : f32 to vector<4x96xf32>
    %183 = arith.addf %182, %181 : vector<4x96xf32>
    %184 = arith.divf %182, %183 : vector<4x96xf32>
    %185 = vector.extract_strided_slice %178 {offsets = [0, 96], sizes = [4, 32], strides = [1, 1]} : vector<4x128xf32> to vector<4x32xf32>
    %186 = math.tanh %185 : vector<4x32xf32>
    %187 = vector.extract_strided_slice %184 {offsets = [0, 0], sizes = [4, 32], strides = [1, 1]} : vector<4x96xf32> to vector<4x32xf32>
    %188 = vector.extract_strided_slice %184 {offsets = [0, 32], sizes = [4, 32], strides = [1, 1]} : vector<4x96xf32> to vector<4x32xf32>
    %189 = vector.extract_strided_slice %184 {offsets = [0, 64], sizes = [4, 32], strides = [1, 1]} : vector<4x96xf32> to vector<4x32xf32>
    %190 = arith.mulf %188, %159 : vector<4x32xf32>
    %191 = arith.mulf %187, %186 : vector<4x32xf32>
    %192 = arith.addf %190, %191 : vector<4x32xf32>
    %193 = math.tanh %192 : vector<4x32xf32>
    %194 = arith.mulf %189, %193 : vector<4x32xf32>
    %195 = vector.shape_cast %15 : vector<4x1xi1> to vector<4x1xi1>
    %196 = vector.broadcast %195 : vector<4x1xi1> to vector<4x32xi1>
    %197 = arith.select %196, %194, %156 : vector<4x32xi1>, vector<4x32xf32>
    %198 = vector.shape_cast %15 : vector<4x1xi1> to vector<4x1xi1>
    %199 = vector.broadcast %198 : vector<4x1xi1> to vector<4x32xi1>
    %200 = arith.select %199, %192, %159 : vector<4x32xi1>, vector<4x32xf32>
    %201 = vector.extract_strided_slice %197 {offsets = [0, 0], sizes = [2, 32], strides = [1, 1]} : vector<4x32xf32> to vector<2x32xf32>
    %c3_65 = arith.constant 3 : index
    %c0_66 = arith.constant 0 : index
    %c0_67 = arith.constant 0 : index
    %202 = vector.load %arg15[%c3_65, %c0_66, %c0_67] : memref<8x2x32xf32, #tpu.memory_space<vmem>>, vector<1x2x32xf32>
    %203 = vector.shape_cast %202 : vector<1x2x32xf32> to vector<2x32xf32>
    %204 = vector.shape_cast %201 : vector<2x32xf32> to vector<1x2x32xf32>
    tpu.vector_store %arg15[%c3_65, %c0_66, %c0_67], %204 {strides = array<i32>} : memref<8x2x32xf32, #tpu.memory_space<vmem>>, vector<1x2x32xf32>,
    %205 = vector.extract_strided_slice %197 {offsets = [2, 0], sizes = [2, 32], strides = [1, 1]} : vector<4x32xf32> to vector<2x32xf32>
    %c4_68 = arith.constant 4 : index
    %c0_69 = arith.constant 0 : index
    %c0_70 = arith.constant 0 : index
    %206 = vector.load %arg16[%c4_68, %c0_69, %c0_70] : memref<8x2x32xf32, #tpu.memory_space<vmem>>, vector<1x2x32xf32>
    %207 = vector.shape_cast %206 : vector<1x2x32xf32> to vector<2x32xf32>
    %208 = vector.shape_cast %205 : vector<2x32xf32> to vector<1x2x32xf32>
    tpu.vector_store %arg16[%c4_68, %c0_69, %c0_70], %208 {strides = array<i32>} : memref<8x2x32xf32, #tpu.memory_space<vmem>>, vector<1x2x32xf32>,
    %209 = arith.truncf %197 : vector<4x32xf32> to vector<4x32xbf16>
    %cst_71 = arith.constant dense<0.000000e+00> : vector<4x256xf32>
    %210 = tpu.matmul %209, %40, %cst_71 {dimension_numbers = #tpu.dot_dimension_numbers<[1], [0], [0], [1], [0, 0, 1, 1], [], []>} : vector<4x32xbf16>, vector<32x256xbf16>, vector<4x256xf32> -> vector<4x256xf32>
    %211 = vector.extract_strided_slice %39 {offsets = [4, 0, 0], sizes = [1, 2, 128], strides = [1, 1, 1]} : vector<8x2x256xf32> to vector<1x2x128xf32>
    %212 = vector.shape_cast %211 : vector<1x2x128xf32> to vector<2x128xf32>
    %213 = vector.extract_strided_slice %210 {offsets = [0, 0], sizes = [2, 128], strides = [1, 1]} : vector<4x256xf32> to vector<2x128xf32>
    %214 = arith.addf %212, %213 : vector<2x128xf32>
    %215 = vector.extract_strided_slice %39 {offsets = [3, 0, 128], sizes = [1, 2, 128], strides = [1, 1, 1]} : vector<8x2x256xf32> to vector<1x2x128xf32>
    %216 = vector.shape_cast %215 : vector<1x2x128xf32> to vector<2x128xf32>
    %217 = vector.extract_strided_slice %210 {offsets = [2, 128], sizes = [2, 128], strides = [1, 1]} : vector<4x256xf32> to vector<2x128xf32>
    %218 = arith.addf %216, %217 : vector<2x128xf32>
    %219 = tpu.concatenate %214, %218 in 0 : vector<2x128xf32>, vector<2x128xf32> -> vector<4x128xf32>
    %220 = vector.extract_strided_slice %219 {offsets = [0, 0], sizes = [4, 96], strides = [1, 1]} : vector<4x128xf32> to vector<4x96xf32>
    %221 = arith.negf %220 : vector<4x96xf32>
    %222 = math.exp %221 : vector<4x96xf32>
    %cst_72 = arith.constant 1.000000e+00 : f32
    %223 = vector.broadcast %cst_72 : f32 to vector<4x96xf32>
    %224 = arith.addf %223, %222 : vector<4x96xf32>
    %225 = arith.divf %223, %224 : vector<4x96xf32>
    %226 = vector.extract_strided_slice %219 {offsets = [0, 96], sizes = [4, 32], strides = [1, 1]} : vector<4x128xf32> to vector<4x32xf32>
    %227 = math.tanh %226 : vector<4x32xf32>
    %228 = vector.extract_strided_slice %225 {offsets = [0, 0], sizes = [4, 32], strides = [1, 1]} : vector<4x96xf32> to vector<4x32xf32>
    %229 = vector.extract_strided_slice %225 {offsets = [0, 32], sizes = [4, 32], strides = [1, 1]} : vector<4x96xf32> to vector<4x32xf32>
    %230 = vector.extract_strided_slice %225 {offsets = [0, 64], sizes = [4, 32], strides = [1, 1]} : vector<4x96xf32> to vector<4x32xf32>
    %231 = arith.mulf %229, %200 : vector<4x32xf32>
    %232 = arith.mulf %228, %227 : vector<4x32xf32>
    %233 = arith.addf %231, %232 : vector<4x32xf32>
    %234 = math.tanh %233 : vector<4x32xf32>
    %235 = arith.mulf %230, %234 : vector<4x32xf32>
    %236 = vector.shape_cast %19 : vector<4x1xi1> to vector<4x1xi1>
    %237 = vector.broadcast %236 : vector<4x1xi1> to vector<4x32xi1>
    %238 = arith.select %237, %235, %197 : vector<4x32xi1>, vector<4x32xf32>
    %239 = vector.shape_cast %19 : vector<4x1xi1> to vector<4x1xi1>
    %240 = vector.broadcast %239 : vector<4x1xi1> to vector<4x32xi1>
    %241 = arith.select %240, %233, %200 : vector<4x32xi1>, vector<4x32xf32>
    %242 = vector.extract_strided_slice %238 {offsets = [0, 0], sizes = [2, 32], strides = [1, 1]} : vector<4x32xf32> to vector<2x32xf32>
    %c4_73 = arith.constant 4 : index
    %c0_74 = arith.constant 0 : index
    %c0_75 = arith.constant 0 : index
    %243 = vector.load %arg15[%c4_73, %c0_74, %c0_75] : memref<8x2x32xf32, #tpu.memory_space<vmem>>, vector<1x2x32xf32>
    %244 = vector.shape_cast %243 : vector<1x2x32xf32> to vector<2x32xf32>
    %245 = vector.shape_cast %242 : vector<2x32xf32> to vector<1x2x32xf32>
    tpu.vector_store %arg15[%c4_73, %c0_74, %c0_75], %245 {strides = array<i32>} : memref<8x2x32xf32, #tpu.memory_space<vmem>>, vector<1x2x32xf32>,
    %246 = vector.extract_strided_slice %238 {offsets = [2, 0], sizes = [2, 32], strides = [1, 1]} : vector<4x32xf32> to vector<2x32xf32>
    %c3_76 = arith.constant 3 : index
    %c0_77 = arith.constant 0 : index
    %c0_78 = arith.constant 0 : index
    %247 = vector.load %arg16[%c3_76, %c0_77, %c0_78] : memref<8x2x32xf32, #tpu.memory_space<vmem>>, vector<1x2x32xf32>
    %248 = vector.shape_cast %247 : vector<1x2x32xf32> to vector<2x32xf32>
    %249 = vector.shape_cast %246 : vector<2x32xf32> to vector<1x2x32xf32>
    tpu.vector_store %arg16[%c3_76, %c0_77, %c0_78], %249 {strides = array<i32>} : memref<8x2x32xf32, #tpu.memory_space<vmem>>, vector<1x2x32xf32>,
    %250 = arith.truncf %238 : vector<4x32xf32> to vector<4x32xbf16>
    %cst_79 = arith.constant dense<0.000000e+00> : vector<4x256xf32>
    %251 = tpu.matmul %250, %40, %cst_79 {dimension_numbers = #tpu.dot_dimension_numbers<[1], [0], [0], [1], [0, 0, 1, 1], [], []>} : vector<4x32xbf16>, vector<32x256xbf16>, vector<4x256xf32> -> vector<4x256xf32>
    %252 = vector.extract_strided_slice %39 {offsets = [5, 0, 0], sizes = [1, 2, 128], strides = [1, 1, 1]} : vector<8x2x256xf32> to vector<1x2x128xf32>
    %253 = vector.shape_cast %252 : vector<1x2x128xf32> to vector<2x128xf32>
    %254 = vector.extract_strided_slice %251 {offsets = [0, 0], sizes = [2, 128], strides = [1, 1]} : vector<4x256xf32> to vector<2x128xf32>
    %255 = arith.addf %253, %254 : vector<2x128xf32>
    %256 = vector.extract_strided_slice %39 {offsets = [2, 0, 128], sizes = [1, 2, 128], strides = [1, 1, 1]} : vector<8x2x256xf32> to vector<1x2x128xf32>
    %257 = vector.shape_cast %256 : vector<1x2x128xf32> to vector<2x128xf32>
    %258 = vector.extract_strided_slice %251 {offsets = [2, 128], sizes = [2, 128], strides = [1, 1]} : vector<4x256xf32> to vector<2x128xf32>
    %259 = arith.addf %257, %258 : vector<2x128xf32>
    %260 = tpu.concatenate %255, %259 in 0 : vector<2x128xf32>, vector<2x128xf32> -> vector<4x128xf32>
    %261 = vector.extract_strided_slice %260 {offsets = [0, 0], sizes = [4, 96], strides = [1, 1]} : vector<4x128xf32> to vector<4x96xf32>
    %262 = arith.negf %261 : vector<4x96xf32>
    %263 = math.exp %262 : vector<4x96xf32>
    %cst_80 = arith.constant 1.000000e+00 : f32
    %264 = vector.broadcast %cst_80 : f32 to vector<4x96xf32>
    %265 = arith.addf %264, %263 : vector<4x96xf32>
    %266 = arith.divf %264, %265 : vector<4x96xf32>
    %267 = vector.extract_strided_slice %260 {offsets = [0, 96], sizes = [4, 32], strides = [1, 1]} : vector<4x128xf32> to vector<4x32xf32>
    %268 = math.tanh %267 : vector<4x32xf32>
    %269 = vector.extract_strided_slice %266 {offsets = [0, 0], sizes = [4, 32], strides = [1, 1]} : vector<4x96xf32> to vector<4x32xf32>
    %270 = vector.extract_strided_slice %266 {offsets = [0, 32], sizes = [4, 32], strides = [1, 1]} : vector<4x96xf32> to vector<4x32xf32>
    %271 = vector.extract_strided_slice %266 {offsets = [0, 64], sizes = [4, 32], strides = [1, 1]} : vector<4x96xf32> to vector<4x32xf32>
    %272 = arith.mulf %270, %241 : vector<4x32xf32>
    %273 = arith.mulf %269, %268 : vector<4x32xf32>
    %274 = arith.addf %272, %273 : vector<4x32xf32>
    %275 = math.tanh %274 : vector<4x32xf32>
    %276 = arith.mulf %271, %275 : vector<4x32xf32>
    %277 = vector.shape_cast %23 : vector<4x1xi1> to vector<4x1xi1>
    %278 = vector.broadcast %277 : vector<4x1xi1> to vector<4x32xi1>
    %279 = arith.select %278, %276, %238 : vector<4x32xi1>, vector<4x32xf32>
    %280 = vector.shape_cast %23 : vector<4x1xi1> to vector<4x1xi1>
    %281 = vector.broadcast %280 : vector<4x1xi1> to vector<4x32xi1>
    %282 = arith.select %281, %274, %241 : vector<4x32xi1>, vector<4x32xf32>
    %283 = vector.extract_strided_slice %279 {offsets = [0, 0], sizes = [2, 32], strides = [1, 1]} : vector<4x32xf32> to vector<2x32xf32>
    %c5_81 = arith.constant 5 : index
    %c0_82 = arith.constant 0 : index
    %c0_83 = arith.constant 0 : index
    %284 = vector.load %arg15[%c5_81, %c0_82, %c0_83] : memref<8x2x32xf32, #tpu.memory_space<vmem>>, vector<1x2x32xf32>
    %285 = vector.shape_cast %284 : vector<1x2x32xf32> to vector<2x32xf32>
    %286 = vector.shape_cast %283 : vector<2x32xf32> to vector<1x2x32xf32>
    tpu.vector_store %arg15[%c5_81, %c0_82, %c0_83], %286 {strides = array<i32>} : memref<8x2x32xf32, #tpu.memory_space<vmem>>, vector<1x2x32xf32>,
    %287 = vector.extract_strided_slice %279 {offsets = [2, 0], sizes = [2, 32], strides = [1, 1]} : vector<4x32xf32> to vector<2x32xf32>
    %c2_84 = arith.constant 2 : index
    %c0_85 = arith.constant 0 : index
    %c0_86 = arith.constant 0 : index
    %288 = vector.load %arg16[%c2_84, %c0_85, %c0_86] : memref<8x2x32xf32, #tpu.memory_space<vmem>>, vector<1x2x32xf32>
    %289 = vector.shape_cast %288 : vector<1x2x32xf32> to vector<2x32xf32>
    %290 = vector.shape_cast %287 : vector<2x32xf32> to vector<1x2x32xf32>
    tpu.vector_store %arg16[%c2_84, %c0_85, %c0_86], %290 {strides = array<i32>} : memref<8x2x32xf32, #tpu.memory_space<vmem>>, vector<1x2x32xf32>,
    %291 = arith.truncf %279 : vector<4x32xf32> to vector<4x32xbf16>
    %cst_87 = arith.constant dense<0.000000e+00> : vector<4x256xf32>
    %292 = tpu.matmul %291, %40, %cst_87 {dimension_numbers = #tpu.dot_dimension_numbers<[1], [0], [0], [1], [0, 0, 1, 1], [], []>} : vector<4x32xbf16>, vector<32x256xbf16>, vector<4x256xf32> -> vector<4x256xf32>
    %293 = vector.extract_strided_slice %39 {offsets = [6, 0, 0], sizes = [1, 2, 128], strides = [1, 1, 1]} : vector<8x2x256xf32> to vector<1x2x128xf32>
    %294 = vector.shape_cast %293 : vector<1x2x128xf32> to vector<2x128xf32>
    %295 = vector.extract_strided_slice %292 {offsets = [0, 0], sizes = [2, 128], strides = [1, 1]} : vector<4x256xf32> to vector<2x128xf32>
    %296 = arith.addf %294, %295 : vector<2x128xf32>
    %297 = vector.extract_strided_slice %39 {offsets = [1, 0, 128], sizes = [1, 2, 128], strides = [1, 1, 1]} : vector<8x2x256xf32> to vector<1x2x128xf32>
    %298 = vector.shape_cast %297 : vector<1x2x128xf32> to vector<2x128xf32>
    %299 = vector.extract_strided_slice %292 {offsets = [2, 128], sizes = [2, 128], strides = [1, 1]} : vector<4x256xf32> to vector<2x128xf32>
    %300 = arith.addf %298, %299 : vector<2x128xf32>
    %301 = tpu.concatenate %296, %300 in 0 : vector<2x128xf32>, vector<2x128xf32> -> vector<4x128xf32>
    %302 = vector.extract_strided_slice %301 {offsets = [0, 0], sizes = [4, 96], strides = [1, 1]} : vector<4x128xf32> to vector<4x96xf32>
    %303 = arith.negf %302 : vector<4x96xf32>
    %304 = math.exp %303 : vector<4x96xf32>
    %cst_88 = arith.constant 1.000000e+00 : f32
    %305 = vector.broadcast %cst_88 : f32 to vector<4x96xf32>
    %306 = arith.addf %305, %304 : vector<4x96xf32>
    %307 = arith.divf %305, %306 : vector<4x96xf32>
    %308 = vector.extract_strided_slice %301 {offsets = [0, 96], sizes = [4, 32], strides = [1, 1]} : vector<4x128xf32> to vector<4x32xf32>
    %309 = math.tanh %308 : vector<4x32xf32>
    %310 = vector.extract_strided_slice %307 {offsets = [0, 0], sizes = [4, 32], strides = [1, 1]} : vector<4x96xf32> to vector<4x32xf32>
    %311 = vector.extract_strided_slice %307 {offsets = [0, 32], sizes = [4, 32], strides = [1, 1]} : vector<4x96xf32> to vector<4x32xf32>
    %312 = vector.extract_strided_slice %307 {offsets = [0, 64], sizes = [4, 32], strides = [1, 1]} : vector<4x96xf32> to vector<4x32xf32>
    %313 = arith.mulf %311, %282 : vector<4x32xf32>
    %314 = arith.mulf %310, %309 : vector<4x32xf32>
    %315 = arith.addf %313, %314 : vector<4x32xf32>
    %316 = math.tanh %315 : vector<4x32xf32>
    %317 = arith.mulf %312, %316 : vector<4x32xf32>
    %318 = vector.shape_cast %27 : vector<4x1xi1> to vector<4x1xi1>
    %319 = vector.broadcast %318 : vector<4x1xi1> to vector<4x32xi1>
    %320 = arith.select %319, %317, %279 : vector<4x32xi1>, vector<4x32xf32>
    %321 = vector.shape_cast %27 : vector<4x1xi1> to vector<4x1xi1>
    %322 = vector.broadcast %321 : vector<4x1xi1> to vector<4x32xi1>
    %323 = arith.select %322, %315, %282 : vector<4x32xi1>, vector<4x32xf32>
    %324 = vector.extract_strided_slice %320 {offsets = [0, 0], sizes = [2, 32], strides = [1, 1]} : vector<4x32xf32> to vector<2x32xf32>
    %c6_89 = arith.constant 6 : index
    %c0_90 = arith.constant 0 : index
    %c0_91 = arith.constant 0 : index
    %325 = vector.load %arg15[%c6_89, %c0_90, %c0_91] : memref<8x2x32xf32, #tpu.memory_space<vmem>>, vector<1x2x32xf32>
    %326 = vector.shape_cast %325 : vector<1x2x32xf32> to vector<2x32xf32>
    %327 = vector.shape_cast %324 : vector<2x32xf32> to vector<1x2x32xf32>
    tpu.vector_store %arg15[%c6_89, %c0_90, %c0_91], %327 {strides = array<i32>} : memref<8x2x32xf32, #tpu.memory_space<vmem>>, vector<1x2x32xf32>,
    %328 = vector.extract_strided_slice %320 {offsets = [2, 0], sizes = [2, 32], strides = [1, 1]} : vector<4x32xf32> to vector<2x32xf32>
    %c1_92 = arith.constant 1 : index
    %c0_93 = arith.constant 0 : index
    %c0_94 = arith.constant 0 : index
    %329 = vector.load %arg16[%c1_92, %c0_93, %c0_94] : memref<8x2x32xf32, #tpu.memory_space<vmem>>, vector<1x2x32xf32>
    %330 = vector.shape_cast %329 : vector<1x2x32xf32> to vector<2x32xf32>
    %331 = vector.shape_cast %328 : vector<2x32xf32> to vector<1x2x32xf32>
    tpu.vector_store %arg16[%c1_92, %c0_93, %c0_94], %331 {strides = array<i32>} : memref<8x2x32xf32, #tpu.memory_space<vmem>>, vector<1x2x32xf32>,
    %332 = arith.truncf %320 : vector<4x32xf32> to vector<4x32xbf16>
    %cst_95 = arith.constant dense<0.000000e+00> : vector<4x256xf32>
    %333 = tpu.matmul %332, %40, %cst_95 {dimension_numbers = #tpu.dot_dimension_numbers<[1], [0], [0], [1], [0, 0, 1, 1], [], []>} : vector<4x32xbf16>, vector<32x256xbf16>, vector<4x256xf32> -> vector<4x256xf32>
    %334 = vector.extract_strided_slice %39 {offsets = [7, 0, 0], sizes = [1, 2, 128], strides = [1, 1, 1]} : vector<8x2x256xf32> to vector<1x2x128xf32>
    %335 = vector.shape_cast %334 : vector<1x2x128xf32> to vector<2x128xf32>
    %336 = vector.extract_strided_slice %333 {offsets = [0, 0], sizes = [2, 128], strides = [1, 1]} : vector<4x256xf32> to vector<2x128xf32>
    %337 = arith.addf %335, %336 : vector<2x128xf32>
    %338 = vector.extract_strided_slice %39 {offsets = [0, 0, 128], sizes = [1, 2, 128], strides = [1, 1, 1]} : vector<8x2x256xf32> to vector<1x2x128xf32>
    %339 = vector.shape_cast %338 : vector<1x2x128xf32> to vector<2x128xf32>
    %340 = vector.extract_strided_slice %333 {offsets = [2, 128], sizes = [2, 128], strides = [1, 1]} : vector<4x256xf32> to vector<2x128xf32>
    %341 = arith.addf %339, %340 : vector<2x128xf32>
    %342 = tpu.concatenate %337, %341 in 0 : vector<2x128xf32>, vector<2x128xf32> -> vector<4x128xf32>
    %343 = vector.extract_strided_slice %342 {offsets = [0, 0], sizes = [4, 96], strides = [1, 1]} : vector<4x128xf32> to vector<4x96xf32>
    %344 = arith.negf %343 : vector<4x96xf32>
    %345 = math.exp %344 : vector<4x96xf32>
    %cst_96 = arith.constant 1.000000e+00 : f32
    %346 = vector.broadcast %cst_96 : f32 to vector<4x96xf32>
    %347 = arith.addf %346, %345 : vector<4x96xf32>
    %348 = arith.divf %346, %347 : vector<4x96xf32>
    %349 = vector.extract_strided_slice %342 {offsets = [0, 96], sizes = [4, 32], strides = [1, 1]} : vector<4x128xf32> to vector<4x32xf32>
    %350 = math.tanh %349 : vector<4x32xf32>
    %351 = vector.extract_strided_slice %348 {offsets = [0, 0], sizes = [4, 32], strides = [1, 1]} : vector<4x96xf32> to vector<4x32xf32>
    %352 = vector.extract_strided_slice %348 {offsets = [0, 32], sizes = [4, 32], strides = [1, 1]} : vector<4x96xf32> to vector<4x32xf32>
    %353 = vector.extract_strided_slice %348 {offsets = [0, 64], sizes = [4, 32], strides = [1, 1]} : vector<4x96xf32> to vector<4x32xf32>
    %354 = arith.mulf %352, %323 : vector<4x32xf32>
    %355 = arith.mulf %351, %350 : vector<4x32xf32>
    %356 = arith.addf %354, %355 : vector<4x32xf32>
    %357 = math.tanh %356 : vector<4x32xf32>
    %358 = arith.mulf %353, %357 : vector<4x32xf32>
    %359 = vector.shape_cast %31 : vector<4x1xi1> to vector<4x1xi1>
    %360 = vector.broadcast %359 : vector<4x1xi1> to vector<4x32xi1>
    %361 = arith.select %360, %358, %320 : vector<4x32xi1>, vector<4x32xf32>
    %362 = vector.extract_strided_slice %361 {offsets = [0, 0], sizes = [2, 32], strides = [1, 1]} : vector<4x32xf32> to vector<2x32xf32>
    %c7_97 = arith.constant 7 : index
    %c0_98 = arith.constant 0 : index
    %c0_99 = arith.constant 0 : index
    %363 = vector.load %arg15[%c7_97, %c0_98, %c0_99] : memref<8x2x32xf32, #tpu.memory_space<vmem>>, vector<1x2x32xf32>
    %364 = vector.shape_cast %363 : vector<1x2x32xf32> to vector<2x32xf32>
    %365 = vector.shape_cast %362 : vector<2x32xf32> to vector<1x2x32xf32>
    tpu.vector_store %arg15[%c7_97, %c0_98, %c0_99], %365 {strides = array<i32>} : memref<8x2x32xf32, #tpu.memory_space<vmem>>, vector<1x2x32xf32>,
    %366 = vector.extract_strided_slice %361 {offsets = [2, 0], sizes = [2, 32], strides = [1, 1]} : vector<4x32xf32> to vector<2x32xf32>
    %c0_100 = arith.constant 0 : index
    %c0_101 = arith.constant 0 : index
    %c0_102 = arith.constant 0 : index
    %367 = vector.load %arg16[%c0_100, %c0_101, %c0_102] : memref<8x2x32xf32, #tpu.memory_space<vmem>>, vector<1x2x32xf32>
    %368 = vector.shape_cast %367 : vector<1x2x32xf32> to vector<2x32xf32>
    %369 = vector.shape_cast %366 : vector<2x32xf32> to vector<1x2x32xf32>
    tpu.vector_store %arg16[%c0_100, %c0_101, %c0_102], %369 {strides = array<i32>} : memref<8x2x32xf32, #tpu.memory_space<vmem>>, vector<1x2x32xf32>,
    %c0_103 = arith.constant 0 : index
    %c0_104 = arith.constant 0 : index
    %c0_105 = arith.constant 0 : index
    %370 = vector.load %arg15[%c0_103, %c0_104, %c0_105] : memref<8x2x32xf32, #tpu.memory_space<vmem>>, vector<8x2x32xf32>
    %c0_106 = arith.constant 0 : index
    %c0_107 = arith.constant 0 : index
    %c0_108 = arith.constant 0 : index
    %371 = vector.load %arg16[%c0_106, %c0_107, %c0_108] : memref<8x2x32xf32, #tpu.memory_space<vmem>>, vector<8x2x32xf32>
    %372 = tpu.concatenate %370, %371 in 2 : vector<8x2x32xf32>, vector<8x2x32xf32> -> vector<8x2x64xf32>
    %373 = vector.shape_cast %372 : vector<8x2x64xf32> to vector<16x64xf32>
    %374 = arith.truncf %373 : vector<16x64xf32> to vector<16x64xbf16>
    %c0_109 = arith.constant 0 : index
    %c0_110 = arith.constant 0 : index
    %375 = vector.load %arg9[%c0_109, %c0_110] : memref<64x256xbf16, #tpu.memory_space<vmem>>, vector<64x256xbf16>
    %cst_111 = arith.constant dense<0.000000e+00> : vector<16x256xf32>
    %376 = tpu.matmul %374, %375, %cst_111 {dimension_numbers = #tpu.dot_dimension_numbers<[1], [0], [0], [1], [0, 0, 1, 1], [], []>} : vector<16x64xbf16>, vector<64x256xbf16>, vector<16x256xf32> -> vector<16x256xf32>
    %c0_112 = arith.constant 0 : index
    %c0_113 = arith.constant 0 : index
    %377 = vector.load %arg11[%c0_112, %c0_113] : memref<1x256xf32, #tpu.memory_space<vmem>>, vector<1x256xf32>
    %378 = vector.broadcast %377 : vector<1x256xf32> to vector<16x256xf32>
    %379 = arith.addf %376, %378 : vector<16x256xf32>
    %380 = vector.shape_cast %379 : vector<16x256xf32> to vector<8x2x256xf32>
    %c0_114 = arith.constant 0 : index
    %c0_115 = arith.constant 0 : index
    %381 = vector.load %arg10[%c0_114, %c0_115] : memref<32x256xbf16, #tpu.memory_space<vmem>>, vector<32x256xbf16>
    %c1_116 = arith.constant 1 : index
    %c0_117 = arith.constant 0 : index
    %c0_118 = arith.constant 0 : index
    %382 = vector.load %arg4[%c1_116, %c0_117, %c0_118] : memref<2x4x32xf32, #tpu.memory_space<vmem>>, vector<1x4x32xf32>
    %383 = vector.shape_cast %382 : vector<1x4x32xf32> to vector<4x32xf32>
    %c1_119 = arith.constant 1 : index
    %c0_120 = arith.constant 0 : index
    %c0_121 = arith.constant 0 : index
    %384 = vector.load %arg5[%c1_119, %c0_120, %c0_121] : memref<2x4x32xf32, #tpu.memory_space<vmem>>, vector<1x4x32xf32>
    %385 = vector.shape_cast %384 : vector<1x4x32xf32> to vector<4x32xf32>
    %386 = arith.truncf %383 : vector<4x32xf32> to vector<4x32xbf16>
    %cst_122 = arith.constant dense<0.000000e+00> : vector<4x256xf32>
    %387 = tpu.matmul %386, %381, %cst_122 {dimension_numbers = #tpu.dot_dimension_numbers<[1], [0], [0], [1], [0, 0, 1, 1], [], []>} : vector<4x32xbf16>, vector<32x256xbf16>, vector<4x256xf32> -> vector<4x256xf32>
    %388 = vector.extract_strided_slice %380 {offsets = [0, 0, 0], sizes = [1, 2, 128], strides = [1, 1, 1]} : vector<8x2x256xf32> to vector<1x2x128xf32>
    %389 = vector.shape_cast %388 : vector<1x2x128xf32> to vector<2x128xf32>
    %390 = vector.extract_strided_slice %387 {offsets = [0, 0], sizes = [2, 128], strides = [1, 1]} : vector<4x256xf32> to vector<2x128xf32>
    %391 = arith.addf %389, %390 : vector<2x128xf32>
    %392 = vector.extract_strided_slice %380 {offsets = [7, 0, 128], sizes = [1, 2, 128], strides = [1, 1, 1]} : vector<8x2x256xf32> to vector<1x2x128xf32>
    %393 = vector.shape_cast %392 : vector<1x2x128xf32> to vector<2x128xf32>
    %394 = vector.extract_strided_slice %387 {offsets = [2, 128], sizes = [2, 128], strides = [1, 1]} : vector<4x256xf32> to vector<2x128xf32>
    %395 = arith.addf %393, %394 : vector<2x128xf32>
    %396 = tpu.concatenate %391, %395 in 0 : vector<2x128xf32>, vector<2x128xf32> -> vector<4x128xf32>
    %397 = vector.extract_strided_slice %396 {offsets = [0, 0], sizes = [4, 96], strides = [1, 1]} : vector<4x128xf32> to vector<4x96xf32>
    %398 = arith.negf %397 : vector<4x96xf32>
    %399 = math.exp %398 : vector<4x96xf32>
    %cst_123 = arith.constant 1.000000e+00 : f32
    %400 = vector.broadcast %cst_123 : f32 to vector<4x96xf32>
    %401 = arith.addf %400, %399 : vector<4x96xf32>
    %402 = arith.divf %400, %401 : vector<4x96xf32>
    %403 = vector.extract_strided_slice %396 {offsets = [0, 96], sizes = [4, 32], strides = [1, 1]} : vector<4x128xf32> to vector<4x32xf32>
    %404 = math.tanh %403 : vector<4x32xf32>
    %405 = vector.extract_strided_slice %402 {offsets = [0, 0], sizes = [4, 32], strides = [1, 1]} : vector<4x96xf32> to vector<4x32xf32>
    %406 = vector.extract_strided_slice %402 {offsets = [0, 32], sizes = [4, 32], strides = [1, 1]} : vector<4x96xf32> to vector<4x32xf32>
    %407 = vector.extract_strided_slice %402 {offsets = [0, 64], sizes = [4, 32], strides = [1, 1]} : vector<4x96xf32> to vector<4x32xf32>
    %408 = arith.mulf %406, %385 : vector<4x32xf32>
    %409 = arith.mulf %405, %404 : vector<4x32xf32>
    %410 = arith.addf %408, %409 : vector<4x32xf32>
    %411 = math.tanh %410 : vector<4x32xf32>
    %412 = arith.mulf %407, %411 : vector<4x32xf32>
    %413 = vector.shape_cast %3 : vector<4x1xi1> to vector<4x1xi1>
    %414 = vector.broadcast %413 : vector<4x1xi1> to vector<4x32xi1>
    %415 = arith.select %414, %412, %383 : vector<4x32xi1>, vector<4x32xf32>
    %416 = vector.shape_cast %3 : vector<4x1xi1> to vector<4x1xi1>
    %417 = vector.broadcast %416 : vector<4x1xi1> to vector<4x32xi1>
    %418 = arith.select %417, %410, %385 : vector<4x32xi1>, vector<4x32xf32>
    %419 = vector.extract_strided_slice %415 {offsets = [0, 0], sizes = [2, 32], strides = [1, 1]} : vector<4x32xf32> to vector<2x32xf32>
    %c0_124 = arith.constant 0 : index
    %c0_125 = arith.constant 0 : index
    %c0_126 = arith.constant 0 : index
    %420 = vector.load %arg17[%c0_124, %c0_125, %c0_126] : memref<8x2x32xf32, #tpu.memory_space<vmem>>, vector<1x2x32xf32>
    %421 = vector.shape_cast %420 : vector<1x2x32xf32> to vector<2x32xf32>
    %422 = vector.shape_cast %419 : vector<2x32xf32> to vector<1x2x32xf32>
    tpu.vector_store %arg17[%c0_124, %c0_125, %c0_126], %422 {strides = array<i32>} : memref<8x2x32xf32, #tpu.memory_space<vmem>>, vector<1x2x32xf32>,
    %423 = vector.extract_strided_slice %415 {offsets = [2, 0], sizes = [2, 32], strides = [1, 1]} : vector<4x32xf32> to vector<2x32xf32>
    %c7_127 = arith.constant 7 : index
    %c0_128 = arith.constant 0 : index
    %c0_129 = arith.constant 0 : index
    %424 = vector.load %arg18[%c7_127, %c0_128, %c0_129] : memref<8x2x32xf32, #tpu.memory_space<vmem>>, vector<1x2x32xf32>
    %425 = vector.shape_cast %424 : vector<1x2x32xf32> to vector<2x32xf32>
    %426 = vector.shape_cast %423 : vector<2x32xf32> to vector<1x2x32xf32>
    tpu.vector_store %arg18[%c7_127, %c0_128, %c0_129], %426 {strides = array<i32>} : memref<8x2x32xf32, #tpu.memory_space<vmem>>, vector<1x2x32xf32>,
    %427 = arith.truncf %415 : vector<4x32xf32> to vector<4x32xbf16>
    %cst_130 = arith.constant dense<0.000000e+00> : vector<4x256xf32>
    %428 = tpu.matmul %427, %381, %cst_130 {dimension_numbers = #tpu.dot_dimension_numbers<[1], [0], [0], [1], [0, 0, 1, 1], [], []>} : vector<4x32xbf16>, vector<32x256xbf16>, vector<4x256xf32> -> vector<4x256xf32>
    %429 = vector.extract_strided_slice %380 {offsets = [1, 0, 0], sizes = [1, 2, 128], strides = [1, 1, 1]} : vector<8x2x256xf32> to vector<1x2x128xf32>
    %430 = vector.shape_cast %429 : vector<1x2x128xf32> to vector<2x128xf32>
    %431 = vector.extract_strided_slice %428 {offsets = [0, 0], sizes = [2, 128], strides = [1, 1]} : vector<4x256xf32> to vector<2x128xf32>
    %432 = arith.addf %430, %431 : vector<2x128xf32>
    %433 = vector.extract_strided_slice %380 {offsets = [6, 0, 128], sizes = [1, 2, 128], strides = [1, 1, 1]} : vector<8x2x256xf32> to vector<1x2x128xf32>
    %434 = vector.shape_cast %433 : vector<1x2x128xf32> to vector<2x128xf32>
    %435 = vector.extract_strided_slice %428 {offsets = [2, 128], sizes = [2, 128], strides = [1, 1]} : vector<4x256xf32> to vector<2x128xf32>
    %436 = arith.addf %434, %435 : vector<2x128xf32>
    %437 = tpu.concatenate %432, %436 in 0 : vector<2x128xf32>, vector<2x128xf32> -> vector<4x128xf32>
    %438 = vector.extract_strided_slice %437 {offsets = [0, 0], sizes = [4, 96], strides = [1, 1]} : vector<4x128xf32> to vector<4x96xf32>
    %439 = arith.negf %438 : vector<4x96xf32>
    %440 = math.exp %439 : vector<4x96xf32>
    %cst_131 = arith.constant 1.000000e+00 : f32
    %441 = vector.broadcast %cst_131 : f32 to vector<4x96xf32>
    %442 = arith.addf %441, %440 : vector<4x96xf32>
    %443 = arith.divf %441, %442 : vector<4x96xf32>
    %444 = vector.extract_strided_slice %437 {offsets = [0, 96], sizes = [4, 32], strides = [1, 1]} : vector<4x128xf32> to vector<4x32xf32>
    %445 = math.tanh %444 : vector<4x32xf32>
    %446 = vector.extract_strided_slice %443 {offsets = [0, 0], sizes = [4, 32], strides = [1, 1]} : vector<4x96xf32> to vector<4x32xf32>
    %447 = vector.extract_strided_slice %443 {offsets = [0, 32], sizes = [4, 32], strides = [1, 1]} : vector<4x96xf32> to vector<4x32xf32>
    %448 = vector.extract_strided_slice %443 {offsets = [0, 64], sizes = [4, 32], strides = [1, 1]} : vector<4x96xf32> to vector<4x32xf32>
    %449 = arith.mulf %447, %418 : vector<4x32xf32>
    %450 = arith.mulf %446, %445 : vector<4x32xf32>
    %451 = arith.addf %449, %450 : vector<4x32xf32>
    %452 = math.tanh %451 : vector<4x32xf32>
    %453 = arith.mulf %448, %452 : vector<4x32xf32>
    %454 = vector.shape_cast %7 : vector<4x1xi1> to vector<4x1xi1>
    %455 = vector.broadcast %454 : vector<4x1xi1> to vector<4x32xi1>
    %456 = arith.select %455, %453, %415 : vector<4x32xi1>, vector<4x32xf32>
    %457 = vector.shape_cast %7 : vector<4x1xi1> to vector<4x1xi1>
    %458 = vector.broadcast %457 : vector<4x1xi1> to vector<4x32xi1>
    %459 = arith.select %458, %451, %418 : vector<4x32xi1>, vector<4x32xf32>
    %460 = vector.extract_strided_slice %456 {offsets = [0, 0], sizes = [2, 32], strides = [1, 1]} : vector<4x32xf32> to vector<2x32xf32>
    %c1_132 = arith.constant 1 : index
    %c0_133 = arith.constant 0 : index
    %c0_134 = arith.constant 0 : index
    %461 = vector.load %arg17[%c1_132, %c0_133, %c0_134] : memref<8x2x32xf32, #tpu.memory_space<vmem>>, vector<1x2x32xf32>
    %462 = vector.shape_cast %461 : vector<1x2x32xf32> to vector<2x32xf32>
    %463 = vector.shape_cast %460 : vector<2x32xf32> to vector<1x2x32xf32>
    tpu.vector_store %arg17[%c1_132, %c0_133, %c0_134], %463 {strides = array<i32>} : memref<8x2x32xf32, #tpu.memory_space<vmem>>, vector<1x2x32xf32>,
    %464 = vector.extract_strided_slice %456 {offsets = [2, 0], sizes = [2, 32], strides = [1, 1]} : vector<4x32xf32> to vector<2x32xf32>
    %c6_135 = arith.constant 6 : index
    %c0_136 = arith.constant 0 : index
    %c0_137 = arith.constant 0 : index
    %465 = vector.load %arg18[%c6_135, %c0_136, %c0_137] : memref<8x2x32xf32, #tpu.memory_space<vmem>>, vector<1x2x32xf32>
    %466 = vector.shape_cast %465 : vector<1x2x32xf32> to vector<2x32xf32>
    %467 = vector.shape_cast %464 : vector<2x32xf32> to vector<1x2x32xf32>
    tpu.vector_store %arg18[%c6_135, %c0_136, %c0_137], %467 {strides = array<i32>} : memref<8x2x32xf32, #tpu.memory_space<vmem>>, vector<1x2x32xf32>,
    %468 = arith.truncf %456 : vector<4x32xf32> to vector<4x32xbf16>
    %cst_138 = arith.constant dense<0.000000e+00> : vector<4x256xf32>
    %469 = tpu.matmul %468, %381, %cst_138 {dimension_numbers = #tpu.dot_dimension_numbers<[1], [0], [0], [1], [0, 0, 1, 1], [], []>} : vector<4x32xbf16>, vector<32x256xbf16>, vector<4x256xf32> -> vector<4x256xf32>
    %470 = vector.extract_strided_slice %380 {offsets = [2, 0, 0], sizes = [1, 2, 128], strides = [1, 1, 1]} : vector<8x2x256xf32> to vector<1x2x128xf32>
    %471 = vector.shape_cast %470 : vector<1x2x128xf32> to vector<2x128xf32>
    %472 = vector.extract_strided_slice %469 {offsets = [0, 0], sizes = [2, 128], strides = [1, 1]} : vector<4x256xf32> to vector<2x128xf32>
    %473 = arith.addf %471, %472 : vector<2x128xf32>
    %474 = vector.extract_strided_slice %380 {offsets = [5, 0, 128], sizes = [1, 2, 128], strides = [1, 1, 1]} : vector<8x2x256xf32> to vector<1x2x128xf32>
    %475 = vector.shape_cast %474 : vector<1x2x128xf32> to vector<2x128xf32>
    %476 = vector.extract_strided_slice %469 {offsets = [2, 128], sizes = [2, 128], strides = [1, 1]} : vector<4x256xf32> to vector<2x128xf32>
    %477 = arith.addf %475, %476 : vector<2x128xf32>
    %478 = tpu.concatenate %473, %477 in 0 : vector<2x128xf32>, vector<2x128xf32> -> vector<4x128xf32>
    %479 = vector.extract_strided_slice %478 {offsets = [0, 0], sizes = [4, 96], strides = [1, 1]} : vector<4x128xf32> to vector<4x96xf32>
    %480 = arith.negf %479 : vector<4x96xf32>
    %481 = math.exp %480 : vector<4x96xf32>
    %cst_139 = arith.constant 1.000000e+00 : f32
    %482 = vector.broadcast %cst_139 : f32 to vector<4x96xf32>
    %483 = arith.addf %482, %481 : vector<4x96xf32>
    %484 = arith.divf %482, %483 : vector<4x96xf32>
    %485 = vector.extract_strided_slice %478 {offsets = [0, 96], sizes = [4, 32], strides = [1, 1]} : vector<4x128xf32> to vector<4x32xf32>
    %486 = math.tanh %485 : vector<4x32xf32>
    %487 = vector.extract_strided_slice %484 {offsets = [0, 0], sizes = [4, 32], strides = [1, 1]} : vector<4x96xf32> to vector<4x32xf32>
    %488 = vector.extract_strided_slice %484 {offsets = [0, 32], sizes = [4, 32], strides = [1, 1]} : vector<4x96xf32> to vector<4x32xf32>
    %489 = vector.extract_strided_slice %484 {offsets = [0, 64], sizes = [4, 32], strides = [1, 1]} : vector<4x96xf32> to vector<4x32xf32>
    %490 = arith.mulf %488, %459 : vector<4x32xf32>
    %491 = arith.mulf %487, %486 : vector<4x32xf32>
    %492 = arith.addf %490, %491 : vector<4x32xf32>
    %493 = math.tanh %492 : vector<4x32xf32>
    %494 = arith.mulf %489, %493 : vector<4x32xf32>
    %495 = vector.shape_cast %11 : vector<4x1xi1> to vector<4x1xi1>
    %496 = vector.broadcast %495 : vector<4x1xi1> to vector<4x32xi1>
    %497 = arith.select %496, %494, %456 : vector<4x32xi1>, vector<4x32xf32>
    %498 = vector.shape_cast %11 : vector<4x1xi1> to vector<4x1xi1>
    %499 = vector.broadcast %498 : vector<4x1xi1> to vector<4x32xi1>
    %500 = arith.select %499, %492, %459 : vector<4x32xi1>, vector<4x32xf32>
    %501 = vector.extract_strided_slice %497 {offsets = [0, 0], sizes = [2, 32], strides = [1, 1]} : vector<4x32xf32> to vector<2x32xf32>
    %c2_140 = arith.constant 2 : index
    %c0_141 = arith.constant 0 : index
    %c0_142 = arith.constant 0 : index
    %502 = vector.load %arg17[%c2_140, %c0_141, %c0_142] : memref<8x2x32xf32, #tpu.memory_space<vmem>>, vector<1x2x32xf32>
    %503 = vector.shape_cast %502 : vector<1x2x32xf32> to vector<2x32xf32>
    %504 = vector.shape_cast %501 : vector<2x32xf32> to vector<1x2x32xf32>
    tpu.vector_store %arg17[%c2_140, %c0_141, %c0_142], %504 {strides = array<i32>} : memref<8x2x32xf32, #tpu.memory_space<vmem>>, vector<1x2x32xf32>,
    %505 = vector.extract_strided_slice %497 {offsets = [2, 0], sizes = [2, 32], strides = [1, 1]} : vector<4x32xf32> to vector<2x32xf32>
    %c5_143 = arith.constant 5 : index
    %c0_144 = arith.constant 0 : index
    %c0_145 = arith.constant 0 : index
    %506 = vector.load %arg18[%c5_143, %c0_144, %c0_145] : memref<8x2x32xf32, #tpu.memory_space<vmem>>, vector<1x2x32xf32>
    %507 = vector.shape_cast %506 : vector<1x2x32xf32> to vector<2x32xf32>
    %508 = vector.shape_cast %505 : vector<2x32xf32> to vector<1x2x32xf32>
    tpu.vector_store %arg18[%c5_143, %c0_144, %c0_145], %508 {strides = array<i32>} : memref<8x2x32xf32, #tpu.memory_space<vmem>>, vector<1x2x32xf32>,
    %509 = arith.truncf %497 : vector<4x32xf32> to vector<4x32xbf16>
    %cst_146 = arith.constant dense<0.000000e+00> : vector<4x256xf32>
    %510 = tpu.matmul %509, %381, %cst_146 {dimension_numbers = #tpu.dot_dimension_numbers<[1], [0], [0], [1], [0, 0, 1, 1], [], []>} : vector<4x32xbf16>, vector<32x256xbf16>, vector<4x256xf32> -> vector<4x256xf32>
    %511 = vector.extract_strided_slice %380 {offsets = [3, 0, 0], sizes = [1, 2, 128], strides = [1, 1, 1]} : vector<8x2x256xf32> to vector<1x2x128xf32>
    %512 = vector.shape_cast %511 : vector<1x2x128xf32> to vector<2x128xf32>
    %513 = vector.extract_strided_slice %510 {offsets = [0, 0], sizes = [2, 128], strides = [1, 1]} : vector<4x256xf32> to vector<2x128xf32>
    %514 = arith.addf %512, %513 : vector<2x128xf32>
    %515 = vector.extract_strided_slice %380 {offsets = [4, 0, 128], sizes = [1, 2, 128], strides = [1, 1, 1]} : vector<8x2x256xf32> to vector<1x2x128xf32>
    %516 = vector.shape_cast %515 : vector<1x2x128xf32> to vector<2x128xf32>
    %517 = vector.extract_strided_slice %510 {offsets = [2, 128], sizes = [2, 128], strides = [1, 1]} : vector<4x256xf32> to vector<2x128xf32>
    %518 = arith.addf %516, %517 : vector<2x128xf32>
    %519 = tpu.concatenate %514, %518 in 0 : vector<2x128xf32>, vector<2x128xf32> -> vector<4x128xf32>
    %520 = vector.extract_strided_slice %519 {offsets = [0, 0], sizes = [4, 96], strides = [1, 1]} : vector<4x128xf32> to vector<4x96xf32>
    %521 = arith.negf %520 : vector<4x96xf32>
    %522 = math.exp %521 : vector<4x96xf32>
    %cst_147 = arith.constant 1.000000e+00 : f32
    %523 = vector.broadcast %cst_147 : f32 to vector<4x96xf32>
    %524 = arith.addf %523, %522 : vector<4x96xf32>
    %525 = arith.divf %523, %524 : vector<4x96xf32>
    %526 = vector.extract_strided_slice %519 {offsets = [0, 96], sizes = [4, 32], strides = [1, 1]} : vector<4x128xf32> to vector<4x32xf32>
    %527 = math.tanh %526 : vector<4x32xf32>
    %528 = vector.extract_strided_slice %525 {offsets = [0, 0], sizes = [4, 32], strides = [1, 1]} : vector<4x96xf32> to vector<4x32xf32>
    %529 = vector.extract_strided_slice %525 {offsets = [0, 32], sizes = [4, 32], strides = [1, 1]} : vector<4x96xf32> to vector<4x32xf32>
    %530 = vector.extract_strided_slice %525 {offsets = [0, 64], sizes = [4, 32], strides = [1, 1]} : vector<4x96xf32> to vector<4x32xf32>
    %531 = arith.mulf %529, %500 : vector<4x32xf32>
    %532 = arith.mulf %528, %527 : vector<4x32xf32>
    %533 = arith.addf %531, %532 : vector<4x32xf32>
    %534 = math.tanh %533 : vector<4x32xf32>
    %535 = arith.mulf %530, %534 : vector<4x32xf32>
    %536 = vector.shape_cast %15 : vector<4x1xi1> to vector<4x1xi1>
    %537 = vector.broadcast %536 : vector<4x1xi1> to vector<4x32xi1>
    %538 = arith.select %537, %535, %497 : vector<4x32xi1>, vector<4x32xf32>
    %539 = vector.shape_cast %15 : vector<4x1xi1> to vector<4x1xi1>
    %540 = vector.broadcast %539 : vector<4x1xi1> to vector<4x32xi1>
    %541 = arith.select %540, %533, %500 : vector<4x32xi1>, vector<4x32xf32>
    %542 = vector.extract_strided_slice %538 {offsets = [0, 0], sizes = [2, 32], strides = [1, 1]} : vector<4x32xf32> to vector<2x32xf32>
    %c3_148 = arith.constant 3 : index
    %c0_149 = arith.constant 0 : index
    %c0_150 = arith.constant 0 : index
    %543 = vector.load %arg17[%c3_148, %c0_149, %c0_150] : memref<8x2x32xf32, #tpu.memory_space<vmem>>, vector<1x2x32xf32>
    %544 = vector.shape_cast %543 : vector<1x2x32xf32> to vector<2x32xf32>
    %545 = vector.shape_cast %542 : vector<2x32xf32> to vector<1x2x32xf32>
    tpu.vector_store %arg17[%c3_148, %c0_149, %c0_150], %545 {strides = array<i32>} : memref<8x2x32xf32, #tpu.memory_space<vmem>>, vector<1x2x32xf32>,
    %546 = vector.extract_strided_slice %538 {offsets = [2, 0], sizes = [2, 32], strides = [1, 1]} : vector<4x32xf32> to vector<2x32xf32>
    %c4_151 = arith.constant 4 : index
    %c0_152 = arith.constant 0 : index
    %c0_153 = arith.constant 0 : index
    %547 = vector.load %arg18[%c4_151, %c0_152, %c0_153] : memref<8x2x32xf32, #tpu.memory_space<vmem>>, vector<1x2x32xf32>
    %548 = vector.shape_cast %547 : vector<1x2x32xf32> to vector<2x32xf32>
    %549 = vector.shape_cast %546 : vector<2x32xf32> to vector<1x2x32xf32>
    tpu.vector_store %arg18[%c4_151, %c0_152, %c0_153], %549 {strides = array<i32>} : memref<8x2x32xf32, #tpu.memory_space<vmem>>, vector<1x2x32xf32>,
    %550 = arith.truncf %538 : vector<4x32xf32> to vector<4x32xbf16>
    %cst_154 = arith.constant dense<0.000000e+00> : vector<4x256xf32>
    %551 = tpu.matmul %550, %381, %cst_154 {dimension_numbers = #tpu.dot_dimension_numbers<[1], [0], [0], [1], [0, 0, 1, 1], [], []>} : vector<4x32xbf16>, vector<32x256xbf16>, vector<4x256xf32> -> vector<4x256xf32>
    %552 = vector.extract_strided_slice %380 {offsets = [4, 0, 0], sizes = [1, 2, 128], strides = [1, 1, 1]} : vector<8x2x256xf32> to vector<1x2x128xf32>
    %553 = vector.shape_cast %552 : vector<1x2x128xf32> to vector<2x128xf32>
    %554 = vector.extract_strided_slice %551 {offsets = [0, 0], sizes = [2, 128], strides = [1, 1]} : vector<4x256xf32> to vector<2x128xf32>
    %555 = arith.addf %553, %554 : vector<2x128xf32>
    %556 = vector.extract_strided_slice %380 {offsets = [3, 0, 128], sizes = [1, 2, 128], strides = [1, 1, 1]} : vector<8x2x256xf32> to vector<1x2x128xf32>
    %557 = vector.shape_cast %556 : vector<1x2x128xf32> to vector<2x128xf32>
    %558 = vector.extract_strided_slice %551 {offsets = [2, 128], sizes = [2, 128], strides = [1, 1]} : vector<4x256xf32> to vector<2x128xf32>
    %559 = arith.addf %557, %558 : vector<2x128xf32>
    %560 = tpu.concatenate %555, %559 in 0 : vector<2x128xf32>, vector<2x128xf32> -> vector<4x128xf32>
    %561 = vector.extract_strided_slice %560 {offsets = [0, 0], sizes = [4, 96], strides = [1, 1]} : vector<4x128xf32> to vector<4x96xf32>
    %562 = arith.negf %561 : vector<4x96xf32>
    %563 = math.exp %562 : vector<4x96xf32>
    %cst_155 = arith.constant 1.000000e+00 : f32
    %564 = vector.broadcast %cst_155 : f32 to vector<4x96xf32>
    %565 = arith.addf %564, %563 : vector<4x96xf32>
    %566 = arith.divf %564, %565 : vector<4x96xf32>
    %567 = vector.extract_strided_slice %560 {offsets = [0, 96], sizes = [4, 32], strides = [1, 1]} : vector<4x128xf32> to vector<4x32xf32>
    %568 = math.tanh %567 : vector<4x32xf32>
    %569 = vector.extract_strided_slice %566 {offsets = [0, 0], sizes = [4, 32], strides = [1, 1]} : vector<4x96xf32> to vector<4x32xf32>
    %570 = vector.extract_strided_slice %566 {offsets = [0, 32], sizes = [4, 32], strides = [1, 1]} : vector<4x96xf32> to vector<4x32xf32>
    %571 = vector.extract_strided_slice %566 {offsets = [0, 64], sizes = [4, 32], strides = [1, 1]} : vector<4x96xf32> to vector<4x32xf32>
    %572 = arith.mulf %570, %541 : vector<4x32xf32>
    %573 = arith.mulf %569, %568 : vector<4x32xf32>
    %574 = arith.addf %572, %573 : vector<4x32xf32>
    %575 = math.tanh %574 : vector<4x32xf32>
    %576 = arith.mulf %571, %575 : vector<4x32xf32>
    %577 = vector.shape_cast %19 : vector<4x1xi1> to vector<4x1xi1>
    %578 = vector.broadcast %577 : vector<4x1xi1> to vector<4x32xi1>
    %579 = arith.select %578, %576, %538 : vector<4x32xi1>, vector<4x32xf32>
    %580 = vector.shape_cast %19 : vector<4x1xi1> to vector<4x1xi1>
    %581 = vector.broadcast %580 : vector<4x1xi1> to vector<4x32xi1>
    %582 = arith.select %581, %574, %541 : vector<4x32xi1>, vector<4x32xf32>
    %583 = vector.extract_strided_slice %579 {offsets = [0, 0], sizes = [2, 32], strides = [1, 1]} : vector<4x32xf32> to vector<2x32xf32>
    %c4_156 = arith.constant 4 : index
    %c0_157 = arith.constant 0 : index
    %c0_158 = arith.constant 0 : index
    %584 = vector.load %arg17[%c4_156, %c0_157, %c0_158] : memref<8x2x32xf32, #tpu.memory_space<vmem>>, vector<1x2x32xf32>
    %585 = vector.shape_cast %584 : vector<1x2x32xf32> to vector<2x32xf32>
    %586 = vector.shape_cast %583 : vector<2x32xf32> to vector<1x2x32xf32>
    tpu.vector_store %arg17[%c4_156, %c0_157, %c0_158], %586 {strides = array<i32>} : memref<8x2x32xf32, #tpu.memory_space<vmem>>, vector<1x2x32xf32>,
    %587 = vector.extract_strided_slice %579 {offsets = [2, 0], sizes = [2, 32], strides = [1, 1]} : vector<4x32xf32> to vector<2x32xf32>
    %c3_159 = arith.constant 3 : index
    %c0_160 = arith.constant 0 : index
    %c0_161 = arith.constant 0 : index
    %588 = vector.load %arg18[%c3_159, %c0_160, %c0_161] : memref<8x2x32xf32, #tpu.memory_space<vmem>>, vector<1x2x32xf32>
    %589 = vector.shape_cast %588 : vector<1x2x32xf32> to vector<2x32xf32>
    %590 = vector.shape_cast %587 : vector<2x32xf32> to vector<1x2x32xf32>
    tpu.vector_store %arg18[%c3_159, %c0_160, %c0_161], %590 {strides = array<i32>} : memref<8x2x32xf32, #tpu.memory_space<vmem>>, vector<1x2x32xf32>,
    %591 = arith.truncf %579 : vector<4x32xf32> to vector<4x32xbf16>
    %cst_162 = arith.constant dense<0.000000e+00> : vector<4x256xf32>
    %592 = tpu.matmul %591, %381, %cst_162 {dimension_numbers = #tpu.dot_dimension_numbers<[1], [0], [0], [1], [0, 0, 1, 1], [], []>} : vector<4x32xbf16>, vector<32x256xbf16>, vector<4x256xf32> -> vector<4x256xf32>
    %593 = vector.extract_strided_slice %380 {offsets = [5, 0, 0], sizes = [1, 2, 128], strides = [1, 1, 1]} : vector<8x2x256xf32> to vector<1x2x128xf32>
    %594 = vector.shape_cast %593 : vector<1x2x128xf32> to vector<2x128xf32>
    %595 = vector.extract_strided_slice %592 {offsets = [0, 0], sizes = [2, 128], strides = [1, 1]} : vector<4x256xf32> to vector<2x128xf32>
    %596 = arith.addf %594, %595 : vector<2x128xf32>
    %597 = vector.extract_strided_slice %380 {offsets = [2, 0, 128], sizes = [1, 2, 128], strides = [1, 1, 1]} : vector<8x2x256xf32> to vector<1x2x128xf32>
    %598 = vector.shape_cast %597 : vector<1x2x128xf32> to vector<2x128xf32>
    %599 = vector.extract_strided_slice %592 {offsets = [2, 128], sizes = [2, 128], strides = [1, 1]} : vector<4x256xf32> to vector<2x128xf32>
    %600 = arith.addf %598, %599 : vector<2x128xf32>
    %601 = tpu.concatenate %596, %600 in 0 : vector<2x128xf32>, vector<2x128xf32> -> vector<4x128xf32>
    %602 = vector.extract_strided_slice %601 {offsets = [0, 0], sizes = [4, 96], strides = [1, 1]} : vector<4x128xf32> to vector<4x96xf32>
    %603 = arith.negf %602 : vector<4x96xf32>
    %604 = math.exp %603 : vector<4x96xf32>
    %cst_163 = arith.constant 1.000000e+00 : f32
    %605 = vector.broadcast %cst_163 : f32 to vector<4x96xf32>
    %606 = arith.addf %605, %604 : vector<4x96xf32>
    %607 = arith.divf %605, %606 : vector<4x96xf32>
    %608 = vector.extract_strided_slice %601 {offsets = [0, 96], sizes = [4, 32], strides = [1, 1]} : vector<4x128xf32> to vector<4x32xf32>
    %609 = math.tanh %608 : vector<4x32xf32>
    %610 = vector.extract_strided_slice %607 {offsets = [0, 0], sizes = [4, 32], strides = [1, 1]} : vector<4x96xf32> to vector<4x32xf32>
    %611 = vector.extract_strided_slice %607 {offsets = [0, 32], sizes = [4, 32], strides = [1, 1]} : vector<4x96xf32> to vector<4x32xf32>
    %612 = vector.extract_strided_slice %607 {offsets = [0, 64], sizes = [4, 32], strides = [1, 1]} : vector<4x96xf32> to vector<4x32xf32>
    %613 = arith.mulf %611, %582 : vector<4x32xf32>
    %614 = arith.mulf %610, %609 : vector<4x32xf32>
    %615 = arith.addf %613, %614 : vector<4x32xf32>
    %616 = math.tanh %615 : vector<4x32xf32>
    %617 = arith.mulf %612, %616 : vector<4x32xf32>
    %618 = vector.shape_cast %23 : vector<4x1xi1> to vector<4x1xi1>
    %619 = vector.broadcast %618 : vector<4x1xi1> to vector<4x32xi1>
    %620 = arith.select %619, %617, %579 : vector<4x32xi1>, vector<4x32xf32>
    %621 = vector.shape_cast %23 : vector<4x1xi1> to vector<4x1xi1>
    %622 = vector.broadcast %621 : vector<4x1xi1> to vector<4x32xi1>
    %623 = arith.select %622, %615, %582 : vector<4x32xi1>, vector<4x32xf32>
    %624 = vector.extract_strided_slice %620 {offsets = [0, 0], sizes = [2, 32], strides = [1, 1]} : vector<4x32xf32> to vector<2x32xf32>
    %c5_164 = arith.constant 5 : index
    %c0_165 = arith.constant 0 : index
    %c0_166 = arith.constant 0 : index
    %625 = vector.load %arg17[%c5_164, %c0_165, %c0_166] : memref<8x2x32xf32, #tpu.memory_space<vmem>>, vector<1x2x32xf32>
    %626 = vector.shape_cast %625 : vector<1x2x32xf32> to vector<2x32xf32>
    %627 = vector.shape_cast %624 : vector<2x32xf32> to vector<1x2x32xf32>
    tpu.vector_store %arg17[%c5_164, %c0_165, %c0_166], %627 {strides = array<i32>} : memref<8x2x32xf32, #tpu.memory_space<vmem>>, vector<1x2x32xf32>,
    %628 = vector.extract_strided_slice %620 {offsets = [2, 0], sizes = [2, 32], strides = [1, 1]} : vector<4x32xf32> to vector<2x32xf32>
    %c2_167 = arith.constant 2 : index
    %c0_168 = arith.constant 0 : index
    %c0_169 = arith.constant 0 : index
    %629 = vector.load %arg18[%c2_167, %c0_168, %c0_169] : memref<8x2x32xf32, #tpu.memory_space<vmem>>, vector<1x2x32xf32>
    %630 = vector.shape_cast %629 : vector<1x2x32xf32> to vector<2x32xf32>
    %631 = vector.shape_cast %628 : vector<2x32xf32> to vector<1x2x32xf32>
    tpu.vector_store %arg18[%c2_167, %c0_168, %c0_169], %631 {strides = array<i32>} : memref<8x2x32xf32, #tpu.memory_space<vmem>>, vector<1x2x32xf32>,
    %632 = arith.truncf %620 : vector<4x32xf32> to vector<4x32xbf16>
    %cst_170 = arith.constant dense<0.000000e+00> : vector<4x256xf32>
    %633 = tpu.matmul %632, %381, %cst_170 {dimension_numbers = #tpu.dot_dimension_numbers<[1], [0], [0], [1], [0, 0, 1, 1], [], []>} : vector<4x32xbf16>, vector<32x256xbf16>, vector<4x256xf32> -> vector<4x256xf32>
    %634 = vector.extract_strided_slice %380 {offsets = [6, 0, 0], sizes = [1, 2, 128], strides = [1, 1, 1]} : vector<8x2x256xf32> to vector<1x2x128xf32>
    %635 = vector.shape_cast %634 : vector<1x2x128xf32> to vector<2x128xf32>
    %636 = vector.extract_strided_slice %633 {offsets = [0, 0], sizes = [2, 128], strides = [1, 1]} : vector<4x256xf32> to vector<2x128xf32>
    %637 = arith.addf %635, %636 : vector<2x128xf32>
    %638 = vector.extract_strided_slice %380 {offsets = [1, 0, 128], sizes = [1, 2, 128], strides = [1, 1, 1]} : vector<8x2x256xf32> to vector<1x2x128xf32>
    %639 = vector.shape_cast %638 : vector<1x2x128xf32> to vector<2x128xf32>
    %640 = vector.extract_strided_slice %633 {offsets = [2, 128], sizes = [2, 128], strides = [1, 1]} : vector<4x256xf32> to vector<2x128xf32>
    %641 = arith.addf %639, %640 : vector<2x128xf32>
    %642 = tpu.concatenate %637, %641 in 0 : vector<2x128xf32>, vector<2x128xf32> -> vector<4x128xf32>
    %643 = vector.extract_strided_slice %642 {offsets = [0, 0], sizes = [4, 96], strides = [1, 1]} : vector<4x128xf32> to vector<4x96xf32>
    %644 = arith.negf %643 : vector<4x96xf32>
    %645 = math.exp %644 : vector<4x96xf32>
    %cst_171 = arith.constant 1.000000e+00 : f32
    %646 = vector.broadcast %cst_171 : f32 to vector<4x96xf32>
    %647 = arith.addf %646, %645 : vector<4x96xf32>
    %648 = arith.divf %646, %647 : vector<4x96xf32>
    %649 = vector.extract_strided_slice %642 {offsets = [0, 96], sizes = [4, 32], strides = [1, 1]} : vector<4x128xf32> to vector<4x32xf32>
    %650 = math.tanh %649 : vector<4x32xf32>
    %651 = vector.extract_strided_slice %648 {offsets = [0, 0], sizes = [4, 32], strides = [1, 1]} : vector<4x96xf32> to vector<4x32xf32>
    %652 = vector.extract_strided_slice %648 {offsets = [0, 32], sizes = [4, 32], strides = [1, 1]} : vector<4x96xf32> to vector<4x32xf32>
    %653 = vector.extract_strided_slice %648 {offsets = [0, 64], sizes = [4, 32], strides = [1, 1]} : vector<4x96xf32> to vector<4x32xf32>
    %654 = arith.mulf %652, %623 : vector<4x32xf32>
    %655 = arith.mulf %651, %650 : vector<4x32xf32>
    %656 = arith.addf %654, %655 : vector<4x32xf32>
    %657 = math.tanh %656 : vector<4x32xf32>
    %658 = arith.mulf %653, %657 : vector<4x32xf32>
    %659 = vector.shape_cast %27 : vector<4x1xi1> to vector<4x1xi1>
    %660 = vector.broadcast %659 : vector<4x1xi1> to vector<4x32xi1>
    %661 = arith.select %660, %658, %620 : vector<4x32xi1>, vector<4x32xf32>
    %662 = vector.shape_cast %27 : vector<4x1xi1> to vector<4x1xi1>
    %663 = vector.broadcast %662 : vector<4x1xi1> to vector<4x32xi1>
    %664 = arith.select %663, %656, %623 : vector<4x32xi1>, vector<4x32xf32>
    %665 = vector.extract_strided_slice %661 {offsets = [0, 0], sizes = [2, 32], strides = [1, 1]} : vector<4x32xf32> to vector<2x32xf32>
    %c6_172 = arith.constant 6 : index
    %c0_173 = arith.constant 0 : index
    %c0_174 = arith.constant 0 : index
    %666 = vector.load %arg17[%c6_172, %c0_173, %c0_174] : memref<8x2x32xf32, #tpu.memory_space<vmem>>, vector<1x2x32xf32>
    %667 = vector.shape_cast %666 : vector<1x2x32xf32> to vector<2x32xf32>
    %668 = vector.shape_cast %665 : vector<2x32xf32> to vector<1x2x32xf32>
    tpu.vector_store %arg17[%c6_172, %c0_173, %c0_174], %668 {strides = array<i32>} : memref<8x2x32xf32, #tpu.memory_space<vmem>>, vector<1x2x32xf32>,
    %669 = vector.extract_strided_slice %661 {offsets = [2, 0], sizes = [2, 32], strides = [1, 1]} : vector<4x32xf32> to vector<2x32xf32>
    %c1_175 = arith.constant 1 : index
    %c0_176 = arith.constant 0 : index
    %c0_177 = arith.constant 0 : index
    %670 = vector.load %arg18[%c1_175, %c0_176, %c0_177] : memref<8x2x32xf32, #tpu.memory_space<vmem>>, vector<1x2x32xf32>
    %671 = vector.shape_cast %670 : vector<1x2x32xf32> to vector<2x32xf32>
    %672 = vector.shape_cast %669 : vector<2x32xf32> to vector<1x2x32xf32>
    tpu.vector_store %arg18[%c1_175, %c0_176, %c0_177], %672 {strides = array<i32>} : memref<8x2x32xf32, #tpu.memory_space<vmem>>, vector<1x2x32xf32>,
    %673 = arith.truncf %661 : vector<4x32xf32> to vector<4x32xbf16>
    %cst_178 = arith.constant dense<0.000000e+00> : vector<4x256xf32>
    %674 = tpu.matmul %673, %381, %cst_178 {dimension_numbers = #tpu.dot_dimension_numbers<[1], [0], [0], [1], [0, 0, 1, 1], [], []>} : vector<4x32xbf16>, vector<32x256xbf16>, vector<4x256xf32> -> vector<4x256xf32>
    %675 = vector.extract_strided_slice %380 {offsets = [7, 0, 0], sizes = [1, 2, 128], strides = [1, 1, 1]} : vector<8x2x256xf32> to vector<1x2x128xf32>
    %676 = vector.shape_cast %675 : vector<1x2x128xf32> to vector<2x128xf32>
    %677 = vector.extract_strided_slice %674 {offsets = [0, 0], sizes = [2, 128], strides = [1, 1]} : vector<4x256xf32> to vector<2x128xf32>
    %678 = arith.addf %676, %677 : vector<2x128xf32>
    %679 = vector.extract_strided_slice %380 {offsets = [0, 0, 128], sizes = [1, 2, 128], strides = [1, 1, 1]} : vector<8x2x256xf32> to vector<1x2x128xf32>
    %680 = vector.shape_cast %679 : vector<1x2x128xf32> to vector<2x128xf32>
    %681 = vector.extract_strided_slice %674 {offsets = [2, 128], sizes = [2, 128], strides = [1, 1]} : vector<4x256xf32> to vector<2x128xf32>
    %682 = arith.addf %680, %681 : vector<2x128xf32>
    %683 = tpu.concatenate %678, %682 in 0 : vector<2x128xf32>, vector<2x128xf32> -> vector<4x128xf32>
    %684 = vector.extract_strided_slice %683 {offsets = [0, 0], sizes = [4, 96], strides = [1, 1]} : vector<4x128xf32> to vector<4x96xf32>
    %685 = arith.negf %684 : vector<4x96xf32>
    %686 = math.exp %685 : vector<4x96xf32>
    %cst_179 = arith.constant 1.000000e+00 : f32
    %687 = vector.broadcast %cst_179 : f32 to vector<4x96xf32>
    %688 = arith.addf %687, %686 : vector<4x96xf32>
    %689 = arith.divf %687, %688 : vector<4x96xf32>
    %690 = vector.extract_strided_slice %683 {offsets = [0, 96], sizes = [4, 32], strides = [1, 1]} : vector<4x128xf32> to vector<4x32xf32>
    %691 = math.tanh %690 : vector<4x32xf32>
    %692 = vector.extract_strided_slice %689 {offsets = [0, 0], sizes = [4, 32], strides = [1, 1]} : vector<4x96xf32> to vector<4x32xf32>
    %693 = vector.extract_strided_slice %689 {offsets = [0, 32], sizes = [4, 32], strides = [1, 1]} : vector<4x96xf32> to vector<4x32xf32>
    %694 = vector.extract_strided_slice %689 {offsets = [0, 64], sizes = [4, 32], strides = [1, 1]} : vector<4x96xf32> to vector<4x32xf32>
    %695 = arith.mulf %693, %664 : vector<4x32xf32>
    %696 = arith.mulf %692, %691 : vector<4x32xf32>
    %697 = arith.addf %695, %696 : vector<4x32xf32>
    %698 = math.tanh %697 : vector<4x32xf32>
    %699 = arith.mulf %694, %698 : vector<4x32xf32>
    %700 = vector.shape_cast %31 : vector<4x1xi1> to vector<4x1xi1>
    %701 = vector.broadcast %700 : vector<4x1xi1> to vector<4x32xi1>
    %702 = arith.select %701, %699, %661 : vector<4x32xi1>, vector<4x32xf32>
    %703 = vector.extract_strided_slice %702 {offsets = [0, 0], sizes = [2, 32], strides = [1, 1]} : vector<4x32xf32> to vector<2x32xf32>
    %c7_180 = arith.constant 7 : index
    %c0_181 = arith.constant 0 : index
    %c0_182 = arith.constant 0 : index
    %704 = vector.load %arg17[%c7_180, %c0_181, %c0_182] : memref<8x2x32xf32, #tpu.memory_space<vmem>>, vector<1x2x32xf32>
    %705 = vector.shape_cast %704 : vector<1x2x32xf32> to vector<2x32xf32>
    %706 = vector.shape_cast %703 : vector<2x32xf32> to vector<1x2x32xf32>
    tpu.vector_store %arg17[%c7_180, %c0_181, %c0_182], %706 {strides = array<i32>} : memref<8x2x32xf32, #tpu.memory_space<vmem>>, vector<1x2x32xf32>,
    %707 = vector.extract_strided_slice %702 {offsets = [2, 0], sizes = [2, 32], strides = [1, 1]} : vector<4x32xf32> to vector<2x32xf32>
    %c0_183 = arith.constant 0 : index
    %c0_184 = arith.constant 0 : index
    %c0_185 = arith.constant 0 : index
    %708 = vector.load %arg18[%c0_183, %c0_184, %c0_185] : memref<8x2x32xf32, #tpu.memory_space<vmem>>, vector<1x2x32xf32>
    %709 = vector.shape_cast %708 : vector<1x2x32xf32> to vector<2x32xf32>
    %710 = vector.shape_cast %707 : vector<2x32xf32> to vector<1x2x32xf32>
    tpu.vector_store %arg18[%c0_183, %c0_184, %c0_185], %710 {strides = array<i32>} : memref<8x2x32xf32, #tpu.memory_space<vmem>>, vector<1x2x32xf32>,
    %c0_186 = arith.constant 0 : index
    %c0_187 = arith.constant 0 : index
    %c0_188 = arith.constant 0 : index
    %711 = vector.load %arg17[%c0_186, %c0_187, %c0_188] : memref<8x2x32xf32, #tpu.memory_space<vmem>>, vector<8x2x32xf32>
    %c0_189 = arith.constant 0 : index
    %c0_190 = arith.constant 0 : index
    %c0_191 = arith.constant 0 : index
    %712 = vector.load %arg18[%c0_189, %c0_190, %c0_191] : memref<8x2x32xf32, #tpu.memory_space<vmem>>, vector<8x2x32xf32>
    %713 = tpu.concatenate %711, %712 in 2 : vector<8x2x32xf32>, vector<8x2x32xf32> -> vector<8x2x64xf32>
    %c0_192 = arith.constant 0 : index
    %c0_193 = arith.constant 0 : index
    %c0_194 = arith.constant 0 : index
    %714 = vector.load %arg2[%c0_192, %c0_193, %c0_194] : memref<8x4x1xf32, #tpu.memory_space<vmem>>, vector<8x4x1xf32>
    %715 = vector.extract_strided_slice %714 {offsets = [0, 0, 0], sizes = [8, 2, 1], strides = [1, 1, 1]} : vector<8x4x1xf32> to vector<8x2x1xf32>
    %cst_195 = arith.constant 0.000000e+00 : f32
    %716 = vector.broadcast %cst_195 : f32 to vector<8x2x1xf32>
    %717 = arith.cmpf ogt, %715, %716 : vector<8x2x1xf32>
    %cst_196 = arith.constant 0xCB18967F : f32
    %718 = vector.shape_cast %717 : vector<8x2x1xi1> to vector<8x2x1xi1>
    %719 = vector.broadcast %718 : vector<8x2x1xi1> to vector<8x2x64xi1>
    %720 = vector.broadcast %cst_196 : f32 to vector<8x2x64xf32>
    %721 = arith.select %719, %713, %720 : vector<8x2x64xi1>, vector<8x2x64xf32>
    %722 = vector.shape_cast %721 : vector<8x2x64xf32> to vector<16x64xf32>
    %723 = arith.truncf %722 : vector<16x64xf32> to vector<16x64xbf16>
    %c0_197 = arith.constant 0 : index
    %c0_198 = arith.constant 0 : index
    %724 = vector.load %arg12[%c0_197, %c0_198] : memref<64x64xbf16, #tpu.memory_space<vmem>>, vector<64x64xbf16>
    %cst_199 = arith.constant dense<0.000000e+00> : vector<16x64xf32>
    %725 = tpu.matmul %723, %724, %cst_199 {dimension_numbers = #tpu.dot_dimension_numbers<[1], [0], [0], [1], [0, 0, 1, 1], [], []>} : vector<16x64xbf16>, vector<64x64xbf16>, vector<16x64xf32> -> vector<16x64xf32>
    %726 = math.tanh %725 : vector<16x64xf32>
    %c0_200 = arith.constant 0 : index
    %c0_201 = arith.constant 0 : index
    %727 = vector.load %arg13[%c0_200, %c0_201] : memref<1x64xf32, #tpu.memory_space<vmem>>, vector<1x64xf32>
    %728 = vector.broadcast %727 : vector<1x64xf32> to vector<16x64xf32>
    %729 = arith.mulf %726, %728 : vector<16x64xf32>
    %cst_202 = arith.constant dense<0.000000e+00> : vector<16xf32>
    %730 = vector.multi_reduction <add>, %729, %cst_202 [1] : vector<16x64xf32> to vector<16xf32>
    %731 = vector.shape_cast %730 : vector<16xf32> to vector<16x1xf32>
    %732 = vector.shape_cast %731 : vector<16x1xf32> to vector<8x2x1xf32>
    %733 = vector.extract_strided_slice %732 {offsets = [0, 0, 0], sizes = [1, 2, 1], strides = [1, 1, 1]} : vector<8x2x1xf32> to vector<1x2x1xf32>
    %734 = vector.shape_cast %733 : vector<1x2x1xf32> to vector<2x1xf32>
    %735 = vector.extract_strided_slice %732 {offsets = [1, 0, 0], sizes = [1, 2, 1], strides = [1, 1, 1]} : vector<8x2x1xf32> to vector<1x2x1xf32>
    %736 = vector.shape_cast %735 : vector<1x2x1xf32> to vector<2x1xf32>
    %737 = vector.extract_strided_slice %732 {offsets = [2, 0, 0], sizes = [1, 2, 1], strides = [1, 1, 1]} : vector<8x2x1xf32> to vector<1x2x1xf32>
    %738 = vector.shape_cast %737 : vector<1x2x1xf32> to vector<2x1xf32>
    %739 = vector.extract_strided_slice %732 {offsets = [3, 0, 0], sizes = [1, 2, 1], strides = [1, 1, 1]} : vector<8x2x1xf32> to vector<1x2x1xf32>
    %740 = vector.shape_cast %739 : vector<1x2x1xf32> to vector<2x1xf32>
    %741 = vector.extract_strided_slice %732 {offsets = [4, 0, 0], sizes = [1, 2, 1], strides = [1, 1, 1]} : vector<8x2x1xf32> to vector<1x2x1xf32>
    %742 = vector.shape_cast %741 : vector<1x2x1xf32> to vector<2x1xf32>
    %743 = vector.extract_strided_slice %732 {offsets = [5, 0, 0], sizes = [1, 2, 1], strides = [1, 1, 1]} : vector<8x2x1xf32> to vector<1x2x1xf32>
    %744 = vector.shape_cast %743 : vector<1x2x1xf32> to vector<2x1xf32>
    %745 = vector.extract_strided_slice %732 {offsets = [6, 0, 0], sizes = [1, 2, 1], strides = [1, 1, 1]} : vector<8x2x1xf32> to vector<1x2x1xf32>
    %746 = vector.shape_cast %745 : vector<1x2x1xf32> to vector<2x1xf32>
    %747 = vector.extract_strided_slice %732 {offsets = [7, 0, 0], sizes = [1, 2, 1], strides = [1, 1, 1]} : vector<8x2x1xf32> to vector<1x2x1xf32>
    %748 = vector.shape_cast %747 : vector<1x2x1xf32> to vector<2x1xf32>
    %749 = tpu.concatenate %734, %736, %738, %740, %742, %744, %746, %748 in 1 : vector<2x1xf32>, vector<2x1xf32>, vector<2x1xf32>, vector<2x1xf32>, vector<2x1xf32>, vector<2x1xf32>, vector<2x1xf32>, vector<2x1xf32> -> vector<2x8xf32>
    %c0_203 = arith.constant 0 : index
    %c0_204 = arith.constant 0 : index
    %750 = vector.load %arg3[%c0_203, %c0_204] : memref<2x8xf32, #tpu.memory_space<vmem>>, vector<2x8xf32>
    %cst_205 = arith.constant 0.000000e+00 : f32
    %751 = vector.broadcast %cst_205 : f32 to vector<2x8xf32>
    %752 = arith.cmpf ogt, %750, %751 : vector<2x8xf32>
    %cst_206 = arith.constant -9.999900e+04 : f32
    %753 = vector.broadcast %cst_206 : f32 to vector<2x8xf32>
    %754 = arith.select %752, %749, %753 : vector<2x8xi1>, vector<2x8xf32>
    %cst_207 = arith.constant dense<0xFF800000> : vector<2xf32>
    %755 = vector.multi_reduction <maximumf>, %754, %cst_207 [1] : vector<2x8xf32> to vector<2xf32>
    %756 = vector.shape_cast %755 : vector<2xf32> to vector<2x1xf32>
    %757 = vector.broadcast %756 : vector<2x1xf32> to vector<2x8xf32>
    %758 = arith.subf %754, %757 : vector<2x8xf32>
    %759 = math.exp %758 : vector<2x8xf32>
    %cst_208 = arith.constant dense<0.000000e+00> : vector<2xf32>
    %760 = vector.multi_reduction <add>, %759, %cst_208 [1] : vector<2x8xf32> to vector<2xf32>
    %761 = vector.shape_cast %760 : vector<2xf32> to vector<2x1xf32>
    %762 = math.log %761 : vector<2x1xf32>
    %763 = vector.broadcast %756 : vector<2x1xf32> to vector<2x8xf32>
    %764 = arith.subf %754, %763 : vector<2x8xf32>
    %765 = vector.broadcast %762 : vector<2x1xf32> to vector<2x8xf32>
    %766 = arith.subf %764, %765 : vector<2x8xf32>
    %c0_209 = arith.constant 0 : index
    %c0_210 = arith.constant 0 : index
    %767 = vector.load %arg14[%c0_209, %c0_210] : memref<2x8xf32, #tpu.memory_space<vmem>>, vector<2x8xf32>
    tpu.vector_store %arg14[%c0_209, %c0_210], %766 {strides = array<i32>} : memref<2x8xf32, #tpu.memory_space<vmem>>, vector<2x8xf32>,
    return
  }
  func.func @transform_0(%arg0: i32) -> (i32, i32, i32) {
    %c0_i32 = arith.constant 0 : i32
    %c0_i32_0 = arith.constant 0 : i32
    %c0_i32_1 = arith.constant 0 : i32
    %c0_i32_2 = arith.constant 0 : i32
    return %c0_i32, %c0_i32_0, %c0_i32_1 : i32, i32, i32
  }
  func.func @transform_1(%arg0: i32) -> (i32, i32, i32) {
    %c0_i32 = arith.constant 0 : i32
    %c0_i32_0 = arith.constant 0 : i32
    %c0_i32_1 = arith.constant 0 : i32
    %c0_i32_2 = arith.constant 0 : i32
    return %c0_i32, %c0_i32_0, %c0_i32_1 : i32, i32, i32
  }
  func.func @transform_2(%arg0: i32) -> (i32, i32) {
    %c0_i32 = arith.constant 0 : i32
    %c0_i32_0 = arith.constant 0 : i32
    %c0_i32_1 = arith.constant 0 : i32
    return %c0_i32, %c0_i32_0 : i32, i32
  }
  func.func @transform_3(%arg0: i32) -> (i32, i32, i32) {
    %c0_i32 = arith.constant 0 : i32
    %c0_i32_0 = arith.constant 0 : i32
    %c0_i32_1 = arith.constant 0 : i32
    %c0_i32_2 = arith.constant 0 : i32
    return %c0_i32, %c0_i32_0, %c0_i32_1 : i32, i32, i32
  }
  func.func @transform_4(%arg0: i32) -> (i32, i32, i32) {
    %c0_i32 = arith.constant 0 : i32
    %c0_i32_0 = arith.constant 0 : i32
    %c0_i32_1 = arith.constant 0 : i32
    %c0_i32_2 = arith.constant 0 : i32
    return %c0_i32, %c0_i32_0, %c0_i32_1 : i32, i32, i32
  }
  func.func @transform_5(%arg0: i32) -> (i32, i32) {
    %c0_i32 = arith.constant 0 : i32
    %c0_i32_0 = arith.constant 0 : i32
    %c0_i32_1 = arith.constant 0 : i32
    return %c0_i32, %c0_i32_0 : i32, i32
  }
  func.func @transform_6(%arg0: i32) -> (i32, i32) {
    %c0_i32 = arith.constant 0 : i32
    %c0_i32_0 = arith.constant 0 : i32
    %c0_i32_1 = arith.constant 0 : i32
    return %c0_i32, %c0_i32_0 : i32, i32
  }
  func.func @transform_7(%arg0: i32) -> (i32, i32) {
    %c0_i32 = arith.constant 0 : i32
    %c0_i32_0 = arith.constant 0 : i32
    %c0_i32_1 = arith.constant 0 : i32
    return %c0_i32, %c0_i32_0 : i32, i32
  }
  func.func @transform_8(%arg0: i32) -> (i32, i32) {
    %c0_i32 = arith.constant 0 : i32
    %c0_i32_0 = arith.constant 0 : i32
    %c0_i32_1 = arith.constant 0 : i32
    return %c0_i32, %c0_i32_0 : i32, i32
  }
  func.func @transform_9(%arg0: i32) -> (i32, i32) {
    %c0_i32 = arith.constant 0 : i32
    %c0_i32_0 = arith.constant 0 : i32
    %c0_i32_1 = arith.constant 0 : i32
    return %c0_i32, %c0_i32_0 : i32, i32
  }
  func.func @transform_10(%arg0: i32) -> (i32, i32) {
    %c0_i32 = arith.constant 0 : i32
    %c0_i32_0 = arith.constant 0 : i32
    %c0_i32_1 = arith.constant 0 : i32
    return %c0_i32, %c0_i32_0 : i32, i32
  }
  func.func @transform_11(%arg0: i32) -> (i32, i32) {
    %c0_i32 = arith.constant 0 : i32
    %c0_i32_0 = arith.constant 0 : i32
    %c0_i32_1 = arith.constant 0 : i32
    return %c0_i32, %c0_i32_0 : i32, i32
  }
  func.func @transform_12(%arg0: i32) -> (i32, i32) {
    %c0_i32 = arith.constant 0 : i32
    %c0_i32_0 = arith.constant 0 : i32
    %c0_i32_1 = arith.constant 0 : i32
    return %c0_i32, %c0_i32_0 : i32, i32
  }
  func.func @transform_13(%arg0: i32) -> (i32, i32) {
    %c0_i32 = arith.constant 0 : i32
    %c0_i32_0 = arith.constant 0 : i32
    %c0_i32_1 = arith.constant 0 : i32
    return %c0_i32, %c0_i32_0 : i32, i32
  }
}

</mosaic_0001>

<bundles_post_ra>
// kernel: reverse
= control target key start
LH: loop header
LB: loop body
LE: loop exit
PB: predicated region body
PF: predicated region fallthrough
CT: control target
= control target key end

     0   :  { %v2_v0 = vlaneseq  ;;  %s112_s0 = inlined_call_operand.vmem [shape: f32[8,2], index: 0, kind: input, shape index: {}]   ;;  %s113_s1 = inlined_call_operand.vmem [shape: f32[8,2], index: 1, kind: output, shape index: {}]  }
   0x2   :  { %v3_v1 = vsub.s32 7, %v2_v0 }
   0x4   :  { %4 = vset.pattern.permute.xlu0 %v3_v1 }
   0x5   :  { %v21_v2 = vld [vmem:[%s112_s0] sm:$0x3] }
   0x6   :  { %22 = vst [vmem:[#allocation1] sm:$0x3] %v21_v2 }
   0xd   :  { %v41_v3 = vld [vmem:[#allocation1] sm:$0x3] }
   0xe   :  { %42 = vst [vmem:[#allocation0] sm:$0x3] %v41_v3 }
  0x15   :  { %v43_v4 = vld [vmem:[#allocation0] sm:$0xff] }
  0x16   :  { %44 = vperm.xlu0 %4, %v43_v4  }
  0x91   :  { %v45_v5 = vpop.permute.xlu0 %44 }
  0x92   :  { %46 = vst [vmem:[#allocation2] sm:$0xff] %v45_v5 }
  0x99   :  { %v51_v6 = vld [vmem:[#allocation2] sm:$0x3] }
  0x9a   :  { %54 = vst [vmem:[#allocation3] sm:$0x3] %v51_v6 }
  0xa1   :  { %v71_v7 = vld [vmem:[#allocation3] sm:$0x3] }
  0xa2   :  { %72 = vst [vmem:[%s113_s1] sm:$0x3] %v71_v7 }

// kernel: single_pointer_net_forward.1
= control target key start
LH: loop header
LB: loop body
LE: loop exit
PB: predicated region body
PF: predicated region fallthrough
CT: control target
= control target key end

     0   :  { %v2979_v2 = vmov 0   ;;  %v81_v5 = vlaneseq  ;;  %v2980_v13 = vmov 1966171168   ;;  %s3893_s0 = inlined_call_operand.vmem [shape: bf16[8,2,16], index: 0, kind: input, shape index: {}]   ;;  %s3894_s1 = inlined_call_operand.vmem [shape: f32[8,4,1], index: 1, kind: input, shape index: {}]   ;;  %s3895_s2 = inlined_call_operand.vmem [shape: f32[2,8], index: 2, kind: input, shape index: {}]   ;;  %s3896_s3 = inlined_call_operand.vmem [shape: f32[2,4,32], index: 3, kind: input, shape index: {}]   ;;  %s3897_s4 = inlined_call_operand.vmem [shape: f32[2,4,32], index: 4, kind: input, shape index: {}]   ;;  %s3898_s5 = inlined_call_operand.vmem [shape: bf16[16,256], index: 5, kind: input, shape index: {}]   ;;  %s3899_s6 = inlined_call_operand.vmem [shape: bf16[32,256], index: 6, kind: input, shape index: {}]   ;;  %s3900_s7 = inlined_call_operand.vmem [shape: f32[1,256], index: 7, kind: input, shape index: {}]   ;;  %s3901_s8 = inlined_call_operand.vmem [shape: bf16[64,256], index: 8, kind: input, shape index: {}]   ;;  %s3902_s9 = inlined_call_operand.vmem [shape: bf16[32,256], index: 9, kind: input, shape index: {}]   ;;  %s3903_s10 = inlined_call_operand.vmem [shape: f32[1,256], index: 10, kind: input, shape index: {}]   ;;  %s3904_s11 = inlined_call_operand.vmem [shape: bf16[64,64], index: 11, kind: input, shape index: {}]   ;;  %s3905_s12 = inlined_call_operand.vmem [shape: f32[1,64], index: 12, kind: input, shape index: {}]   ;;  %s3906_s13 = inlined_call_operand.hbm [shape: f32[2,8], index: 13, kind: output, shape index: {}]  }
   0x1   :  { %v2790_v0 = vld [vmem:[%s3898_s5 + $0x4] ss:$8 sps:$4 sm:$0xff]   ;;  %v2792_v1 = vld [vmem:[%s3898_s5] ss:$8 sps:$4 sm:$0xff]   ;;  %194 = vmatprep.mubr.bf16.mxu0 %v2979_v2  ;;  %2788 = vset.pattern.permute.xlu1 %v2979_v2  ;;  %v104_v14 = vunpack.c.l.s4 %v2980_v13  ;;  %v3100_v15 = vld [vmem:[%s3899_s6 + $0x14] ss:$8 sps:$4 sm:$0xff]  }
   0x2   :  { %v69_v3 = vld [vmem:[%s3893_s0] sm:$0x1]  ;;  %v70_v4 = vld [vmem:[%s3893_s0 + $0x1] sm:$0x1]  ;;  %176 = vmatprep.subr.bf16.mxu0 %v2790_v0  ;;  %v71_v6 = vld [vmem:[%s3893_s0 + $0x2] sm:$0x1]  ;;  %550 = vmatprep.mubr.bf16.mxu1 %v2979_v2 }
   0x3   :  { %v72_v7 = vld [vmem:[%s3893_s0 + $0x3] sm:$0x1]  ;;  %v73_v8 = vld [vmem:[%s3893_s0 + $0x4] sm:$0x1]  ;;  %177 = vmatpush1.bf16.msra.mxu0 %v2792_v1  ;;  %v74_v9 = vld [vmem:[%s3893_s0 + $0x5] sm:$0x1]  ;;  %2789 = vset.pattern.permute.xlu0 %v2979_v2  ;;  %v99_v16 = vcombine.low %v69_v3, %v70_v4  ;;  %v105_v21 = vunpack.c.0.s8 %v104_v14 }
   0x4   :  { %v75_v10 = vld [vmem:[%s3893_s0 + $0x6] sm:$0x1]  ;;  %v76_v11 = vld [vmem:[%s3893_s0 + $0x7] sm:$0x1]  ;;  %v3095_v12 = vshrl.u32 %v81_v5, 7  ;;  %v100_v18 = vcombine.low %v71_v6, %v72_v7  ;;  %v101_v19 = vcombine.low %v73_v8, %v74_v9  ;;  %296 = vmatprep.subr.bf16.mxu0 %v3100_v15  ;;  %530 = vmatprep.subr.bf16.mxu1 %v3100_v15 }
   0x5   :  { %v3105_v17 = vld [vmem:[%s3899_s6 + $0x10] ss:$8 sps:$4 sm:$0xff]   ;;  %v102_v20 = vcombine.low %v75_v10, %v76_v11  ;;  %v3111_v22 = vld [vmem:[%s3899_s6 + $0x4] ss:$8 sps:$4 sm:$0xff]   ;;  %v3117_v23 = vld [vmem:[%s3899_s6] ss:$8 sps:$4 sm:$0xff]  }
   0x6   :  { %531 = vmatpush1.bf16.msra.mxu1 %v3105_v17  ;;  %v108_v24 = vsub.s32 %v105_v21, %v3095_v12 }
   0x7   :  { %532 = vmatprep.subr.bf16.mxu1 %v3111_v22 }
   0x8   :  { %v109_v25 = vrot.slane %v99_v16, %v108_v24  ;;  %v116_v26 = vrot.slane %v100_v18, %v108_v24  ;;  %v123_v27 = vrot.slane %v101_v19, %v108_v24  ;;  %v130_v28 = vrot.slane %v102_v20, %v108_v24 }
   0xa   :  { %533 = vmatpush1.bf16.msra.mxu1 %v3117_v23  ;;  %v131_v29 = vcombine.low %v109_v25, %v116_v26  ;;  %v132_v30 = vcombine.low %v123_v27, %v130_v28 }
   0xb   :  { %754 = vmatprep.subr.bf16.mxu1 %v3100_v15 }
   0xc   :  { %18 = vsyncpa [#allocation7], 0  ;;  %v139_v31 = vrot.slane %v131_v29, %v108_v24  ;;  %v146_v32 = vrot.slane %v132_v30, %v108_v24  ;;  %vm158_vm0 = vcmask 130048   ;;  %v3129_v34 = vld [vmem:[%s3896_s3] sm:$0xf]  ;;  %vm280_vm1 = vcmask 261120  }
   0xd   :  { %v259_v35 = vpack.c.bf16 %v3129_v34, %v3129_v34  ;;  %v83_v36 = vsub.s32 0, %v3095_v12  ;;  %v87_v37 = vsub.s32 1, %v3095_v12  ;;  %v79_v38 = vld [vmem:[%s3900_s7] sm:$0x3]  ;;  %v2981_v42 = vmov 1983009808  }
   0xe   :  { %v147_v33 = vcombine.low %v139_v31, %v146_v32  ;;  %v212_v43 = vunpack.c.l.s4 %v2981_v42  ;;  %vm349_vm2 = vcmask 1041408   ;;  %s2982_s7 = smov 32   ;;  %v258_v10 = vld [vmem:[%s3897_s4] sm:$0xf]  ;;  %s2983_s23 = smov 64  }
   0xf   :  { %v84_v39 = vrot.slane %v79_v38, %v83_v36  ;;  %v88_v40 = vrot.slane %v79_v38, %v87_v37  ;;  %v46_v16 = vld [vmem:[%s3894_s1] sm:$0xf] }
  0x10   :  { %2701 = vmatmul.mubr.msk.bf16.vlgmr.msra.gmra.mxu0 %vm158_vm0, %v147_v33  ;;  %v213_v48 = vunpack.c.0.s8 %v212_v43  ;;  %vm47_vm3 = vcmp.gt.f32.partialorder %v46_v16, 0.0 }
  0x11   :  { %297 = vmatpush1.bf16.msra.mxu0 %v3105_v17  ;;  %316 = vmatprep.mubr.bf16.mxu0 %v2979_v2  ;;  %v379_v21 = vsel %vm47_vm3, 1, %v2979_v2 }
  0x12   :  { %298 = vmatprep.subr.bf16.mxu0 %v3111_v22  ;;  %v3162_v54 = vsub.s32 %v213_v48, %v3095_v12 }
  0x15   :  { %299 = vmatpush1.bf16.msra.mxu0 %v3117_v23 }
  0x16   :  { %418 = vmatprep.subr.bf16.mxu0 %v3100_v15 }
  0x18   :  { %2706 = vmatmul.mubr.msk.bf16.vlgmr.msra.gmra.mxu0 %vm280_vm1, %v259_v35 }
  0x19   :  { %419 = vmatpush1.bf16.msra.mxu0 %v3105_v17  ;;  %438 = vmatprep.mubr.bf16.mxu0 %v2979_v2 }
  0x1a   :  { %420 = vmatprep.subr.bf16.mxu0 %v3111_v22 }
  0x1d   :  { %421 = vmatpush1.bf16.msra.mxu0 %v3117_v23 }
  0x1e   :  { %642 = vmatprep.subr.bf16.mxu0 %v3100_v15 }
  0xd0   :  { %v196_v41 = vpop.f32.mrf.mxu0 }
  0xd1   :  { %v3151_v45 = vadd.f32 %v196_v41, %v84_v39 }
  0xd2   :  { %v198_v44 = vpop.f32.mrf.mxu0 }
  0xd3   :  { %v3153_v46 = vadd.f32 %v198_v44, %v88_v40 }
  0xd4   :  { %v200_v47 = vpop.f32.mrf.mxu0 }
  0xd5   :  { %v210_v49 = vcombine.high %v3151_v45, %v3153_v46  ;;  %v3157_v51 = vadd.f32 %v200_v47, %v84_v39  ;;  %v209_v61 = vcombine.low %v3151_v45, %v3153_v46 }
  0xd6   :  { %v202_v50 = vpop.f32.mrf.mxu0 }
  0xd7   :  { %v3159_v52 = vadd.f32 %v202_v50, %v88_v40  ;;  %v3180_v3 = vrot.slane %v209_v61, %v3162_v54 }
  0xd8   :  { %v318_v53 = vpop.f32.mrf.mxu0 }
  0xd9   :  { %v227_v55 = vcombine.low %v3157_v51, %v3159_v52  ;;  %v228_v56 = vcombine.high %v3157_v51, %v3159_v52  ;;  %v325_v6 = vadd.f32 %v318_v53, %v3180_v3  ;;  %v3218_v48 = vcombine.high %v3180_v3, %v3180_v3 }
  0xda   :  { %v320_v57 = vpop.f32.mrf.mxu0  ;;  %v3265_v51 = vrot.slane %v210_v49, %v3162_v54 }
  0xdb   :  { %v3169_v58 = vrot.slane %v228_v56, %v3162_v54  ;;  %v335_v59 = vrot.slane %v320_v57, %v3162_v54 }
  0xdc   :  { %v322_v60 = vpop.f32.mrf.mxu0 }
  0xdd   :  { %v3176_v62 = vcombine.high %v3169_v58, %v3169_v58  ;;  %v336_v1 = vcombine.high %v335_v59, %v335_v59  ;;  %v448_v42 = vrot.slane %v3169_v58, 2  ;;  %v2692_v59 = vld [vmem:[%s3894_s1 + $0x4] sm:$0xf] }
  0xde   :  { %v323_v63 = vpop.f32.mrf.mxu0  ;;  %vm50_vm5 = vcmp.gt.f32.partialorder %v2692_v59, 0.0 }
  0xdf   :  { %v326_v0 = vrot.slane %v3176_v62, 2  ;;  %v496_v61 = vsel %vm50_vm5, 1, %v2979_v2  ;;  %vm394_vm5 = vcmask 254976  }
  0xe1   :  { %v338_v4 = vadd.f32 %v336_v1, %v326_v0 }
  0xe3   :  { %v340_v5 = vcombine.low %v338_v4, %v338_v4 }
  0xe5   :  { %v347_v7 = vrot.slane %v340_v5, %v3162_v54 }
  0xe7   :  { %v350_v8 = vsel %vm349_vm2, %v325_v6, %v347_v7 }
  0xe8   :  { %2821 = vtanh.f32 %v350_v8  ;;  %v2707_v11 = vmul.f32 -1.442695, %v350_v8 }
  0xea   :  { %2823 = vpow2.f32 %v2707_v11 }
  0xf5   :  { %v2822_v9 = vpop.eup %2821 }
  0xf6   :  { %364 = vrot.lane.b32.xlu0 %v2822_v9, %s2982_s7 }
  0xf7   :  { %v2824_v13 = vpop.eup %2823 }
  0xf8   :  { %v354_v14 = vadd.f32 1.0, %v2824_v13 }
  0xfa   :  { %359 = vrot.lane.b32.xlu0 %v258_v10, %s2982_s7  ;;  %2825 = vrcp.f32 %v354_v14 }
 0x107   :  { %v2826_v18 = vpop.eup %2825 }
 0x168   :  { %v365_v19 = vpop.permute.xlu0 %364 }
 0x169   :  { %v367_v20 = vmul.f32 %v2826_v18, %v365_v19 }
 0x16b   :  { %369 = vrot.lane.b32.xlu1 %v367_v20, %s2982_s7 }
 0x16c   :  { %v360_v24 = vpop.permute.xlu0 %359 }
 0x16d   :  { %v362_v25 = vmul.f32 %v2826_v18, %v360_v24 }
 0x16f   :  { %381 = vperm.xlu1 %2788, %v379_v21   ;;  %v3253_v21 = vrot.slane %v227_v55, %v3162_v54 }
 0x173   :  { %385 = vrot.lane.b32.xlu1 %v3129_v34, %s2983_s23 }
 0x1dd   :  { %v370_v26 = vpop.permute.xlu1 %369 }
 0x1de   :  { %v372_v27 = vadd.f32 %v370_v26, %v362_v25  ;;  %v3257_v25 = vcombine.high %v3253_v21, %v3253_v21 }
 0x1e0   :  { %2827 = vtanh.f32 %v372_v27 }
 0x1ea   :  { %v3198_v29 = vpop.permute.xlu1 %381 }
 0x1eb   :  { %vm383_vm4 = vcmp.eq.s32.totalorder %v3198_v29, 1 }
 0x1ec   :  { %v389_v7 = vsel %vm383_vm4, %v372_v27, %v360_v24 }
 0x1ed   :  { %v2828_v28 = vpop.eup %2827 }
 0x1ee   :  { %375 = vrot.lane.b32.xlu0 %v2828_v28, %s2982_s7  ;;  %v386_v31 = vpop.permute.xlu1 %385 }
 0x260   :  { %v376_v30 = vpop.permute.xlu0 %375 }
 0x261   :  { %v378_v32 = vmul.f32 %v2826_v18, %v376_v30  ;;  %v560_v30 = vrot.slane %v3257_v25, 2 }
 0x263   :  { %v3203_v33 = vsel %vm383_vm4, %v378_v32, %v386_v31 }
 0x264   :  { %v399_v34 = vpack.c.bf16 %v3203_v33, %v3203_v33 }
 0x266   :  { %401 = vrot.lane.b32.xlu0 %v399_v34, %s2983_s23 }
 0x2d8   :  { %v402_v35 = vpop.permute.xlu0 %401 }
 0x2d9   :  { %2708 = vmatmul.mubr.msk.bf16.vlgmr.msra.gmra.mxu0 %vm280_vm1, %v402_v35 }
 0x2da   :  { %643 = vmatpush1.bf16.msra.mxu0 %v3105_v17  ;;  %662 = vmatprep.mubr.bf16.mxu0 %v2979_v2 }
 0x2db   :  { %644 = vmatprep.subr.bf16.mxu0 %v3111_v22 }
 0x2de   :  { %645 = vmatpush1.bf16.msra.mxu0 %v3117_v23 }
 0x2df   :  { %866 = vmatprep.subr.bf16.mxu0 %v3100_v15 }
 0x399   :  { %v440_v38 = vpop.f32.mrf.mxu0 }
 0x39a   :  { %v447_v53 = vadd.f32 %v440_v38, %v3218_v48 }
 0x39b   :  { %v442_v39 = vpop.f32.mrf.mxu0 }
 0x39c   :  { %v457_v40 = vrot.slane %v442_v39, %v3162_v54  ;;  %v2693_v39 = vld [vmem:[%s3894_s1 + $0x8] sm:$0xf] }
 0x39d   :  { %v444_v41 = vpop.f32.mrf.mxu0  ;;  %vm53_vm7 = vcmp.gt.f32.partialorder %v2693_v39, 0.0 }
 0x39e   :  { %v458_v43 = vcombine.high %v457_v40, %v457_v40  ;;  %v608_v45 = vsel %vm53_vm7, 1, %v2979_v2  ;;  %vm397_vm7 = vcmask 257026  }
 0x39f   :  { %v445_v44 = vpop.f32.mrf.mxu0 }
 0x3a0   :  { %v460_v47 = vadd.f32 %v458_v43, %v448_v42 }
 0x3a2   :  { %v462_v50 = vcombine.low %v460_v47, %v460_v47 }
 0x3a4   :  { %v469_v56 = vrot.slane %v462_v50, %v3162_v54 }
 0x3a6   :  { %v471_v57 = vsel %vm349_vm2, %v447_v53, %v469_v56 }
 0x3a7   :  { %2829 = vtanh.f32 %v471_v57  ;;  %v2709_v63 = vmul.f32 -1.442695, %v471_v57 }
 0x3a9   :  { %2831 = vpow2.f32 %v2709_v63 }
 0x3b4   :  { %v2830_v60 = vpop.eup %2829 }
 0x3b5   :  { %481 = vrot.lane.b32.xlu1 %v2830_v60, %s2982_s7 }
 0x3b6   :  { %v2832_v0 = vpop.eup %2831 }
 0x3b7   :  { %v475_v1 = vadd.f32 1.0, %v2832_v0 }
 0x3b9   :  { %498 = vperm.xlu1 %2788, %v496_v61   ;;  %2833 = vrcp.f32 %v475_v1 }
 0x3c6   :  { %v2834_v4 = vpop.eup %2833 }
 0x3c7   :  { %v479_v8 = vmul.f32 %v2834_v4, %v389_v7 }
 0x427   :  { %v482_v5 = vpop.permute.xlu1 %481 }
 0x428   :  { %v484_v6 = vmul.f32 %v2834_v4, %v482_v5 }
 0x42a   :  { %486 = vrot.lane.b32.xlu0 %v484_v6, %s2982_s7 }
 0x434   :  { %v3232_v13 = vpop.permute.xlu1 %498 }
 0x435   :  { %vm500_vm6 = vcmp.eq.s32.totalorder %v3232_v13, 1 }
 0x49c   :  { %v487_v9 = vpop.permute.xlu0 %486 }
 0x49d   :  { %v489_v10 = vadd.f32 %v487_v9, %v479_v8  ;;  %v672_v8 = vrot.slane %v3253_v21, 2 }
 0x49f   :  { %2835 = vtanh.f32 %v489_v10  ;;  %v502_v47 = vsel %vm500_vm6, %v489_v10, %v389_v7 }
 0x4ac   :  { %v2836_v11 = vpop.eup %2835 }
 0x4ad   :  { %492 = vrot.lane.b32.xlu0 %v2836_v11, %s2982_s7 }
 0x51f   :  { %v493_v14 = vpop.permute.xlu0 %492 }
 0x520   :  { %v495_v16 = vmul.f32 %v2834_v4, %v493_v14  ;;  %v226_v14 = vcombine.high %v3265_v51, %v3265_v51 }
 0x522   :  { %v3238_v18 = vsel %vm500_vm6, %v495_v16, %v3203_v33 }
 0x523   :  { %v511_v19 = vpack.c.bf16 %v3238_v18, %v3238_v18 }
 0x525   :  { %513 = vrot.lane.b32.xlu1 %v511_v19, %s2983_s23 }
 0x597   :  { %v514_v20 = vpop.permute.xlu1 %513 }
 0x598   :  { %2710 = vmatmul.mubr.msk.bf16.vlgmr.msra.gmra.mxu1 %vm280_vm1, %v514_v20 }
 0x599   :  { %755 = vmatpush1.bf16.msra.mxu1 %v3105_v17  ;;  %774 = vmatprep.mubr.bf16.mxu1 %v2979_v2 }
 0x59a   :  { %756 = vmatprep.subr.bf16.mxu1 %v3111_v22 }
 0x59d   :  { %757 = vmatpush1.bf16.msra.mxu1 %v3117_v23 }
 0x59e   :  { %978 = vmatprep.subr.bf16.mxu1 %v3100_v15 }
 0x658   :  { %v552_v24 = vpop.f32.mrf.mxu1 }
 0x659   :  { %v559_v55 = vadd.f32 %v552_v24, %v3265_v51 }
 0x65a   :  { %v554_v26 = vpop.f32.mrf.mxu1 }
 0x65b   :  { %v569_v27 = vrot.slane %v554_v26, %v3162_v54 }
 0x65c   :  { %v556_v28 = vpop.f32.mrf.mxu1 }
 0x65d   :  { %v570_v31 = vcombine.high %v569_v27, %v569_v27 }
 0x65e   :  { %v557_v32 = vpop.f32.mrf.mxu1 }
 0x65f   :  { %v572_v34 = vadd.f32 %v570_v31, %v560_v30 }
 0x661   :  { %v574_v52 = vcombine.low %v572_v34, %v572_v34 }
 0x663   :  { %v581_v35 = vrot.slane %v574_v52, %v3162_v54 }
 0x665   :  { %v583_v38 = vsel %vm349_vm2, %v559_v55, %v581_v35 }
 0x666   :  { %2837 = vtanh.f32 %v583_v38  ;;  %v2711_v46 = vmul.f32 -1.442695, %v583_v38 }
 0x668   :  { %2839 = vpow2.f32 %v2711_v46 }
 0x673   :  { %v2838_v40 = vpop.eup %2837 }
 0x674   :  { %593 = vrot.lane.b32.xlu0 %v2838_v40, %s2982_s7 }
 0x675   :  { %v2840_v49 = vpop.eup %2839 }
 0x676   :  { %v587_v41 = vadd.f32 1.0, %v2840_v49 }
 0x678   :  { %610 = vperm.xlu0 %2789, %v608_v45   ;;  %2841 = vrcp.f32 %v587_v41 }
 0x685   :  { %v2842_v42 = vpop.eup %2841 }
 0x686   :  { %v591_v50 = vmul.f32 %v2842_v42, %v502_v47 }
 0x6e6   :  { %v594_v43 = vpop.permute.xlu0 %593 }
 0x6e7   :  { %v596_v44 = vmul.f32 %v2842_v42, %v594_v43 }
 0x6e9   :  { %598 = vrot.lane.b32.xlu1 %v596_v44, %s2982_s7 }
 0x6f3   :  { %v3279_v59 = vpop.permute.xlu0 %610 }
 0x6f4   :  { %vm612_vm8 = vcmp.eq.s32.totalorder %v3279_v59, 1 }
 0x75b   :  { %v599_v53 = vpop.permute.xlu1 %598 }
 0x75c   :  { %v601_v56 = vadd.f32 %v599_v53, %v591_v50 }
 0x75e   :  { %2843 = vtanh.f32 %v601_v56  ;;  %v614_v55 = vsel %vm612_vm8, %v601_v56, %v502_v47  ;;  %v784_v56 = vrot.slane %v226_v14, 2 }
 0x76b   :  { %v2844_v57 = vpop.eup %2843 }
 0x76c   :  { %604 = vrot.lane.b32.xlu1 %v2844_v57, %s2982_s7 }
 0x7de   :  { %v605_v60 = vpop.permute.xlu1 %604 }
 0x7df   :  { %v607_v61 = vmul.f32 %v2842_v42, %v605_v60 }
 0x7e1   :  { %v3285_v63 = vsel %vm612_vm8, %v607_v61, %v3238_v18 }
 0x7e2   :  { %v623_v0 = vpack.c.bf16 %v3285_v63, %v3285_v63 }
 0x7e4   :  { %625 = vrot.lane.b32.xlu1 %v623_v0, %s2983_s23 }
 0x856   :  { %v626_v1 = vpop.permute.xlu1 %625 }
 0x857   :  { %2712 = vmatmul.mubr.msk.bf16.vlgmr.msra.gmra.mxu0 %vm280_vm1, %v626_v1 }
 0x858   :  { %867 = vmatpush1.bf16.msra.mxu0 %v3105_v17  ;;  %886 = vmatprep.mubr.bf16.mxu0 %v2979_v2 }
 0x859   :  { %868 = vmatprep.subr.bf16.mxu0 %v3111_v22 }
 0x85c   :  { %869 = vmatpush1.bf16.msra.mxu0 %v3117_v23 }
 0x85d   :  { %1090 = vmatprep.subr.bf16.mxu0 %v3100_v15  ;;  %v2694_v15 = vld [vmem:[%s3894_s1 + $0xc] sm:$0xf] }
 0x85e   :  { %vm56_vm9 = vcmp.gt.f32.partialorder %v2694_v15, 0.0 }
 0x85f   :  { %v720_v27 = vsel %vm56_vm9, 1, %v2979_v2 }
 0x917   :  { %v664_v4 = vpop.f32.mrf.mxu0 }
 0x918   :  { %v671_v19 = vadd.f32 %v664_v4, %v226_v14 }
 0x919   :  { %v666_v5 = vpop.f32.mrf.mxu0 }
 0x91a   :  { %v681_v6 = vrot.slane %v666_v5, %v3162_v54 }
 0x91b   :  { %v668_v7 = vpop.f32.mrf.mxu0 }
 0x91c   :  { %v682_v9 = vcombine.high %v681_v6, %v681_v6  ;;  %v2695_v6 = vld [vmem:[%s3894_s1 + $0x10] sm:$0xf] }
 0x91d   :  { %v669_v10 = vpop.f32.mrf.mxu0  ;;  %vm59_vm11 = vcmp.gt.f32.partialorder %v2695_v6, 0.0 }
 0x91e   :  { %v684_v11 = vadd.f32 %v682_v9, %v672_v8  ;;  %v832_v8 = vsel %vm59_vm11, 1, %v2979_v2  ;;  %vm1342_vm11 = vcmask 523264  }
 0x920   :  { %v686_v16 = vcombine.low %v684_v11, %v684_v11 }
 0x922   :  { %v693_v20 = vrot.slane %v686_v16, %v3162_v54 }
 0x924   :  { %v695_v24 = vsel %vm349_vm2, %v671_v19, %v693_v20 }
 0x925   :  { %2845 = vtanh.f32 %v695_v24  ;;  %v2713_v28 = vmul.f32 -1.442695, %v695_v24 }
 0x927   :  { %2847 = vpow2.f32 %v2713_v28 }
 0x932   :  { %v2846_v26 = vpop.eup %2845 }
 0x933   :  { %705 = vrot.lane.b32.xlu0 %v2846_v26, %s2982_s7 }
 0x934   :  { %v2848_v30 = vpop.eup %2847 }
 0x935   :  { %v699_v31 = vadd.f32 1.0, %v2848_v30 }
 0x937   :  { %722 = vperm.xlu0 %2789, %v720_v27   ;;  %2849 = vrcp.f32 %v699_v31 }
 0x944   :  { %v2850_v32 = vpop.eup %2849 }
 0x945   :  { %v703_v35 = vmul.f32 %v2850_v32, %v614_v55 }
 0x9a5   :  { %v706_v34 = vpop.permute.xlu0 %705 }
 0x9a6   :  { %v708_v52 = vmul.f32 %v2850_v32, %v706_v34 }
 0x9a8   :  { %710 = vrot.lane.b32.xlu1 %v708_v52, %s2982_s7 }
 0x9b2   :  { %v3311_v45 = vpop.permute.xlu0 %722 }
 0x9b3   :  { %vm724_vm10 = vcmp.eq.s32.totalorder %v3311_v45, 1 }
 0xa1a   :  { %v711_v38 = vpop.permute.xlu1 %710 }
 0xa1b   :  { %v713_v39 = vadd.f32 %v711_v38, %v703_v35 }
 0xa1d   :  { %2851 = vtanh.f32 %v713_v39  ;;  %v726_v19 = vsel %vm724_vm10, %v713_v39, %v614_v55  ;;  %v896_v39 = vrot.slane %v3265_v51, 2 }
 0xa2a   :  { %v2852_v40 = vpop.eup %2851 }
 0xa2b   :  { %716 = vrot.lane.b32.xlu1 %v2852_v40, %s2982_s7 }
 0xa9d   :  { %v717_v46 = vpop.permute.xlu1 %716 }
 0xa9e   :  { %v719_v49 = vmul.f32 %v2850_v32, %v717_v46 }
 0xaa0   :  { %v3317_v41 = vsel %vm724_vm10, %v719_v49, %v3285_v63 }
 0xaa1   :  { %v735_v42 = vpack.c.bf16 %v3317_v41, %v3317_v41 }
 0xaa3   :  { %737 = vrot.lane.b32.xlu0 %v735_v42, %s2983_s23 }
 0xb15   :  { %v738_v43 = vpop.permute.xlu0 %737 }
 0xb16   :  { %2714 = vmatmul.mubr.msk.bf16.vlgmr.msra.gmra.mxu1 %vm280_vm1, %v738_v43 }
 0xb17   :  { %979 = vmatpush1.bf16.msra.mxu1 %v3105_v17  ;;  %998 = vmatprep.mubr.bf16.mxu1 %v2979_v2 }
 0xb18   :  { %980 = vmatprep.subr.bf16.mxu1 %v3111_v22 }
 0xb1b   :  { %981 = vmatpush1.bf16.msra.mxu1 %v3117_v23 }
 0xbd6   :  { %v776_v44 = vpop.f32.mrf.mxu1 }
 0xbd7   :  { %v783_v1 = vadd.f32 %v776_v44, %v3253_v21 }
 0xbd8   :  { %v778_v47 = vpop.f32.mrf.mxu1 }
 0xbd9   :  { %v793_v50 = vrot.slane %v778_v47, %v3162_v54 }
 0xbda   :  { %v780_v53 = vpop.f32.mrf.mxu1 }
 0xbdb   :  { %v794_v57 = vcombine.high %v793_v50, %v793_v50 }
 0xbdc   :  { %v781_v60 = vpop.f32.mrf.mxu1 }
 0xbdd   :  { %v796_v61 = vadd.f32 %v794_v57, %v784_v56 }
 0xbdf   :  { %v798_v0 = vcombine.low %v796_v61, %v796_v61 }
 0xbe1   :  { %v805_v4 = vrot.slane %v798_v0, %v3162_v54 }
 0xbe3   :  { %v807_v5 = vsel %vm349_vm2, %v783_v1, %v805_v4 }
 0xbe4   :  { %2853 = vtanh.f32 %v807_v5  ;;  %v2715_v9 = vmul.f32 -1.442695, %v807_v5 }
 0xbe6   :  { %2855 = vpow2.f32 %v2715_v9 }
 0xbf1   :  { %v2854_v7 = vpop.eup %2853 }
 0xbf2   :  { %817 = vrot.lane.b32.xlu1 %v2854_v7, %s2982_s7 }
 0xbf3   :  { %v2856_v10 = vpop.eup %2855 }
 0xbf4   :  { %v811_v21 = vadd.f32 1.0, %v2856_v10 }
 0xbf6   :  { %834 = vperm.xlu1 %2788, %v832_v8   ;;  %2857 = vrcp.f32 %v811_v21 }
 0xc03   :  { %v2858_v11 = vpop.eup %2857 }
 0xc04   :  { %v815_v20 = vmul.f32 %v2858_v11, %v726_v19 }
 0xc64   :  { %v818_v14 = vpop.permute.xlu1 %817 }
 0xc65   :  { %v820_v16 = vmul.f32 %v2858_v11, %v818_v14 }
 0xc67   :  { %822 = vrot.lane.b32.xlu0 %v820_v16, %s2982_s7 }
 0xc71   :  { %v3340_v27 = vpop.permute.xlu1 %834 }
 0xc72   :  { %vm836_vm12 = vcmp.eq.s32.totalorder %v3340_v27, 1 }
 0xcd9   :  { %v823_v24 = vpop.permute.xlu0 %822 }
 0xcda   :  { %v825_v15 = vadd.f32 %v823_v24, %v815_v20 }
 0xcdc   :  { %2859 = vtanh.f32 %v825_v15  ;;  %v838_v60 = vsel %vm836_vm12, %v825_v15, %v726_v19  ;;  %v1008_v19 = vrot.slane %v3218_v48, 2 }
 0xce9   :  { %v2860_v26 = vpop.eup %2859 }
 0xcea   :  { %828 = vrot.lane.b32.xlu0 %v2860_v26, %s2982_s7 }
 0xd5c   :  { %v829_v28 = vpop.permute.xlu0 %828 }
 0xd5d   :  { %v831_v30 = vmul.f32 %v2858_v11, %v829_v28 }
 0xd5f   :  { %v3346_v31 = vsel %vm836_vm12, %v831_v30, %v3317_v41 }
 0xd60   :  { %v847_v32 = vpack.c.bf16 %v3346_v31, %v3346_v31 }
 0xd62   :  { %849 = vrot.lane.b32.xlu1 %v847_v32, %s2983_s23 }
 0xdd4   :  { %v850_v34 = vpop.permute.xlu1 %849 }
 0xdd5   :  { %2716 = vmatmul.mubr.msk.bf16.vlgmr.msra.gmra.mxu0 %vm280_vm1, %v850_v34  ;;  %v2697_v34 = vld [vmem:[%s3894_s1 + $0x18] sm:$0xf] }
 0xdd6   :  { %1091 = vmatpush1.bf16.msra.mxu0 %v3105_v17  ;;  %1110 = vmatprep.mubr.bf16.mxu0 %v2979_v2  ;;  %vm65_vm15 = vcmp.gt.f32.partialorder %v2697_v34, 0.0 }
 0xdd7   :  { %1092 = vmatprep.subr.bf16.mxu0 %v3111_v22  ;;  %v2696_v22 = vld [vmem:[%s3894_s1 + $0x14] sm:$0xf]  ;;  %v1056_v48 = vsel %vm65_vm15, 1, %v2979_v2  ;;  %vm2985_vm15 = vmmov 0  }
 0xdd8   :  { %vm62_vm13 = vcmp.gt.f32.partialorder %v2696_v22, 0.0 }
 0xdd9   :  { %v944_v51 = vsel %vm62_vm13, 1, %v2979_v2 }
 0xdda   :  { %1093 = vmatpush1.bf16.msra.mxu0 %v3117_v23 }
 0xe95   :  { %v888_v52 = vpop.f32.mrf.mxu0 }
 0xe96   :  { %v895_v43 = vadd.f32 %v888_v52, %v3257_v25 }
 0xe97   :  { %v890_v55 = vpop.f32.mrf.mxu0 }
 0xe98   :  { %v905_v35 = vrot.slane %v890_v55, %v3162_v54 }
 0xe99   :  { %v892_v38 = vpop.f32.mrf.mxu0 }
 0xe9a   :  { %v906_v40 = vcombine.high %v905_v35, %v905_v35 }
 0xe9b   :  { %v893_v46 = vpop.f32.mrf.mxu0 }
 0xe9c   :  { %v908_v49 = vadd.f32 %v906_v40, %v896_v39 }
 0xe9e   :  { %v910_v42 = vcombine.low %v908_v49, %v908_v49 }
 0xea0   :  { %v917_v17 = vrot.slane %v910_v42, %v3162_v54 }
 0xea2   :  { %v919_v44 = vsel %vm349_vm2, %v895_v43, %v917_v17 }
 0xea3   :  { %2861 = vtanh.f32 %v919_v44  ;;  %v2717_v47 = vmul.f32 -1.442695, %v919_v44 }
 0xea5   :  { %2863 = vpow2.f32 %v2717_v47 }
 0xeb0   :  { %v2862_v23 = vpop.eup %2861 }
 0xeb1   :  { %929 = vrot.lane.b32.xlu0 %v2862_v23, %s2982_s7 }
 0xeb2   :  { %v2864_v50 = vpop.eup %2863 }
 0xeb3   :  { %v923_v25 = vadd.f32 1.0, %v2864_v50 }
 0xeb5   :  { %946 = vperm.xlu0 %2789, %v944_v51   ;;  %2865 = vrcp.f32 %v923_v25 }
 0xec2   :  { %v2866_v53 = vpop.eup %2865 }
 0xec3   :  { %v927_v61 = vmul.f32 %v2866_v53, %v838_v60 }
 0xf23   :  { %v930_v56 = vpop.permute.xlu0 %929 }
 0xf24   :  { %v932_v57 = vmul.f32 %v2866_v53, %v930_v56 }
 0xf26   :  { %934 = vrot.lane.b32.xlu1 %v932_v57, %s2982_s7 }
 0xf30   :  { %v3370_v5 = vpop.permute.xlu0 %946 }
 0xf31   :  { %vm948_vm14 = vcmp.eq.s32.totalorder %v3370_v5, 1 }
 0xf98   :  { %v935_v0 = vpop.permute.xlu1 %934 }
 0xf99   :  { %v937_v1 = vadd.f32 %v935_v0, %v927_v61 }
 0xf9b   :  { %2867 = vtanh.f32 %v937_v1  ;;  %v3396_v46 = vsel %vm948_vm14, %v937_v1, %v838_v60  ;;  %v1120_v60 = vrot.slane %v3180_v3, 2 }
 0xfa8   :  { %v2868_v4 = vpop.eup %2867 }
 0xfa9   :  { %940 = vrot.lane.b32.xlu1 %v2868_v4, %s2982_s7 }
0x101b   :  { %v941_v6 = vpop.permute.xlu1 %940 }
0x101c   :  { %v943_v7 = vmul.f32 %v2866_v53, %v941_v6 }
0x101e   :  { %v3376_v8 = vsel %vm948_vm14, %v943_v7, %v3346_v31 }
0x101f   :  { %v959_v9 = vpack.c.bf16 %v3376_v8, %v3376_v8 }
0x1021   :  { %961 = vrot.lane.b32.xlu0 %v959_v9, %s2983_s23 }
0x1093   :  { %v962_v10 = vpop.permute.xlu0 %961 }
0x1094   :  { %2718 = vmatmul.mubr.msk.bf16.vlgmr.msra.gmra.mxu1 %vm280_vm1, %v962_v10  ;;  %v2698_v10 = vld [vmem:[%s3894_s1 + $0x1c] sm:$0xf] }
0x1095   :  { %1378 = vmatprep.mubr.bf16.mxu1 %v2979_v2  ;;  %vm68_vm3 = vcmp.gt.f32.partialorder %v2698_v10, 0.0 }
0x1096   :  { %v1168_v3 = vsel %vm68_vm3, 1, %v2979_v2 }
0x1154   :  { %v1000_v21 = vpop.f32.mrf.mxu1 }
0x1155   :  { %v1007_v28 = vadd.f32 %v1000_v21, %v3169_v58 }
0x1156   :  { %v1002_v11 = vpop.f32.mrf.mxu1 }
0x1157   :  { %v1017_v14 = vrot.slane %v1002_v11, %v3162_v54 }
0x1158   :  { %v1004_v16 = vpop.f32.mrf.mxu1 }
0x1159   :  { %v1018_v20 = vcombine.high %v1017_v14, %v1017_v14 }
0x115a   :  { %v1005_v24 = vpop.f32.mrf.mxu1 }
0x115b   :  { %v1020_v15 = vadd.f32 %v1018_v20, %v1008_v19 }
0x115d   :  { %v1022_v26 = vcombine.low %v1020_v15, %v1020_v15 }
0x115f   :  { %v1029_v30 = vrot.slane %v1022_v26, %v3162_v54 }
0x1161   :  { %v1031_v32 = vsel %vm349_vm2, %v1007_v28, %v1029_v30 }
0x1162   :  { %2869 = vtanh.f32 %v1031_v32  ;;  %v2719_v55 = vmul.f32 -1.442695, %v1031_v32 }
0x1164   :  { %2871 = vpow2.f32 %v2719_v55 }
0x116f   :  { %v2870_v52 = vpop.eup %2869 }
0x1170   :  { %1041 = vrot.lane.b32.xlu1 %v2870_v52, %s2982_s7 }
0x1171   :  { %v2872_v35 = vpop.eup %2871 }
0x1172   :  { %v1035_v58 = vadd.f32 1.0, %v2872_v35 }
0x1174   :  { %1058 = vperm.xlu1 %2788, %v1056_v48   ;;  %2873 = vrcp.f32 %v1035_v58 }
0x1181   :  { %v2874_v38 = vpop.eup %2873 }
0x1182   :  { %v1039_v49 = vmul.f32 %v2874_v38, %v3396_v46 }
0x11e2   :  { %v1042_v39 = vpop.permute.xlu1 %1041 }
0x11e3   :  { %v1044_v40 = vmul.f32 %v2874_v38, %v1042_v39  ;;  %v2799_v39 = vld [vmem:[%s3901_s8 + $0x30] ss:$8 sps:$4 sm:$0xff]  }
0x11e5   :  { %1046 = vrot.lane.b32.xlu0 %v1044_v40, %s2982_s7  ;;  %v2801_v40 = vld [vmem:[%s3901_s8 + $0x34] ss:$8 sps:$4 sm:$0xff]  }
0x11e6   :  { %1354 = vmatprep.subr.bf16.mxu1 %v2801_v40 }
0x11e7   :  { %1355 = vmatpush1.bf16.msra.mxu1 %v2799_v39 }
0x11ef   :  { %v3400_v44 = vpop.permute.xlu1 %1058 }
0x11f0   :  { %vm1060_vm0 = vcmp.eq.s32.totalorder %v3400_v44, 1 }
0x1257   :  { %v1047_v42 = vpop.permute.xlu0 %1046 }
0x1258   :  { %v1049_v43 = vadd.f32 %v1047_v42, %v1039_v49 }
0x125a   :  { %2875 = vtanh.f32 %v1049_v43  ;;  %v1062_v26 = vsel %vm1060_vm0, %v1049_v43, %v3396_v46  ;;  %v2804_v43 = vld [vmem:[%s3901_s8 + $0x24] ss:$8 sps:$4 sm:$0xff]  }
0x125b   :  { %1356 = vmatprep.subr.bf16.mxu1 %v2804_v43 }
0x1267   :  { %v2876_v17 = vpop.eup %2875 }
0x1268   :  { %1052 = vrot.lane.b32.xlu0 %v2876_v17, %s2982_s7  ;;  %v2802_v17 = vld [vmem:[%s3901_s8 + $0x20] ss:$8 sps:$4 sm:$0xff]  }
0x1269   :  { %1357 = vmatpush1.bf16.msra.mxu1 %v2802_v17 }
0x12da   :  { %v1053_v22 = vpop.permute.xlu0 %1052 }
0x12db   :  { %v1055_v23 = vmul.f32 %v2874_v38, %v1053_v22 }
0x12dd   :  { %v3406_v51 = vsel %vm1060_vm0, %v1055_v23, %v3376_v8  ;;  %v2807_v23 = vld [vmem:[%s3901_s8 + $0x14] ss:$8 sps:$4 sm:$0xff]  }
0x12de   :  { %v1071_v47 = vpack.c.bf16 %v3406_v51, %v3406_v51  ;;  %1358 = vmatprep.subr.bf16.mxu1 %v2807_v23 }
0x12e0   :  { %1073 = vrot.lane.b32.xlu1 %v1071_v47, %s2983_s23  ;;  %v2810_v47 = vld [vmem:[%s3901_s8 + $0x4] ss:$8 sps:$4 sm:$0xff]  }
0x1352   :  { %v1074_v50 = vpop.permute.xlu1 %1073 }
0x1353   :  { %2720 = vmatmul.mubr.msk.bf16.vlgmr.msra.gmra.mxu0 %vm280_vm1, %v1074_v50  ;;  %v3495_v50 = vld [vmem:[%s3902_s9 + $0x14] ss:$8 sps:$4 sm:$0xff]  }
0x1354   :  { %1501 = vmatprep.mubr.bf16.mxu0 %v2979_v2  ;;  %1481 = vmatprep.subr.bf16.mxu0 %v3495_v50 }
0x1413   :  { %v1112_v25 = vpop.f32.mrf.mxu0 }
0x1414   :  { %v1119_v6 = vadd.f32 %v1112_v25, %v3176_v62  ;;  %v2808_v25 = vld [vmem:[%s3901_s8] ss:$8 sps:$4 sm:$0xff]  }
0x1415   :  { %v1114_v53 = vpop.f32.mrf.mxu0 }
0x1416   :  { %v1129_v56 = vrot.slane %v1114_v53, %v3162_v54  ;;  %v3503_v53 = vld [vmem:[%s3902_s9 + $0x10] ss:$8 sps:$4 sm:$0xff]  }
0x1417   :  { %v1116_v57 = vpop.f32.mrf.mxu0  ;;  %1482 = vmatpush1.bf16.msra.mxu0 %v3503_v53 }
0x1418   :  { %v1130_v61 = vcombine.high %v1129_v56, %v1129_v56  ;;  %v3510_v57 = vld [vmem:[%s3902_s9 + $0x4] ss:$8 sps:$4 sm:$0xff]  }
0x1419   :  { %v1117_v0 = vpop.f32.mrf.mxu0  ;;  %1483 = vmatprep.subr.bf16.mxu0 %v3510_v57 }
0x141a   :  { %v1132_v1 = vadd.f32 %v1130_v61, %v1120_v60  ;;  %v3517_v60 = vld [vmem:[%s3902_s9] ss:$8 sps:$4 sm:$0xff]   ;;  %v3522_v61 = vld [vmem:[%s3896_s3 + $0x4] sm:$0xf] }
0x141b   :  { %v2732_v0 = vld [vmem:[%s3897_s4 + $0x4] sm:$0xf]  ;;  %1484 = vmatpush1.bf16.msra.mxu0 %v3517_v60 }
0x141c   :  { %v1134_v4 = vcombine.low %v1132_v1, %v1132_v1  ;;  %v1445_v1 = vpack.c.bf16 %v3522_v61, %v3522_v61  ;;  %1595 = vmatprep.subr.bf16.mxu0 %v3495_v50 }
0x141e   :  { %v1141_v7 = vrot.slane %v1134_v4, %v3162_v54  ;;  %2737 = vmatmul.mubr.msk.bf16.vlgmr.msra.gmra.mxu0 %vm280_vm1, %v1445_v1 }
0x141f   :  { %1596 = vmatpush1.bf16.msra.mxu0 %v3503_v53  ;;  %1615 = vmatprep.mubr.bf16.mxu0 %v2979_v2 }
0x1420   :  { %v1143_v9 = vsel %vm349_vm2, %v1119_v6, %v1141_v7  ;;  %1597 = vmatprep.subr.bf16.mxu0 %v3510_v57 }
0x1421   :  { %2877 = vtanh.f32 %v1143_v9  ;;  %v2721_v62 = vmul.f32 -1.442695, %v1143_v9 }
0x1423   :  { %2879 = vpow2.f32 %v2721_v62  ;;  %1598 = vmatpush1.bf16.msra.mxu0 %v3517_v60 }
0x1424   :  { %1809 = vmatprep.subr.bf16.mxu0 %v3495_v50 }
0x142e   :  { %v2878_v21 = vpop.eup %2877 }
0x142f   :  { %1153 = vrot.lane.b32.xlu0 %v2878_v21, %s2982_s7 }
0x1430   :  { %v2880_v11 = vpop.eup %2879 }
0x1431   :  { %v1147_v14 = vadd.f32 1.0, %v2880_v11 }
0x1433   :  { %1170 = vperm.xlu0 %2789, %v1168_v3   ;;  %2881 = vrcp.f32 %v1147_v14 }
0x1437   :  { %391 = vrot.lane.b32.xlu0 %v3203_v33, %s2983_s23 }
0x143b   :  { %616 = vrot.lane.b32.xlu0 %v3285_v63, %s2983_s23 }
0x143f   :  { %840 = vrot.lane.b32.xlu0 %v3346_v31, %s2983_s23 }
0x1440   :  { %v2882_v16 = vpop.eup %2881 }
0x1441   :  { %v1151_v28 = vmul.f32 %v2882_v16, %v1062_v26 }
0x1443   :  { %1064 = vrot.lane.b32.xlu0 %v3406_v51, %s2983_s23 }
0x14a1   :  { %v1154_v19 = vpop.permute.xlu0 %1153 }
0x14a2   :  { %v1156_v20 = vmul.f32 %v2882_v16, %v1154_v19 }
0x14a4   :  { %1158 = vrot.lane.b32.xlu1 %v1156_v20, %s2982_s7 }
0x14ae   :  { %v3432_v33 = vpop.permute.xlu0 %1170 }
0x14af   :  { %vm1172_vm9 = vcmp.eq.s32.totalorder %v3432_v33, 1 }
0x14b2   :  { %v392_v63 = vpop.permute.xlu0 %391 }
0x14b3   :  { %395 = vst.msk [vmem:[#allocation2] sm:$0x3] %vm394_vm5, %v392_v63 }
0x14b4   :  { %398 = vst.msk [vmem:[#allocation3 + $0xc] sm:$0xc] %vm397_vm7, %v392_v63 }
0x14b6   :  { %v617_v31 = vpop.permute.xlu0 %616 }
0x14b7   :  { %620 = vst.msk [vmem:[#allocation2 + $0x4] sm:$0x3] %vm394_vm5, %v617_v31 }
0x14b8   :  { %622 = vst.msk [vmem:[#allocation3 + $0x8] sm:$0xc] %vm397_vm7, %v617_v31 }
0x14ba   :  { %v841_v24 = vpop.permute.xlu0 %840  ;;  %v1181_v3 = vld [vmem:[#allocation2] sm:$0x3] }
0x14bb   :  { %844 = vst.msk [vmem:[#allocation2 + $0x8] sm:$0x3] %vm394_vm5, %v841_v24  ;;  %v1196_v46 = vld [vmem:[#allocation3 + $0xe] sm:$0x3] }
0x14bc   :  { %846 = vst.msk [vmem:[#allocation3 + $0x4] sm:$0xc] %vm397_vm7, %v841_v24 }
0x14be   :  { %v1065_v15 = vpop.permute.xlu0 %1064  ;;  %v1183_v11 = vld [vmem:[#allocation2 + $0x4] sm:$0x3] }
0x14bf   :  { %1068 = vst.msk [vmem:[#allocation2 + $0xc] sm:$0x3] %vm394_vm5, %v1065_v15  ;;  %v1194_v38 = vld [vmem:[#allocation3 + $0xa] sm:$0x3] }
0x14c0   :  { %1070 = vst.msk [vmem:[#allocation3] sm:$0xc] %vm397_vm7, %v1065_v15 }
0x14c2   :  { %v1185_v14 = vld [vmem:[#allocation2 + $0x8] sm:$0x3] }
0x14de   :  { %v1503_v43 = vpop.f32.mrf.mxu0 }
0x14e0   :  { %v1505_v17 = vpop.f32.mrf.mxu0 }
0x1516   :  { %v1159_v30 = vpop.permute.xlu1 %1158 }
0x1517   :  { %v1161_v32 = vadd.f32 %v1159_v30, %v1151_v28 }
0x1519   :  { %2883 = vtanh.f32 %v1161_v32 }
0x1526   :  { %v2884_v34 = vpop.eup %2883 }
0x1527   :  { %1164 = vrot.lane.b32.xlu1 %v2884_v34, %s2982_s7 }
0x152b   :  { %504 = vrot.lane.b32.xlu1 %v3238_v18, %s2983_s23  ;;  %v1190_v18 = vld [vmem:[#allocation3 + $0x2] sm:$0x3] }
0x152f   :  { %728 = vrot.lane.b32.xlu1 %v3317_v41, %s2983_s23 }
0x1533   :  { %952 = vrot.lane.b32.xlu1 %v3376_v8, %s2983_s23  ;;  %v1192_v8 = vld [vmem:[#allocation3 + $0x6] sm:$0x3] }
0x1599   :  { %v1165_v52 = vpop.permute.xlu1 %1164 }
0x159a   :  { %v1167_v48 = vmul.f32 %v2882_v16, %v1165_v52 }
0x159c   :  { %v1173_v55 = vsel %vm1172_vm9, %v1167_v48, %v3406_v51  ;;  %v2805_v51 = vld [vmem:[%s3901_s8 + $0x10] ss:$8 sps:$4 sm:$0xff]  }
0x159d   :  { %1175 = vrot.lane.b32.xlu1 %v1173_v55, %s2983_s23  ;;  %v505_v35 = vpop.permute.xlu1 %504  ;;  %1359 = vmatpush1.bf16.msra.mxu1 %v2805_v51  ;;  %v1187_v55 = vld [vmem:[#allocation2 + $0xc] sm:$0x3]  ;;  %v1290_v51 = vld [vmem:[%s3903_s10] sm:$0x3] }
0x159e   :  { %508 = vst.msk [vmem:[#allocation2 + $0x2] sm:$0x3] %vm394_vm5, %v505_v35  ;;  %1360 = vmatprep.subr.bf16.mxu1 %v2810_v47  ;;  %v1295_v47 = vrot.slane %v1290_v51, %v83_v36 }
0x159f   :  { %510 = vst.msk [vmem:[#allocation3 + $0xa] sm:$0xc] %vm397_vm7, %v505_v35 }
0x15a1   :  { %1207 = vrot.lane.b32.xlu1 %v1190_v18, %s2982_s7  ;;  %v729_v41 = vpop.permute.xlu1 %728  ;;  %1361 = vmatpush1.bf16.msra.mxu1 %v2808_v25  ;;  %v1299_v25 = vrot.slane %v1290_v51, %v87_v37 }
0x15a2   :  { %732 = vst.msk [vmem:[#allocation2 + $0x6] sm:$0x3] %vm394_vm5, %v729_v41  ;;  %1702 = vmatprep.subr.bf16.mxu1 %v3495_v50 }
0x15a3   :  { %734 = vst.msk [vmem:[#allocation3 + $0x6] sm:$0xc] %vm397_vm7, %v729_v41 }
0x15a5   :  { %1211 = vrot.lane.b32.xlu1 %v1192_v8, %s2982_s7  ;;  %v953_v58 = vpop.permute.xlu1 %952  ;;  %v1182_v62 = vld [vmem:[#allocation2 + $0x2] sm:$0x3] }
0x15a6   :  { %956 = vst.msk [vmem:[#allocation2 + $0xa] sm:$0x3] %vm394_vm5, %v953_v58  ;;  %v1195_v4 = vld [vmem:[#allocation3 + $0xc] sm:$0x3] }
0x15a7   :  { %958 = vst.msk [vmem:[#allocation3 + $0x2] sm:$0xc] %vm397_vm7, %v953_v58 }
0x15a9   :  { %1215 = vrot.lane.b32.xlu1 %v1194_v38, %s2982_s7  ;;  %v1184_v24 = vld [vmem:[#allocation2 + $0x6] sm:$0x3] }
0x15aa   :  { %v1193_v42 = vld [vmem:[#allocation3 + $0x8] sm:$0x3] }
0x15ad   :  { %1219 = vrot.lane.b32.xlu1 %v1196_v46, %s2982_s7  ;;  %v1186_v15 = vld [vmem:[#allocation2 + $0xa] sm:$0x3] }
0x15ae   :  { %v1191_v49 = vld [vmem:[#allocation3 + $0x4] sm:$0x3] }
0x15af   :  { %1209 = vrot.lane.b32.xlu0 %v1191_v49, %s2982_s7 }
0x15b1   :  { %1543 = vrot.lane.b32.xlu1 %v2732_v0, %s2982_s7 }
0x15b3   :  { %1213 = vrot.lane.b32.xlu0 %v1193_v42, %s2982_s7 }
0x160f   :  { %v1176_v22 = vpop.permute.xlu1 %1175 }
0x1610   :  { %1179 = vst.msk [vmem:[#allocation2 + $0xe] sm:$0x3] %vm394_vm5, %v1176_v22 }
0x1611   :  { %1180 = vst.msk [vmem:[#allocation3 - $0x2] sm:$0xc] %vm397_vm7, %v1176_v22  ;;  %v1507_v22 = vpop.f32.mrf.mxu0 }
0x1613   :  { %v1208_v6 = vpop.permute.xlu1 %1207  ;;  %v1508_v23 = vpop.f32.mrf.mxu0 }
0x1614   :  { %v1230_v19 = vsel %vm280_vm1, %v1182_v62, %v1208_v6  ;;  %v1520_v62 = vrot.slane %v1505_v17, %v3162_v54 }
0x1617   :  { %v1212_v7 = vpop.permute.xlu1 %1211  ;;  %v1188_v34 = vld [vmem:[#allocation2 + $0xe] sm:$0x3] }
0x1618   :  { %v1189_v56 = vld [vmem:[#allocation3] sm:$0x3]  ;;  %v1232_v30 = vsel %vm280_vm1, %v1184_v24, %v1212_v7 }
0x1619   :  { %1205 = vrot.lane.b32.xlu0 %v1189_v56, %s2982_s7 }
0x161b   :  { %v1216_v10 = vpop.permute.xlu1 %1215 }
0x161c   :  { %v1234_v32 = vsel %vm280_vm1, %v1186_v15, %v1216_v10 }
0x161d   :  { %1217 = vrot.lane.b32.xlu0 %v1195_v4, %s2982_s7 }
0x161f   :  { %v1220_v26 = vpop.permute.xlu1 %1219 }
0x1620   :  { %v1236_v18 = vsel %vm280_vm1, %v1188_v34, %v1220_v26 }
0x1621   :  { %v1210_v9 = vpop.permute.xlu0 %1209 }
0x1622   :  { %v1231_v20 = vsel %vm280_vm1, %v1183_v11, %v1210_v9 }
0x1623   :  { %v1246_v52 = vcombine.low %v1231_v20, %v1232_v30 }
0x1625   :  { %v1214_v21 = vpop.permute.xlu0 %1213  ;;  %v1260_v38 = vrot.slane %v1246_v52, %v3162_v54 }
0x1626   :  { %v1233_v63 = vsel %vm280_vm1, %v1185_v14, %v1214_v21 }
0x1627   :  { %v1262_v48 = vcombine.low %v1233_v63, %v1234_v32 }
0x1629   :  { %v1270_v39 = vrot.slane %v1262_v48, %v3162_v54 }
0x168b   :  { %v1206_v16 = vpop.permute.xlu0 %1205 }
0x168c   :  { %v1229_v31 = vsel %vm280_vm1, %v1181_v3, %v1206_v16 }
0x168d   :  { %v1245_v28 = vcombine.low %v1229_v31, %v1230_v19  ;;  %v1521_v19 = vcombine.high %v1520_v62, %v1520_v62 }
0x168f   :  { %v1218_v35 = vpop.permute.xlu0 %1217  ;;  %v1253_v8 = vrot.slane %v1245_v28, %v3162_v54 }
0x1690   :  { %v1235_v41 = vsel %vm280_vm1, %v1187_v55, %v1218_v35  ;;  %v1544_v35 = vpop.permute.xlu1 %1543 }
0x1691   :  { %v1263_v58 = vcombine.low %v1235_v41, %v1236_v18  ;;  %v1261_v46 = vcombine.low %v1253_v8, %v1260_v38 }
0x1693   :  { %v1277_v40 = vrot.slane %v1263_v58, %v3162_v54 }
0x1695   :  { %v1278_v49 = vcombine.low %v1270_v39, %v1277_v40 }
0x1697   :  { %v1281_v42 = vpack.c.bf16 %v1278_v49, %v1261_v46 }
0x1699   :  { %2730 = vmatmul.mubr.msk.bf16.vlgmr.msra.gmra.mxu1 %vm1342_vm11, %v1281_v42 }
0x169a   :  { %1703 = vmatpush1.bf16.msra.mxu1 %v3503_v53  ;;  %1722 = vmatprep.mubr.bf16.mxu1 %v2979_v2 }
0x169b   :  { %1704 = vmatprep.subr.bf16.mxu1 %v3510_v57 }
0x169e   :  { %1705 = vmatpush1.bf16.msra.mxu1 %v3517_v60 }
0x169f   :  { %1916 = vmatprep.subr.bf16.mxu1 %v3495_v50 }
0x1759   :  { %v1380_v56 = vpop.f32.mrf.mxu1 }
0x175a   :  { %v3565_v1 = vadd.f32 %v1380_v56, %v1295_v47 }
0x175b   :  { %v1382_v0 = vpop.f32.mrf.mxu1 }
0x175c   :  { %v3567_v4 = vadd.f32 %v1382_v0, %v1299_v25 }
0x175d   :  { %v1384_v6 = vpop.f32.mrf.mxu1 }
0x175e   :  { %v1394_v7 = vcombine.high %v3565_v1, %v3567_v4  ;;  %v3571_v10 = vadd.f32 %v1384_v6, %v1295_v47  ;;  %v1393_v11 = vcombine.low %v3565_v1, %v3567_v4 }
0x175f   :  { %v1386_v9 = vpop.f32.mrf.mxu1 }
0x1760   :  { %v3573_v21 = vadd.f32 %v1386_v9, %v1299_v25  ;;  %v3591_v20 = vrot.slane %v1393_v11, %v3162_v54 }
0x1762   :  { %v1411_v36 = vcombine.low %v3571_v10, %v3573_v21  ;;  %v1412_v37 = vcombine.high %v3571_v10, %v3573_v21  ;;  %v1510_v24 = vadd.f32 %v1503_v43, %v3591_v20  ;;  %v3618_v56 = vcombine.high %v3591_v20, %v3591_v20 }
0x1763   :  { %v3658_v10 = vrot.slane %v1394_v7, %v3162_v54 }
0x1764   :  { %v3580_v3 = vrot.slane %v1412_v37, %v3162_v54 }
0x1766   :  { %v3587_v14 = vcombine.high %v3580_v3, %v3580_v3  ;;  %v1625_v23 = vrot.slane %v3580_v3, 2 }
0x1768   :  { %v1511_v16 = vrot.slane %v3587_v14, 2 }
0x176a   :  { %v1523_v63 = vadd.f32 %v1521_v19, %v1511_v16 }
0x176c   :  { %v1525_v31 = vcombine.low %v1523_v63, %v1523_v63 }
0x176e   :  { %v1532_v15 = vrot.slane %v1525_v31, %v3162_v54 }
0x1770   :  { %v1534_v26 = vsel %vm349_vm2, %v1510_v24, %v1532_v15 }
0x1771   :  { %2885 = vtanh.f32 %v1534_v26  ;;  %v2738_v30 = vmul.f32 -1.442695, %v1534_v26 }
0x1773   :  { %2887 = vpow2.f32 %v2738_v30 }
0x177e   :  { %v2886_v28 = vpop.eup %2885 }
0x177f   :  { %1548 = vrot.lane.b32.xlu0 %v2886_v28, %s2982_s7 }
0x1780   :  { %v2888_v32 = vpop.eup %2887 }
0x1781   :  { %v1538_v34 = vadd.f32 1.0, %v2888_v32 }
0x1783   :  { %2889 = vrcp.f32 %v1538_v34 }
0x1790   :  { %v2890_v52 = vpop.eup %2889 }
0x1791   :  { %v1546_v18 = vmul.f32 %v2890_v52, %v1544_v35 }
0x17f1   :  { %v1549_v48 = vpop.permute.xlu0 %1548 }
0x17f2   :  { %v1551_v55 = vmul.f32 %v2890_v52, %v1549_v48 }
0x17f4   :  { %1553 = vrot.lane.b32.xlu0 %v1551_v55, %s2982_s7 }
0x17f8   :  { %1564 = vrot.lane.b32.xlu0 %v3522_v61, %s2983_s23 }
0x1866   :  { %v1554_v41 = vpop.permute.xlu0 %1553 }
0x1867   :  { %v1556_v8 = vadd.f32 %v1554_v41, %v1546_v18 }
0x1869   :  { %2891 = vtanh.f32 %v1556_v8  ;;  %v1568_v15 = vsel %vm383_vm4, %v1556_v8, %v1544_v35  ;;  %v3646_v35 = vrot.slane %v1411_v36, %v3162_v54 }
0x186a   :  { %v1565_v39 = vpop.permute.xlu0 %1564 }
0x186b   :  { %v3650_v41 = vcombine.high %v3646_v35, %v3646_v35 }
0x1876   :  { %v2892_v58 = vpop.eup %2891 }
0x1877   :  { %1559 = vrot.lane.b32.xlu1 %v2892_v58, %s2982_s7 }
0x18e9   :  { %v1560_v38 = vpop.permute.xlu1 %1559 }
0x18ea   :  { %v1562_v40 = vmul.f32 %v2890_v52, %v1560_v38 }
0x18ec   :  { %v3603_v46 = vsel %vm383_vm4, %v1562_v40, %v1565_v39  ;;  %v1732_v39 = vrot.slane %v3650_v41, 2 }
0x18ed   :  { %v1576_v49 = vpack.c.bf16 %v3603_v46, %v3603_v46 }
0x18ef   :  { %1578 = vrot.lane.b32.xlu1 %v1576_v49, %s2983_s23 }
0x1961   :  { %v1579_v61 = vpop.permute.xlu1 %1578 }
0x1962   :  { %2739 = vmatmul.mubr.msk.bf16.vlgmr.msra.gmra.mxu0 %vm280_vm1, %v1579_v61 }
0x1963   :  { %1810 = vmatpush1.bf16.msra.mxu0 %v3503_v53  ;;  %1829 = vmatprep.mubr.bf16.mxu0 %v2979_v2 }
0x1964   :  { %1811 = vmatprep.subr.bf16.mxu0 %v3510_v57 }
0x1967   :  { %1812 = vmatpush1.bf16.msra.mxu0 %v3517_v60 }
0x1968   :  { %2023 = vmatprep.subr.bf16.mxu0 %v3495_v50 }
0x1a22   :  { %v1617_v42 = vpop.f32.mrf.mxu0 }
0x1a23   :  { %v1624_v6 = vadd.f32 %v1617_v42, %v3618_v56 }
0x1a24   :  { %v1619_v43 = vpop.f32.mrf.mxu0 }
0x1a25   :  { %v1634_v17 = vrot.slane %v1619_v43, %v3162_v54 }
0x1a26   :  { %v1621_v22 = vpop.f32.mrf.mxu0 }
0x1a27   :  { %v1635_v51 = vcombine.high %v1634_v17, %v1634_v17 }
0x1a28   :  { %v1622_v47 = vpop.f32.mrf.mxu0 }
0x1a29   :  { %v1637_v25 = vadd.f32 %v1635_v51, %v1625_v23 }
0x1a2b   :  { %v1639_v0 = vcombine.low %v1637_v25, %v1637_v25 }
0x1a2d   :  { %v1646_v9 = vrot.slane %v1639_v0, %v3162_v54 }
0x1a2f   :  { %v1648_v37 = vsel %vm349_vm2, %v1624_v6, %v1646_v9 }
0x1a30   :  { %2893 = vtanh.f32 %v1648_v37  ;;  %v2740_v11 = vmul.f32 -1.442695, %v1648_v37 }
0x1a32   :  { %2895 = vpow2.f32 %v2740_v11 }
0x1a3d   :  { %v2894_v62 = vpop.eup %2893 }
0x1a3e   :  { %1658 = vrot.lane.b32.xlu0 %v2894_v62, %s2982_s7 }
0x1a3f   :  { %v2896_v16 = vpop.eup %2895 }
0x1a40   :  { %v1652_v19 = vadd.f32 1.0, %v2896_v16 }
0x1a42   :  { %2897 = vrcp.f32 %v1652_v19 }
0x1a4f   :  { %v2898_v63 = vpop.eup %2897 }
0x1a50   :  { %v1656_v26 = vmul.f32 %v2898_v63, %v1568_v15 }
0x1ab0   :  { %v1659_v31 = vpop.permute.xlu0 %1658 }
0x1ab1   :  { %v1661_v24 = vmul.f32 %v2898_v63, %v1659_v31 }
0x1ab3   :  { %1663 = vrot.lane.b32.xlu1 %v1661_v24, %s2982_s7 }
0x1b25   :  { %v1664_v28 = vpop.permute.xlu1 %1663 }
0x1b26   :  { %v1666_v30 = vadd.f32 %v1664_v28, %v1656_v26 }
0x1b28   :  { %2899 = vtanh.f32 %v1666_v30  ;;  %v1674_v7 = vsel %vm500_vm6, %v1666_v30, %v1568_v15  ;;  %v1839_v15 = vrot.slane %v3646_v35, 2 }
0x1b35   :  { %v2900_v32 = vpop.eup %2899 }
0x1b36   :  { %1669 = vrot.lane.b32.xlu0 %v2900_v32, %s2982_s7  ;;  %v1410_v32 = vcombine.high %v3658_v10, %v3658_v10 }
0x1ba8   :  { %v1670_v34 = vpop.permute.xlu0 %1669 }
0x1ba9   :  { %v1672_v52 = vmul.f32 %v2898_v63, %v1670_v34 }
0x1bab   :  { %v3631_v48 = vsel %vm500_vm6, %v1672_v52, %v3603_v46 }
0x1bac   :  { %v1683_v55 = vpack.c.bf16 %v3631_v48, %v3631_v48 }
0x1bae   :  { %1685 = vrot.lane.b32.xlu1 %v1683_v55, %s2983_s23 }
0x1c20   :  { %v1686_v29 = vpop.permute.xlu1 %1685 }
0x1c21   :  { %2741 = vmatmul.mubr.msk.bf16.vlgmr.msra.gmra.mxu1 %vm280_vm1, %v1686_v29 }
0x1c22   :  { %1917 = vmatpush1.bf16.msra.mxu1 %v3503_v53  ;;  %1936 = vmatprep.mubr.bf16.mxu1 %v2979_v2 }
0x1c23   :  { %1918 = vmatprep.subr.bf16.mxu1 %v3510_v57 }
0x1c26   :  { %1919 = vmatpush1.bf16.msra.mxu1 %v3517_v60 }
0x1c27   :  { %2130 = vmatprep.subr.bf16.mxu1 %v3495_v50 }
0x1ce1   :  { %v1724_v18 = vpop.f32.mrf.mxu1 }
0x1ce2   :  { %v1731_v36 = vadd.f32 %v1724_v18, %v3658_v10 }
0x1ce3   :  { %v1726_v8 = vpop.f32.mrf.mxu1 }
0x1ce4   :  { %v1741_v58 = vrot.slane %v1726_v8, %v3162_v54 }
0x1ce5   :  { %v1728_v38 = vpop.f32.mrf.mxu1 }
0x1ce6   :  { %v1742_v40 = vcombine.high %v1741_v58, %v1741_v58 }
0x1ce7   :  { %v1729_v49 = vpop.f32.mrf.mxu1 }
0x1ce8   :  { %v1744_v61 = vadd.f32 %v1742_v40, %v1732_v39 }
0x1cea   :  { %v1746_v21 = vcombine.low %v1744_v61, %v1744_v61 }
0x1cec   :  { %v1753_v42 = vrot.slane %v1746_v21, %v3162_v54 }
0x1cee   :  { %v1755_v43 = vsel %vm349_vm2, %v1731_v36, %v1753_v42 }
0x1cef   :  { %2901 = vtanh.f32 %v1755_v43  ;;  %v2742_v22 = vmul.f32 -1.442695, %v1755_v43 }
0x1cf1   :  { %2903 = vpow2.f32 %v2742_v22 }
0x1cfc   :  { %v2902_v17 = vpop.eup %2901 }
0x1cfd   :  { %1765 = vrot.lane.b32.xlu0 %v2902_v17, %s2982_s7 }
0x1cfe   :  { %v2904_v23 = vpop.eup %2903 }
0x1cff   :  { %v1759_v51 = vadd.f32 1.0, %v2904_v23 }
0x1d01   :  { %2905 = vrcp.f32 %v1759_v51 }
0x1d0e   :  { %v2906_v47 = vpop.eup %2905 }
0x1d0f   :  { %v1763_v25 = vmul.f32 %v2906_v47, %v1674_v7 }
0x1d6f   :  { %v1766_v1 = vpop.permute.xlu0 %1765 }
0x1d70   :  { %v1768_v4 = vmul.f32 %v2906_v47, %v1766_v1 }
0x1d72   :  { %1770 = vrot.lane.b32.xlu1 %v1768_v4, %s2982_s7 }
0x1de4   :  { %v1771_v0 = vpop.permute.xlu1 %1770 }
0x1de5   :  { %v1773_v6 = vadd.f32 %v1771_v0, %v1763_v25 }
0x1de7   :  { %2907 = vtanh.f32 %v1773_v6  ;;  %v1781_v49 = vsel %vm612_vm8, %v1773_v6, %v1674_v7  ;;  %v1946_v7 = vrot.slane %v1410_v32, 2 }
0x1df4   :  { %v2908_v9 = vpop.eup %2907 }
0x1df5   :  { %1776 = vrot.lane.b32.xlu0 %v2908_v9, %s2982_s7 }
0x1e67   :  { %v1777_v37 = vpop.permute.xlu0 %1776 }
0x1e68   :  { %v1779_v62 = vmul.f32 %v2906_v47, %v1777_v37 }
0x1e6a   :  { %v3671_v11 = vsel %vm612_vm8, %v1779_v62, %v3631_v48 }
0x1e6b   :  { %v1790_v16 = vpack.c.bf16 %v3671_v11, %v3671_v11 }
0x1e6d   :  { %1792 = vrot.lane.b32.xlu1 %v1790_v16, %s2983_s23 }
0x1edf   :  { %v1793_v13 = vpop.permute.xlu1 %1792 }
0x1ee0   :  { %2743 = vmatmul.mubr.msk.bf16.vlgmr.msra.gmra.mxu0 %vm280_vm1, %v1793_v13 }
0x1ee1   :  { %2024 = vmatpush1.bf16.msra.mxu0 %v3503_v53  ;;  %2043 = vmatprep.mubr.bf16.mxu0 %v2979_v2 }
0x1ee2   :  { %2025 = vmatprep.subr.bf16.mxu0 %v3510_v57 }
0x1ee5   :  { %2026 = vmatpush1.bf16.msra.mxu0 %v3517_v60 }
0x1ee6   :  { %2237 = vmatprep.subr.bf16.mxu0 %v3495_v50 }
0x1fa0   :  { %v1831_v19 = vpop.f32.mrf.mxu0 }
0x1fa1   :  { %v1838_v52 = vadd.f32 %v1831_v19, %v1410_v32 }
0x1fa2   :  { %v1833_v63 = vpop.f32.mrf.mxu0 }
0x1fa3   :  { %v1848_v31 = vrot.slane %v1833_v63, %v3162_v54 }
0x1fa4   :  { %v1835_v24 = vpop.f32.mrf.mxu0 }
0x1fa5   :  { %v1849_v26 = vcombine.high %v1848_v31, %v1848_v31 }
0x1fa6   :  { %v1836_v28 = vpop.f32.mrf.mxu0 }
0x1fa7   :  { %v1851_v30 = vadd.f32 %v1849_v26, %v1839_v15 }
0x1fa9   :  { %v1853_v34 = vcombine.low %v1851_v30, %v1851_v30 }
0x1fab   :  { %v1860_v55 = vrot.slane %v1853_v34, %v3162_v54 }
0x1fad   :  { %v1862_v29 = vsel %vm349_vm2, %v1838_v52, %v1860_v55 }
0x1fae   :  { %2909 = vtanh.f32 %v1862_v29  ;;  %v2744_v18 = vmul.f32 -1.442695, %v1862_v29 }
0x1fb0   :  { %2911 = vpow2.f32 %v2744_v18 }
0x1fbb   :  { %v2910_v50 = vpop.eup %2909 }
0x1fbc   :  { %1872 = vrot.lane.b32.xlu0 %v2910_v50, %s2982_s7 }
0x1fbd   :  { %v2912_v8 = vpop.eup %2911 }
0x1fbe   :  { %v1866_v58 = vadd.f32 1.0, %v2912_v8 }
0x1fc0   :  { %2913 = vrcp.f32 %v1866_v58 }
0x1fcd   :  { %v2914_v38 = vpop.eup %2913 }
0x1fce   :  { %v1870_v61 = vmul.f32 %v2914_v38, %v1781_v49 }
0x202e   :  { %v1873_v39 = vpop.permute.xlu0 %1872 }
0x202f   :  { %v1875_v40 = vmul.f32 %v2914_v38, %v1873_v39  ;;  %v2053_v39 = vrot.slane %v3658_v10, 2 }
0x2031   :  { %1877 = vrot.lane.b32.xlu1 %v1875_v40, %s2982_s7 }
0x20a3   :  { %v1878_v21 = vpop.permute.xlu1 %1877 }
0x20a4   :  { %v1880_v36 = vadd.f32 %v1878_v21, %v1870_v61 }
0x20a6   :  { %2915 = vtanh.f32 %v1880_v36 }
0x20b3   :  { %v2916_v42 = vpop.eup %2915 }
0x20b4   :  { %1883 = vrot.lane.b32.xlu0 %v2916_v42, %s2982_s7 }
0x2126   :  { %v1884_v43 = vpop.permute.xlu0 %1883 }
0x2127   :  { %v1886_v17 = vmul.f32 %v2914_v38, %v1884_v43 }
0x2129   :  { %v3696_v22 = vsel %vm724_vm10, %v1886_v17, %v3671_v11 }
0x212a   :  { %v1897_v23 = vpack.c.bf16 %v3696_v22, %v3696_v22 }
0x212c   :  { %1899 = vrot.lane.b32.xlu1 %v1897_v23, %s2983_s23 }
0x219e   :  { %v1900_v59 = vpop.permute.xlu1 %1899 }
0x219f   :  { %2745 = vmatmul.mubr.msk.bf16.vlgmr.msra.gmra.mxu1 %vm280_vm1, %v1900_v59 }
0x21a0   :  { %2131 = vmatpush1.bf16.msra.mxu1 %v3503_v53  ;;  %2150 = vmatprep.mubr.bf16.mxu1 %v2979_v2 }
0x21a1   :  { %2132 = vmatprep.subr.bf16.mxu1 %v3510_v57 }
0x21a4   :  { %2133 = vmatpush1.bf16.msra.mxu1 %v3517_v60 }
0x225f   :  { %v1938_v51 = vpop.f32.mrf.mxu1 }
0x2260   :  { %v1945_v37 = vadd.f32 %v1938_v51, %v3646_v35  ;;  %v1888_v35 = vsel %vm724_vm10, %v1880_v36, %v1781_v49 }
0x2261   :  { %v1940_v47 = vpop.f32.mrf.mxu1 }
0x2262   :  { %v1955_v1 = vrot.slane %v1940_v47, %v3162_v54 }
0x2263   :  { %v1942_v4 = vpop.f32.mrf.mxu1 }
0x2264   :  { %v1956_v25 = vcombine.high %v1955_v1, %v1955_v1 }
0x2265   :  { %v1943_v0 = vpop.f32.mrf.mxu1 }
0x2266   :  { %v1958_v6 = vadd.f32 %v1956_v25, %v1946_v7 }
0x2268   :  { %v1960_v9 = vcombine.low %v1958_v6, %v1958_v6 }
0x226a   :  { %v1967_v62 = vrot.slane %v1960_v9, %v3162_v54 }
0x226c   :  { %v1969_v16 = vsel %vm349_vm2, %v1945_v37, %v1967_v62 }
0x226d   :  { %2917 = vtanh.f32 %v1969_v16  ;;  %v2746_v19 = vmul.f32 -1.442695, %v1969_v16 }
0x226f   :  { %2919 = vpow2.f32 %v2746_v19 }
0x227a   :  { %v2918_v13 = vpop.eup %2917 }
0x227b   :  { %1979 = vrot.lane.b32.xlu0 %v2918_v13, %s2982_s7  ;;  %v2160_v13 = vrot.slane %v3618_v56, 2 }
0x227c   :  { %v2920_v63 = vpop.eup %2919 }
0x227d   :  { %v1973_v31 = vadd.f32 1.0, %v2920_v63 }
0x227f   :  { %2921 = vrcp.f32 %v1973_v31 }
0x228c   :  { %v2922_v24 = vpop.eup %2921 }
0x228d   :  { %v1977_v28 = vmul.f32 %v2922_v24, %v1888_v35 }
0x22ed   :  { %v1980_v15 = vpop.permute.xlu0 %1979 }
0x22ee   :  { %v1982_v26 = vmul.f32 %v2922_v24, %v1980_v15 }
0x22f0   :  { %1984 = vrot.lane.b32.xlu1 %v1982_v26, %s2982_s7 }
0x2362   :  { %v1985_v30 = vpop.permute.xlu1 %1984 }
0x2363   :  { %v1987_v32 = vadd.f32 %v1985_v30, %v1977_v28 }
0x2365   :  { %2923 = vtanh.f32 %v1987_v32 }
0x2372   :  { %v2924_v34 = vpop.eup %2923 }
0x2373   :  { %1990 = vrot.lane.b32.xlu0 %v2924_v34, %s2982_s7 }
0x23e5   :  { %v1991_v52 = vpop.permute.xlu0 %1990 }
0x23e6   :  { %v1993_v55 = vmul.f32 %v2922_v24, %v1991_v52 }
0x23e8   :  { %v3718_v29 = vsel %vm836_vm12, %v1993_v55, %v3696_v22 }
0x23e9   :  { %v2004_v50 = vpack.c.bf16 %v3718_v29, %v3718_v29 }
0x23eb   :  { %2006 = vrot.lane.b32.xlu1 %v2004_v50, %s2983_s23 }
0x245d   :  { %v2007_v45 = vpop.permute.xlu1 %2006 }
0x245e   :  { %2747 = vmatmul.mubr.msk.bf16.vlgmr.msra.gmra.mxu0 %vm280_vm1, %v2007_v45 }
0x245f   :  { %2238 = vmatpush1.bf16.msra.mxu0 %v3503_v53  ;;  %2257 = vmatprep.mubr.bf16.mxu0 %v2979_v2 }
0x2460   :  { %2239 = vmatprep.subr.bf16.mxu0 %v3510_v57 }
0x2463   :  { %2240 = vmatpush1.bf16.msra.mxu0 %v3517_v60 }
0x251e   :  { %v2045_v18 = vpop.f32.mrf.mxu0 }
0x251f   :  { %v2052_v36 = vadd.f32 %v2045_v18, %v3650_v41  ;;  %v1995_v41 = vsel %vm836_vm12, %v1987_v32, %v1888_v35 }
0x2520   :  { %v2047_v8 = vpop.f32.mrf.mxu0 }
0x2521   :  { %v2062_v58 = vrot.slane %v2047_v8, %v3162_v54 }
0x2522   :  { %v2049_v38 = vpop.f32.mrf.mxu0 }
0x2523   :  { %v2063_v40 = vcombine.high %v2062_v58, %v2062_v58 }
0x2524   :  { %v2050_v49 = vpop.f32.mrf.mxu0 }
0x2525   :  { %v2065_v61 = vadd.f32 %v2063_v40, %v2053_v39 }
0x2527   :  { %v2067_v21 = vcombine.low %v2065_v61, %v2065_v61 }
0x2529   :  { %v2074_v53 = vrot.slane %v2067_v21, %v3162_v54 }
0x252b   :  { %v2076_v42 = vsel %vm349_vm2, %v2052_v36, %v2074_v53  ;;  %v2267_v53 = vrot.slane %v3591_v20, 2 }
0x252c   :  { %2925 = vtanh.f32 %v2076_v42  ;;  %v2748_v60 = vmul.f32 -1.442695, %v2076_v42 }
0x252e   :  { %2927 = vpow2.f32 %v2748_v60 }
0x2539   :  { %v2926_v57 = vpop.eup %2925 }
0x253a   :  { %2086 = vrot.lane.b32.xlu0 %v2926_v57, %s2982_s7 }
0x253b   :  { %v2928_v43 = vpop.eup %2927 }
0x253c   :  { %v2080_v17 = vadd.f32 1.0, %v2928_v43 }
0x253e   :  { %2929 = vrcp.f32 %v2080_v17 }
0x254b   :  { %v2930_v10 = vpop.eup %2929 }
0x254c   :  { %v2084_v51 = vmul.f32 %v2930_v10, %v1995_v41 }
0x25ac   :  { %v2087_v23 = vpop.permute.xlu0 %2086 }
0x25ad   :  { %v2089_v59 = vmul.f32 %v2930_v10, %v2087_v23 }
0x25af   :  { %2091 = vrot.lane.b32.xlu1 %v2089_v59, %s2982_s7 }
0x2621   :  { %v2092_v47 = vpop.permute.xlu1 %2091 }
0x2622   :  { %v2094_v1 = vadd.f32 %v2092_v47, %v2084_v51 }
0x2624   :  { %2931 = vtanh.f32 %v2094_v1 }
0x2631   :  { %v2932_v4 = vpop.eup %2931 }
0x2632   :  { %2097 = vrot.lane.b32.xlu0 %v2932_v4, %s2982_s7 }
0x26a4   :  { %v2098_v7 = vpop.permute.xlu0 %2097 }
0x26a5   :  { %v2100_v25 = vmul.f32 %v2930_v10, %v2098_v7  ;;  %v2381_v7 = vld [vmem:[%s3894_s1 + $0x8] sm:$0xf] }
0x26a6   :  { %vm2389_vm4 = vcmp.gt.f32.partialorder %v2381_v7, 0.0 }
0x26a7   :  { %v3741_v0 = vsel %vm948_vm14, %v2100_v25, %v3718_v29  ;;  %v2397_v25 = vsel %vm2389_vm4, 1, %v2979_v2 }
0x26a8   :  { %v2111_v6 = vpack.c.bf16 %v3741_v0, %v3741_v0 }
0x26aa   :  { %2113 = vrot.lane.b32.xlu1 %v2111_v6, %s2983_s23 }
0x271c   :  { %v2114_v27 = vpop.permute.xlu1 %2113 }
0x271d   :  { %2749 = vmatmul.mubr.msk.bf16.vlgmr.msra.gmra.mxu1 %vm280_vm1, %v2114_v27 }
0x27dd   :  { %v2152_v9 = vpop.f32.mrf.mxu1 }
0x27de   :  { %v2159_v15 = vadd.f32 %v2152_v9, %v3580_v3  ;;  %v2102_v3 = vsel %vm948_vm14, %v2094_v1, %v1995_v41 }
0x27df   :  { %v2154_v37 = vpop.f32.mrf.mxu1 }
0x27e0   :  { %v2169_v62 = vrot.slane %v2154_v37, %v3162_v54 }
0x27e1   :  { %v2156_v16 = vpop.f32.mrf.mxu1 }
0x27e2   :  { %v2170_v19 = vcombine.high %v2169_v62, %v2169_v62 }
0x27e3   :  { %v2157_v63 = vpop.f32.mrf.mxu1 }
0x27e4   :  { %v2172_v31 = vadd.f32 %v2170_v19, %v2160_v13 }
0x27e6   :  { %v2174_v24 = vcombine.low %v2172_v31, %v2172_v31 }
0x27e8   :  { %v2181_v26 = vrot.slane %v2174_v24, %v3162_v54  ;;  %v2380_v24 = vld [vmem:[%s3894_s1 + $0x4] sm:$0xf] }
0x27e9   :  { %vm2388_vm10 = vcmp.gt.f32.partialorder %v2380_v24, 0.0 }
0x27ea   :  { %v2183_v35 = vsel %vm349_vm2, %v2159_v15, %v2181_v26 }
0x27eb   :  { %2933 = vtanh.f32 %v2183_v35  ;;  %v2750_v30 = vmul.f32 -1.442695, %v2183_v35 }
0x27ed   :  { %2935 = vpow2.f32 %v2750_v30 }
0x27f8   :  { %v2934_v28 = vpop.eup %2933 }
0x27f9   :  { %2193 = vrot.lane.b32.xlu0 %v2934_v28, %s2982_s7  ;;  %v2384_v28 = vld [vmem:[%s3894_s1 + $0x14] sm:$0xf] }
0x27fa   :  { %v2936_v32 = vpop.eup %2935  ;;  %vm2392_vm13 = vcmp.gt.f32.partialorder %v2384_v28, 0.0 }
0x27fb   :  { %v2187_v34 = vadd.f32 1.0, %v2936_v32  ;;  %v2386_v32 = vld [vmem:[%s3894_s1 + $0x1c] sm:$0xf] }
0x27fc   :  { %vm2394_vm14 = vcmp.gt.f32.partialorder %v2386_v32, 0.0 }
0x27fd   :  { %2937 = vrcp.f32 %v2187_v34 }
0x280a   :  { %v2938_v56 = vpop.eup %2937 }
0x280b   :  { %v2191_v50 = vmul.f32 %v2938_v56, %v2102_v3 }
0x286b   :  { %v2194_v52 = vpop.permute.xlu0 %2193 }
0x286c   :  { %v2196_v55 = vmul.f32 %v2938_v56, %v2194_v52  ;;  %v2402_v52 = vsel %vm2394_vm14, 1, %v2979_v2  ;;  %vm2659_vm14 = vcmask 56320  }
0x286e   :  { %2198 = vrot.lane.b32.xlu1 %v2196_v55, %s2982_s7 }
0x28e0   :  { %v2199_v45 = vpop.permute.xlu1 %2198 }
0x28e1   :  { %v2201_v18 = vadd.f32 %v2199_v45, %v2191_v50 }
0x28e3   :  { %2939 = vtanh.f32 %v2201_v18  ;;  %v2209_v9 = vsel %vm1060_vm0, %v2201_v18, %v2102_v3 }
0x28f0   :  { %v2940_v8 = vpop.eup %2939 }
0x28f1   :  { %2204 = vrot.lane.b32.xlu0 %v2940_v8, %s2982_s7  ;;  %v2984_v8 = vmov 0.0  }
0x28f2   :  { %2764 = vmatprep.subr.bf16.mxu1 %v2984_v8  ;;  %2772 = vmatprep.mubr.msk.bf16.mxu1 %vm2985_vm15, %v2984_v8 }
0x2963   :  { %v2205_v58 = vpop.permute.xlu0 %2204 }
0x2964   :  { %v2207_v38 = vmul.f32 %v2938_v56, %v2205_v58  ;;  %v2400_v56 = vsel %vm2392_vm13, 1, %v2979_v2  ;;  %vm2657_vm13 = vcmask 48128  }
0x2966   :  { %v3760_v39 = vsel %vm1060_vm0, %v2207_v38, %v3741_v0  ;;  %v2818_v38 = vld [vmem:[%s3904_s11 + $0x10] sm:$0xff]  }
0x2967   :  { %v2218_v40 = vpack.c.bf16 %v3760_v39, %v3760_v39 }
0x2969   :  { %2220 = vrot.lane.b32.xlu1 %v2218_v40, %s2983_s23  ;;  %v2819_v40 = vld [vmem:[%s3904_s11 + $0x8] sm:$0xff]  }
0x29db   :  { %v2221_v5 = vpop.permute.xlu1 %2220 }
0x29dc   :  { %2751 = vmatmul.mubr.msk.bf16.vlgmr.msra.gmra.mxu0 %vm280_vm1, %v2221_v5  ;;  %v2820_v5 = vld [vmem:[%s3904_s11] sm:$0xff]  }
0x2a9c   :  { %v2259_v49 = vpop.f32.mrf.mxu0 }
0x2a9d   :  { %v2266_v17 = vadd.f32 %v2259_v49, %v3587_v14  ;;  %v2379_v14 = vld [vmem:[%s3894_s1] sm:$0xf] }
0x2a9e   :  { %v2261_v61 = vpop.f32.mrf.mxu0 }
0x2a9f   :  { %v2276_v21 = vrot.slane %v2261_v61, %v3162_v54 }
0x2aa0   :  { %v2263_v36 = vpop.f32.mrf.mxu0 }
0x2aa1   :  { %v2277_v42 = vcombine.high %v2276_v21, %v2276_v21 }
0x2aa2   :  { %v2264_v57 = vpop.f32.mrf.mxu0 }
0x2aa3   :  { %v2279_v60 = vadd.f32 %v2277_v42, %v2267_v53 }
0x2aa5   :  { %v2281_v43 = vcombine.low %v2279_v60, %v2279_v60 }
0x2aa7   :  { %v2288_v10 = vrot.slane %v2281_v43, %v3162_v54 }
0x2aa9   :  { %v2290_v23 = vsel %vm349_vm2, %v2266_v17, %v2288_v10  ;;  %vm2387_vm2 = vcmp.gt.f32.partialorder %v2379_v14, 0.0 }
0x2aaa   :  { %2941 = vtanh.f32 %v2290_v23  ;;  %v2752_v41 = vmul.f32 -1.442695, %v2290_v23 }
0x2aac   :  { %2943 = vpow2.f32 %v2752_v41 }
0x2ab7   :  { %v2942_v59 = vpop.eup %2941 }
0x2ab8   :  { %2300 = vrot.lane.b32.xlu0 %v2942_v59, %s2982_s7 }
0x2ab9   :  { %v2944_v51 = vpop.eup %2943 }
0x2aba   :  { %v2294_v47 = vadd.f32 1.0, %v2944_v51 }
0x2abc   :  { %2945 = vrcp.f32 %v2294_v47 }
0x2ac9   :  { %v2946_v20 = vpop.eup %2945 }
0x2aca   :  { %v2298_v37 = vmul.f32 %v2946_v20, %v2209_v9 }
0x2b2a   :  { %v2301_v1 = vpop.permute.xlu0 %2300 }
0x2b2b   :  { %v2303_v4 = vmul.f32 %v2946_v20, %v2301_v1 }
0x2b2d   :  { %2305 = vrot.lane.b32.xlu1 %v2303_v4, %s2982_s7 }
0x2b31   :  { %1570 = vrot.lane.b32.xlu1 %v3603_v46, %s2983_s23  ;;  %v2395_v46 = vsel %vm2387_vm2, 1, %v2979_v2 }
0x2b35   :  { %1783 = vrot.lane.b32.xlu1 %v3671_v11, %s2983_s23  ;;  %v2383_v11 = vld [vmem:[%s3894_s1 + $0x10] sm:$0xf] }
0x2b36   :  { %vm2391_vm6 = vcmp.gt.f32.partialorder %v2383_v11, 0.0 }
0x2b37   :  { %v2399_v6 = vsel %vm2391_vm6, 1, %v2979_v2 }
0x2b39   :  { %1997 = vrot.lane.b32.xlu1 %v3718_v29, %s2983_s23  ;;  %v2385_v29 = vld [vmem:[%s3894_s1 + $0x18] sm:$0xf] }
0x2b3a   :  { %vm2393_vm8 = vcmp.gt.f32.partialorder %v2385_v29, 0.0 }
0x2b3b   :  { %v2401_v27 = vsel %vm2393_vm8, 1, %v2979_v2  ;;  %vm2651_vm8 = vcmask 23552  }
0x2b3d   :  { %2211 = vrot.lane.b32.xlu1 %v3760_v39, %s2983_s23 }
0x2b41   :  { %2404 = vperm.xlu1 %2788, %v2395_v46  }
0x2b45   :  { %2410 = vperm.xlu1 %2788, %v2397_v25  }
0x2b49   :  { %2416 = vperm.xlu1 %2788, %v2399_v6  }
0x2b4d   :  { %2422 = vperm.xlu1 %2788, %v2401_v27  }
0x2b9f   :  { %v2306_v62 = vpop.permute.xlu1 %2305 }
0x2ba0   :  { %v2308_v16 = vadd.f32 %v2306_v62, %v2298_v37 }
0x2ba2   :  { %2947 = vtanh.f32 %v2308_v16 }
0x2ba3   :  { %v1571_v13 = vpop.permute.xlu1 %1570 }
0x2ba4   :  { %1573 = vst.msk [vmem:[#allocation4] sm:$0x3] %vm394_vm5, %v1571_v13 }
0x2ba5   :  { %1575 = vst.msk [vmem:[#allocation5 + $0xc] sm:$0xc] %vm397_vm7, %v1571_v13 }
0x2ba7   :  { %v1784_v19 = vpop.permute.xlu1 %1783 }
0x2ba8   :  { %1787 = vst.msk [vmem:[#allocation4 + $0x4] sm:$0x3] %vm394_vm5, %v1784_v19 }
0x2ba9   :  { %1789 = vst.msk [vmem:[#allocation5 + $0x8] sm:$0xc] %vm397_vm7, %v1784_v19 }
0x2bab   :  { %v1998_v63 = vpop.permute.xlu1 %1997  ;;  %v2323_v11 = vld [vmem:[#allocation4] sm:$0x3] }
0x2bac   :  { %2001 = vst.msk [vmem:[#allocation4 + $0x8] sm:$0x3] %vm394_vm5, %v1998_v63  ;;  %v2338_v58 = vld [vmem:[#allocation5 + $0xe] sm:$0x3] }
0x2bad   :  { %2003 = vst.msk [vmem:[#allocation5 + $0x4] sm:$0xc] %vm397_vm7, %v1998_v63 }
0x2baf   :  { %v2948_v44 = vpop.eup %2947  ;;  %v2212_v31 = vpop.permute.xlu1 %2211  ;;  %v2325_v14 = vld [vmem:[#allocation4 + $0x4] sm:$0x3] }
0x2bb0   :  { %2215 = vst.msk [vmem:[#allocation4 + $0xc] sm:$0x3] %vm394_vm5, %v2212_v31  ;;  %2311 = vrot.lane.b32.xlu0 %v2948_v44, %s2982_s7  ;;  %v2336_v18 = vld [vmem:[#allocation5 + $0xa] sm:$0x3] }
0x2bb1   :  { %2217 = vst.msk [vmem:[#allocation5] sm:$0xc] %vm397_vm7, %v2212_v31 }
0x2bb3   :  { %v2327_v29 = vld [vmem:[#allocation4 + $0x8] sm:$0x3] }
0x2bb4   :  { %1676 = vrot.lane.b32.xlu0 %v3631_v48, %s2983_s23  ;;  %v2382_v48 = vld [vmem:[%s3894_s1 + $0xc] sm:$0xf]  ;;  %v2334_v45 = vld [vmem:[#allocation5 + $0x6] sm:$0x3] }
0x2bb5   :  { %vm2390_vm12 = vcmp.gt.f32.partialorder %v2382_v48, 0.0 }
0x2bb6   :  { %v2398_v30 = vsel %vm2390_vm12, 1, %v2979_v2  ;;  %vm2655_vm12 = vcmask 39936  }
0x2bb7   :  { %v2329_v24 = vld [vmem:[#allocation4 + $0xc] sm:$0x3] }
0x2bb8   :  { %1890 = vrot.lane.b32.xlu0 %v3696_v22, %s2983_s23  ;;  %v2332_v3 = vld [vmem:[#allocation5 + $0x2] sm:$0x3] }
0x2bbc   :  { %2104 = vrot.lane.b32.xlu0 %v3741_v0, %s2983_s23  ;;  %v2396_v0 = vsel %vm2388_vm10, 1, %v2979_v2  ;;  %v2817_v2 = vld [vmem:[%s3904_s11 + $0x18] sm:$0xff]   ;;  %v2405_v53 = vpop.permute.xlu1 %2404  ;;  %vm2653_vm10 = vcmask 31744  }
0x2bbd   :  { %2765 = vmatpush3.bf16.msra.mxu1 %v2817_v2  ;;  %vm2427_vm0 = vcmp.eq.s32.totalorder %v2405_v53, 1 }
0x2bbe   :  { %2766 = vmatprep.subr.bf16.mxu1 %v2984_v8 }
0x2bc0   :  { %v2411_v57 = vpop.permute.xlu1 %2410 }
0x2bc1   :  { %2767 = vmatpush3.bf16.msra.mxu1 %v2818_v38 }
0x2bc2   :  { %2768 = vmatprep.subr.bf16.mxu1 %v2984_v8 }
0x2bc4   :  { %v2417_v43 = vpop.permute.xlu1 %2416 }
0x2bc5   :  { %2769 = vmatpush3.bf16.msra.mxu1 %v2819_v40  ;;  %vm2431_vm2 = vcmp.eq.s32.totalorder %v2417_v43, 1 }
0x2bc6   :  { %2770 = vmatprep.subr.bf16.mxu1 %v2984_v8 }
0x2bc8   :  { %v2423_v10 = vpop.permute.xlu1 %2422 }
0x2bc9   :  { %2771 = vmatpush3.bf16.msra.mxu1 %v2820_v5  ;;  %vm2433_vm4 = vcmp.eq.s32.totalorder %v2423_v10, 1 }
0x2c22   :  { %v2312_v15 = vpop.permute.xlu0 %2311 }
0x2c23   :  { %v2314_v26 = vmul.f32 %v2946_v20, %v2312_v15 }
0x2c25   :  { %v2315_v35 = vsel %vm1172_vm9, %v2314_v26, %v3760_v39  ;;  %vm2429_vm9 = vcmp.eq.s32.totalorder %v2411_v57, 1 }
0x2c26   :  { %2317 = vrot.lane.b32.xlu0 %v2315_v35, %s2983_s23  ;;  %v1677_v22 = vpop.permute.xlu0 %1676 }
0x2c27   :  { %1680 = vst.msk [vmem:[#allocation4 + $0x2] sm:$0x3] %vm394_vm5, %v1677_v22 }
0x2c28   :  { %1682 = vst.msk [vmem:[#allocation5 + $0xa] sm:$0xc] %vm397_vm7, %v1677_v22 }
0x2c2a   :  { %2407 = vperm.xlu0 %2789, %v2396_v0   ;;  %v1891_v33 = vpop.permute.xlu0 %1890 }
0x2c2b   :  { %1894 = vst.msk [vmem:[#allocation4 + $0x6] sm:$0x3] %vm394_vm5, %v1891_v33 }
0x2c2c   :  { %1896 = vst.msk [vmem:[#allocation5 + $0x6] sm:$0xc] %vm397_vm7, %v1891_v33 }
0x2c2e   :  { %2413 = vperm.xlu0 %2789, %v2398_v30   ;;  %v2105_v34 = vpop.permute.xlu0 %2104  ;;  %v2324_v47 = vld [vmem:[#allocation4 + $0x2] sm:$0x3] }
0x2c2f   :  { %2108 = vst.msk [vmem:[#allocation4 + $0xa] sm:$0x3] %vm394_vm5, %v2105_v34  ;;  %v2337_v61 = vld [vmem:[#allocation5 + $0xc] sm:$0x3] }
0x2c30   :  { %2110 = vst.msk [vmem:[#allocation5 + $0x2] sm:$0xc] %vm397_vm7, %v2105_v34 }
0x2c32   :  { %2419 = vperm.xlu0 %2789, %v2400_v56   ;;  %v2326_v1 = vld [vmem:[#allocation4 + $0x6] sm:$0x3] }
0x2c33   :  { %v2335_v50 = vld [vmem:[#allocation5 + $0x8] sm:$0x3] }
0x2c36   :  { %2425 = vperm.xlu0 %2789, %v2402_v52   ;;  %v2328_v4 = vld [vmem:[#allocation4 + $0xa] sm:$0x3] }
0x2c37   :  { %v2333_v55 = vld [vmem:[#allocation5 + $0x4] sm:$0x3] }
0x2c38   :  { %2351 = vrot.lane.b32.xlu1 %v2333_v55, %s2982_s7 }
0x2c3a   :  { %2349 = vrot.lane.b32.xlu0 %v2332_v3, %s2982_s7 }
0x2c3c   :  { %2355 = vrot.lane.b32.xlu1 %v2335_v50, %s2982_s7 }
0x2c3e   :  { %2353 = vrot.lane.b32.xlu0 %v2334_v45, %s2982_s7 }
0x2c42   :  { %2357 = vrot.lane.b32.xlu0 %v2336_v18, %s2982_s7 }
0x2c46   :  { %2361 = vrot.lane.b32.xlu0 %v2338_v58, %s2982_s7  ;;  %v2758_v58 = vld [vmem:[%s3905_s12] ss:$0 sm:$0xff] }
0x2c98   :  { %v2318_v39 = vpop.permute.xlu0 %2317 }
0x2c99   :  { %2321 = vst.msk [vmem:[#allocation4 + $0xe] sm:$0x3] %vm394_vm5, %v2318_v39 }
0x2c9a   :  { %2322 = vst.msk [vmem:[#allocation5 - $0x2] sm:$0xc] %vm397_vm7, %v2318_v39 }
0x2ca0   :  { %v2330_v62 = vld [vmem:[#allocation4 + $0xe] sm:$0x3] }
0x2ca1   :  { %v2331_v49 = vld [vmem:[#allocation5] sm:$0x3] }
0x2ca2   :  { %2347 = vrot.lane.b32.xlu1 %v2331_v49, %s2982_s7 }
0x2ca5   :  { %v2408_v21 = vpop.permute.xlu0 %2407 }
0x2ca6   :  { %2359 = vrot.lane.b32.xlu1 %v2337_v61, %s2982_s7  ;;  %vm2428_vm3 = vcmp.eq.s32.totalorder %v2408_v21, 1  ;;  %v2986_v61 = vmov 269488144  }
0x2ca7   :  { %v2584_v21 = vunpack.c.l.s4 %v2986_v61 }
0x2ca9   :  { %v2414_v36 = vpop.permute.xlu0 %2413 }
0x2caa   :  { %v2352_v59 = vpop.permute.xlu1 %2351  ;;  %vm2430_vm5 = vcmp.eq.s32.totalorder %v2414_v36, 1  ;;  %v2987_v36 = vmov 842150450  }
0x2cab   :  { %v2373_v25 = vsel %vm280_vm1, %v2325_v14, %v2352_v59  ;;  %v2591_v53 = vunpack.c.l.s4 %v2987_v36 }
0x2cac   :  { %v2437_v15 = vsel %vm2429_vm9, %v2373_v25, -9999999.0 }
0x2cad   :  { %v2420_v42 = vpop.permute.xlu0 %2419  ;;  %v2592_v10 = vunpack.c.0.s8 %v2591_v53 }
0x2cae   :  { %v2356_v51 = vpop.permute.xlu1 %2355  ;;  %vm2432_vm7 = vcmp.eq.s32.totalorder %v2420_v42, 1  ;;  %v2988_v42 = vmov 1414812756  }
0x2caf   :  { %v2375_v9 = vsel %vm280_vm1, %v2327_v29, %v2356_v51  ;;  %v2598_v57 = vunpack.c.l.s4 %v2988_v42  ;;  %v2595_v51 = vsub.s32 %v2592_v10, %v3095_v12 }
0x2cb0   :  { %v2439_v26 = vsel %vm2431_vm2, %v2375_v9, -9999999.0 }
0x2cb1   :  { %v2426_v60 = vpop.permute.xlu0 %2425 }
0x2cb2   :  { %vm2434_vm6 = vcmp.eq.s32.totalorder %v2426_v60, 1  ;;  %v2989_v60 = vmov 1987475062  }
0x2cb3   :  { %v2605_v43 = vunpack.c.l.s4 %v2989_v60 }
0x2cb5   :  { %v2350_v17 = vpop.permute.xlu0 %2349  ;;  %v2606_v59 = vunpack.c.0.s8 %v2605_v43 }
0x2cb6   :  { %v2372_v20 = vsel %vm280_vm1, %v2324_v47, %v2350_v17  ;;  %v2585_v17 = vunpack.c.0.s8 %v2584_v21 }
0x2cb7   :  { %v2436_v37 = vsel %vm2428_vm3, %v2372_v20, -9999999.0  ;;  %v2609_v20 = vsub.s32 %v2606_v59, %v3095_v12 }
0x2cb9   :  { %v2354_v23 = vpop.permute.xlu0 %2353 }
0x2cba   :  { %v2374_v7 = vsel %vm280_vm1, %v2326_v1, %v2354_v23  ;;  %v2599_v23 = vunpack.c.0.s8 %v2598_v57 }
0x2cbb   :  { %v2438_v13 = vsel %vm2430_vm5, %v2374_v7, -9999999.0 }
0x2cbc   :  { %v2452_v48 = vcombine.low %v2437_v15, %v2438_v13  ;;  %v2602_v47 = vsub.s32 %v2599_v23, %v3095_v12 }
0x2cbd   :  { %v2358_v41 = vpop.permute.xlu0 %2357 }
0x2cbe   :  { %v2376_v46 = vsel %vm280_vm1, %v2328_v4, %v2358_v41  ;;  %v2466_v34 = vrot.slane %v2452_v48, %v3162_v54  ;;  %v2588_v41 = vsub.s32 %v2585_v17, %v3095_v12  ;;  %v2661_v12 = vld [vmem:[%s3895_s2] sm:$0x3]  ;;  %s2990_s2 = smov [#allocation6]  }
0x2cbf   :  { %v2440_v19 = vsel %vm2432_vm7, %v2376_v46, -9999999.0  ;;  %vm2662_vm15 = vcmp.gt.f32.partialorder %v2661_v12, 0.0  ;;  %s2684_s4 = sshll.u32 %s2990_s2, 4  ;;  %s2685_s4 = int_to_ptr.vmem [resolvable:$true] %s2684_s4 }
0x2cc0   :  { %v2468_v22 = vcombine.low %v2439_v26, %v2440_v19  ;;  %s2957_s9 = scalar_lea.vmem %s2685_s4, 32  ;;  %p2962_p1 = scmp.lt.s32.totalorder %s2685_s4, %s2685_s4 }
0x2cc1   :  { %v2362_v6 = vpop.permute.xlu0 %2361  ;;  %p2958_p0 = scmp.ne.s32.totalorder %s2685_s4, %s2957_s9  ;;  %p2963_p2 = scmp.lt.s32.totalorder %s2957_s9, %s2957_s9 }
0x2cc2   :  { %v2378_v44 = vsel %vm280_vm1, %v2330_v62, %v2362_v6  ;;  %v2476_v56 = vrot.slane %v2468_v22, %v3162_v54 }
0x2cc3   :  { %v2442_v28 = vsel %vm2434_vm6, %v2378_v44, -9999999.0  ;;  %p2964_p3 = por %p2963_p2, %p2962_p1 }
0x2cc5   :  { %p2965_p4 = pnand %p2964_p3, %p2958_p0 }
0x2d14   :  { %v2348_v27 = vpop.permute.xlu1 %2347 }
0x2d15   :  { %v2371_v16 = vsel %vm280_vm1, %v2323_v11, %v2348_v27 }
0x2d16   :  { %v2435_v63 = vsel %vm2427_vm0, %v2371_v16, -9999999.0  ;;  %vm2664_vm0 = vcmask 58368  }
0x2d17   :  { %v2451_v31 = vcombine.low %v2435_v63, %v2436_v37 }
0x2d18   :  { %v2360_v35 = vpop.permute.xlu1 %2359 }
0x2d19   :  { %v2377_v0 = vsel %vm280_vm1, %v2329_v24, %v2360_v35  ;;  %v2459_v30 = vrot.slane %v2451_v31, %v3162_v54  ;;  %vm2647_vm1 = vcmask 7168  }
0x2d1a   :  { %v2441_v33 = vsel %vm2433_vm4, %v2377_v0, -9999999.0 }
0x2d1b   :  { %v2469_v32 = vcombine.low %v2441_v33, %v2442_v28  ;;  %v2467_v55 = vcombine.low %v2459_v30, %v2466_v34 }
0x2d1d   :  { %v2483_v52 = vrot.slane %v2469_v32, %v3162_v54 }
0x2d1f   :  { %v2484_v3 = vcombine.low %v2476_v56, %v2483_v52 }
0x2d21   :  { %v2487_v50 = vpack.c.bf16 %v2484_v3, %v2467_v55 }
0x2d23   :  { %2773 = vmatmul.mubr.msk.bf16.vlgmr.msra.gmra.mxu1 %vm1342_vm11, %v2487_v50 }
0x2de3   :  { %v2557_v45 = vpop.f32.mrf.mxu1 }
0x2de4   :  { %2949 = vtanh.f32 %v2557_v45 }
0x2de5   :  { %v2774_v18 = vpop.f32.mrf.mxu1 }
0x2de7   :  { %v2560_v2 = vpop.f32.mrf.mxu1 }
0x2de8   :  { %2951 = vtanh.f32 %v2560_v2 }
0x2de9   :  { %v2775_v8 = vpop.f32.mrf.mxu1 }
0x2df1   :  { %v2950_v38 = vpop.eup %2949 }
0x2df2   :  { %v2573_v39 = vmul.f32 %v2950_v38, %v2758_v58 }
0x2df4   :  { %v2575_v40 = vsel %vm1342_vm11, %v2573_v39, 0.0 }
0x2df5   :  { %v2952_v54 = vpop.eup %2951  ;;  %2576 = vadd.xlane.f32.xlu1 %v2575_v40 }
0x2df6   :  { %v2574_v5 = vmul.f32 %v2952_v54, %v2758_v58 }
0x2df8   :  { %v2578_v49 = vsel %vm1342_vm11, %v2574_v5, 0.0  ;;  %vm2649_vm11 = vcmask 15360  }
0x2df9   :  { %2579 = vadd.xlane.f32.xlu0 %v2578_v49 }
0x2e7e   :  { %v2577_v1 = vpop.xlane.xlu1 %2576 }
0x2e7f   :  { %v2589_v4 = vrot.slane %v2577_v1, %v2588_v41  ;;  %v2596_v14 = vrot.slane %v2577_v1, %v2595_v51  ;;  %v2603_v7 = vrot.slane %v2577_v1, %v2602_v47  ;;  %v2610_v46 = vrot.slane %v2577_v1, %v2609_v20 }
0x2e81   :  { %v2648_v11 = vsel %vm2647_vm1, %v2589_v4, %v2596_v14 }
0x2e82   :  { %v2650_v25 = vsel %vm2649_vm11, %v2648_v11, %v2603_v7  ;;  %v2580_v29 = vpop.xlane.xlu0 %2579 }
0x2e83   :  { %v2652_v6 = vsel %vm2651_vm8, %v2650_v25, %v2610_v46  ;;  %v2617_v27 = vrot.slane %v2580_v29, %v2588_v41  ;;  %v2624_v9 = vrot.slane %v2580_v29, %v2595_v51  ;;  %v2631_v37 = vrot.slane %v2580_v29, %v2602_v47 }
0x2e84   :  { %v2638_v16 = vrot.slane %v2580_v29, %v2609_v20 }
0x2e85   :  { %v2654_v62 = vsel %vm2653_vm10, %v2652_v6, %v2617_v27 }
0x2e86   :  { %v2656_v13 = vsel %vm2655_vm12, %v2654_v62, %v2624_v9 }
0x2e87   :  { %v2658_v19 = vsel %vm2657_vm13, %v2656_v13, %v2631_v37 }
0x2e88   :  { %v2660_v63 = vsel %vm2659_vm14, %v2658_v19, %v2638_v16 }
0x2e89   :  { %v2663_v44 = vsel %vm2662_vm15, %v2660_v63, -99999.0 }
0x2e8a   :  { %v2665_v31 = vsel %vm2664_vm0, %v2663_v44, -inf }
0x2e8b   :  { %2666 = vmax.xlane.f32.xlu0 %v2665_v31 }
0x2f14   :  { %v2667_v24 = vpop.xlane.xlu0 %2666 }
0x2f15   :  { %v2668_v15 = vsub.f32 %v2663_v44, %v2667_v24 }
0x2f17   :  { %v2669_v26 = vmul.f32 1.442695, %v2668_v15 }
0x2f19   :  { %2953 = vpow2.f32 %v2669_v26 }
0x2f26   :  { %v2954_v35 = vpop.eup %2953 }
0x2f27   :  { %v2671_v48 = vsel %vm2664_vm0, %v2954_v35, 0.0 }
0x2f28   :  { %2672 = vadd.xlane.f32.xlu1 %v2671_v48 }
0x2fb1   :  { %v2673_v22 = vpop.xlane.xlu1 %2672 }
0x2fb2   :  { %2955 = vlog2.f32 %v2673_v22 }
0x2fbf   :  { %v2956_v0 = vpop.eup %2955 }
0x2fc0   :  { %v2675_v28 = vmul.f32 0.6931472, %v2956_v0 }
0x2fc2   :  { %v2676_v33 = vsub.f32 %v2668_v15, %v2675_v28 }
0x2fc4   :  { %2677 = vst.msk [vmem:[#allocation6] sm:$0x3] %vm2664_vm0, %v2676_v33 }
0x2fc5   :  { %2968 = shalt.err (!%p2965_p4)
}
0x2fc6   :  { %2687 = dma.vmem_to_hbm [thread:$0]  %s2685_s4, 32, %s3906_s13, [#allocation7]  }
0x2fc7   :  { %2977 = dma.done.wait [#allocation7], 32  }
0x2fc8   :  { %2978 = vsyncadd [#allocation7], 4294967264 }
0x2fc9   :  { %2691 = vsyncpa [#allocation7], 1 }

</bundles_post_ra>
